<compile_context>
chip_gen: v6e
topology: v6e:2x2x1
jax: 0.10.0
libtpu: 0.0.40
codegen_flags: <defaults>
</compile_context>

<pallas_src>
import functools
import math

import numpy as np
import jax
import jax.numpy as jnp
from jax.experimental import pallas as pl
from jax.experimental.pallas import tpu as pltpu


# ------------------------------ small helpers -------------------------------

def _largest_divisor(n, candidates):
    for c in candidates:
        if c <= n and n % c == 0:
            return c
    return n


# ------------------------------ Pallas kernels ------------------------------

def proj1_kernel(x_ref, w_ref, b_ref, gf_ref, gb_ref):
    """gates_x for both directions from a single input stream (layer 0)."""
    g = (jnp.dot(x_ref[...].astype(jnp.bfloat16), w_ref[...],
                 preferred_element_type=jnp.float32) + b_ref[...])   # (rb, 8H)
    g4 = gf_ref.shape[-1]
    gf_ref[...] = g[:, :g4]
    gb_ref[...] = g[:, g4:]


def proj2_kernel(xf_ref, xb_ref, wf_ref, wb_ref, b_ref, gf_ref, gb_ref):
    """gates_x for both directions from the previous layer's two streams."""
    g = (jnp.dot(xf_ref[...].astype(jnp.bfloat16), wf_ref[...],
                 preferred_element_type=jnp.float32)
         + jnp.dot(xb_ref[...].astype(jnp.bfloat16), wb_ref[...],
                   preferred_element_type=jnp.float32)
         + b_ref[...])                                               # (rb, 8H)
    g4 = gf_ref.shape[-1]
    gf_ref[...] = g[:, :g4]
    gb_ref[...] = g[:, g4:]


def bilstm_kernel(gxf_ref, gxb_ref, whhf_ref, whhb_ref,
                  outf_ref, outb_ref, hf_sc, cf_sc, hb_sc, cb_sc):
    """Fused fwd+bwd LSTM recurrence over a chunk of Tc timesteps."""
    step = pl.program_id(0)

    @pl.when(step == 0)
    def _():
        hf_sc[...] = jnp.zeros_like(hf_sc)
        cf_sc[...] = jnp.zeros_like(cf_sc)
        hb_sc[...] = jnp.zeros_like(hb_sc)
        cb_sc[...] = jnp.zeros_like(cb_sc)

    H = hf_sc.shape[-1]
    Tc = gxf_ref.shape[0]

    def lstm_cell(gates, c_prev):
        # PyTorch gate order: i, f, g, o  (H=512 in production keeps these
        # slabs 128-lane aligned).
        i = jax.nn.sigmoid(gates[:, 0 * H:1 * H])
        f = jax.nn.sigmoid(gates[:, 1 * H:2 * H])
        g = jnp.tanh(gates[:, 2 * H:3 * H])
        o = jax.nn.sigmoid(gates[:, 3 * H:4 * H])
        c_new = f * c_prev + i * g
        h_new = o * jnp.tanh(c_new)
        return h_new, c_new

    def body(i, carry):
        # forward direction: local time i
        gf = gxf_ref[i] + jnp.dot(hf_sc[...].astype(jnp.bfloat16), whhf_ref[...],
                                  preferred_element_type=jnp.float32)
        hf_new, cf_new = lstm_cell(gf, cf_sc[...])
        hf_sc[...] = hf_new
        cf_sc[...] = cf_new
        outf_ref[i] = hf_new

        # backward direction: this block holds reversed-order times, so local
        # index Tc-1-i is the i-th time processed in reverse.
        j = Tc - 1 - i
        gb = gxb_ref[j] + jnp.dot(hb_sc[...].astype(jnp.bfloat16), whhb_ref[...],
                                  preferred_element_type=jnp.float32)
        hb_new, cb_new = lstm_cell(gb, cb_sc[...])
        hb_sc[...] = hb_new
        cb_sc[...] = cb_new
        outb_ref[j] = hb_new
        return carry

    jax.lax.fori_loop(0, Tc, body, 0, unroll=True)


def pool_fc_kernel(hf_ref, hb_ref, wf_ref, wb_ref, b_ref, out_ref,
                   accf_sc, accb_sc, *, inv_t):
    """Mean over time (accumulated per chunk) followed by the final Linear."""
    c = pl.program_id(0)

    @pl.when(c == 0)
    def _():
        accf_sc[...] = jnp.zeros_like(accf_sc)
        accb_sc[...] = jnp.zeros_like(accb_sc)

    accf_sc[...] += jnp.sum(hf_ref[...], axis=0)
    accb_sc[...] += jnp.sum(hb_ref[...], axis=0)

    @pl.when(c == pl.num_programs(0) - 1)
    def _():
        pooled_f = accf_sc[...] * inv_t
        pooled_b = accb_sc[...] * inv_t
        out_ref[...] = (jnp.dot(pooled_f, wf_ref[...], preferred_element_type=jnp.float32)
                        + jnp.dot(pooled_b, wb_ref[...], preferred_element_type=jnp.float32)
                        + b_ref[...])


# ------------------------------ kernel wrappers ------------------------------

def run_proj1(x2d, w, b):
    R, Din = x2d.shape
    G = w.shape[1]              # 8H (both directions)
    G4 = G // 2
    rb = _largest_divisor(R, (512, 256, 128, 64, 32, 16, 8))
    return pl.pallas_call(
        proj1_kernel,
        out_shape=(jax.ShapeDtypeStruct((R, G4), jnp.float32),
                   jax.ShapeDtypeStruct((R, G4), jnp.float32)),
        grid_spec=pltpu.PrefetchScalarGridSpec(
            num_scalar_prefetch=0,
            grid=(R // rb,),
            in_specs=[pl.BlockSpec((rb, Din), lambda r: (r, 0)),
                      pl.BlockSpec((Din, G), lambda r: (0, 0)),
                      pl.BlockSpec((1, G), lambda r: (0, 0))],
            out_specs=[pl.BlockSpec((rb, G4), lambda r: (r, 0)),
                       pl.BlockSpec((rb, G4), lambda r: (r, 0))]),
        compiler_params=pltpu.CompilerParams(
            dimension_semantics=("parallel",)),
    )(x2d, w, b)


def run_proj2(xf2d, xb2d, wf, wb, b):
    R, H = xf2d.shape
    G = wf.shape[1]             # 8H
    G4 = G // 2
    rb = _largest_divisor(R, (512, 256, 128, 64, 32, 16, 8))
    return pl.pallas_call(
        proj2_kernel,
        out_shape=(jax.ShapeDtypeStruct((R, G4), jnp.float32),
                   jax.ShapeDtypeStruct((R, G4), jnp.float32)),
        grid_spec=pltpu.PrefetchScalarGridSpec(
            num_scalar_prefetch=0,
            grid=(R // rb,),
            in_specs=[pl.BlockSpec((rb, H), lambda r: (r, 0)),
                      pl.BlockSpec((rb, H), lambda r: (r, 0)),
                      pl.BlockSpec((H, G), lambda r: (0, 0)),
                      pl.BlockSpec((H, G), lambda r: (0, 0)),
                      pl.BlockSpec((1, G), lambda r: (0, 0))],
            out_specs=[pl.BlockSpec((rb, G4), lambda r: (r, 0)),
                       pl.BlockSpec((rb, G4), lambda r: (r, 0))]),
        compiler_params=pltpu.CompilerParams(
            dimension_semantics=("parallel",)),
    )(xf2d, xb2d, wf, wb, b)


def run_bilstm(gx_f, gx_b, whh_f_t, whh_b_t):
    T, B, G4 = gx_f.shape
    H = whh_f_t.shape[0]
    Tc = _largest_divisor(T, (32, 16, 8, 4, 2, 1))
    nc = T // Tc
    return pl.pallas_call(
        bilstm_kernel,
        out_shape=(jax.ShapeDtypeStruct((T, B, H), jnp.float32),
                   jax.ShapeDtypeStruct((T, B, H), jnp.float32)),
        grid_spec=pltpu.PrefetchScalarGridSpec(
            num_scalar_prefetch=0,
            grid=(nc,),
            in_specs=[
                pl.BlockSpec((Tc, B, G4), lambda c: (c, 0, 0)),            # fwd gates
                pl.BlockSpec((Tc, B, G4), lambda c: (nc - 1 - c, 0, 0)),   # bwd gates (reversed chunks)
                pl.BlockSpec((H, G4), lambda c: (0, 0)),                   # whh fwd (bf16)
                pl.BlockSpec((H, G4), lambda c: (0, 0)),                   # whh bwd (bf16)
            ],
            out_specs=[
                pl.BlockSpec((Tc, B, H), lambda c: (c, 0, 0)),
                pl.BlockSpec((Tc, B, H), lambda c: (nc - 1 - c, 0, 0)),
            ],
            scratch_shapes=[pltpu.VMEM((B, H), jnp.float32)] * 4,          # h_f, c_f, h_b, c_b
        ),
        compiler_params=pltpu.CompilerParams(
            dimension_semantics=("arbitrary",)),   # time recurrence
    )(gx_f, gx_b, whh_f_t, whh_b_t)


def run_pool_fc(out_f, out_b, fc_wf_t, fc_wb_t, fc_b):
    T, B, H = out_f.shape
    O = fc_wf_t.shape[1]
    Tc = _largest_divisor(T, (128, 64, 32, 16, 8, 4, 2, 1))
    nc = T // Tc
    return pl.pallas_call(
        functools.partial(pool_fc_kernel, inv_t=1.0 / T),
        out_shape=jax.ShapeDtypeStruct((B, O), jnp.float32),
        grid_spec=pltpu.PrefetchScalarGridSpec(
            num_scalar_prefetch=0,
            grid=(nc,),
            in_specs=[
                pl.BlockSpec((Tc, B, H), lambda c: (c, 0, 0)),
                pl.BlockSpec((Tc, B, H), lambda c: (c, 0, 0)),
                pl.BlockSpec((H, O), lambda c: (0, 0)),
                pl.BlockSpec((H, O), lambda c: (0, 0)),
                pl.BlockSpec((1, O), lambda c: (0, 0)),
            ],
            out_specs=pl.BlockSpec((B, O), lambda c: (0, 0)),
            scratch_shapes=[pltpu.VMEM((B, H), jnp.float32)] * 2,
        ),
        compiler_params=pltpu.CompilerParams(
            dimension_semantics=("arbitrary",)),
    )(out_f, out_b, fc_wf_t, fc_wb_t, fc_b)


# ----------------------------- params & forward ------------------------------

def init_params(key, input_dim, hidden_size, num_layers, bidirectional=True):
    assert bidirectional, "this implementation targets the bidirectional config"
    H = hidden_size
    stdv = 1.0 / math.sqrt(H)
    layers = []
    in_dim = input_dim
    for l in range(num_layers):
        key, *ks = jax.random.split(key, 9)
        wih_f = jax.random.uniform(ks[0], (4 * H, in_dim), jnp.float32, -stdv, stdv)
        whh_f = jax.random.uniform(ks[1], (4 * H, H), jnp.float32, -stdv, stdv)
        bih_f = jax.random.uniform(ks[2], (4 * H,), jnp.float32, -stdv, stdv)
        bhh_f = jax.random.uniform(ks[3], (4 * H,), jnp.float32, -stdv, stdv)
        wih_b = jax.random.uniform(ks[4], (4 * H, in_dim), jnp.float32, -stdv, stdv)
        whh_b = jax.random.uniform(ks[5], (4 * H, H), jnp.float32, -stdv, stdv)
        bih_b = jax.random.uniform(ks[6], (4 * H,), jnp.float32, -stdv, stdv)
        bhh_b = jax.random.uniform(ks[7], (4 * H,), jnp.float32, -stdv, stdv)

        # (in_dim, 8H): forward-direction gate columns first, then backward.
        wih_cat_t = jnp.concatenate([wih_f.T, wih_b.T], axis=1).astype(jnp.bfloat16)
        layer = {
            "b_cat": jnp.concatenate([bih_f + bhh_f, bih_b + bhh_b]).reshape(1, 8 * H),
            "whh_f_t": whh_f.T.astype(jnp.bfloat16),   # (H, 4H)
            "whh_b_t": whh_b.T.astype(jnp.bfloat16),   # (H, 4H)
        }
        if l == 0:
            layer["wih_cat_t"] = wih_cat_t                 # (D, 8H)
        else:
            layer["wih_f_half_t"] = wih_cat_t[:H]          # rows for prev fwd stream
            layer["wih_b_half_t"] = wih_cat_t[H:]          # rows for prev bwd stream
        layers.append(layer)
        in_dim = 2 * H

    key, kw, kb = jax.random.split(key, 3)
    bound = 1.0 / math.sqrt(2 * H)
    fc_w = jax.random.uniform(kw, (2, 2 * H), jnp.float32, -bound, bound)
    fc_b = jax.random.uniform(kb, (2,), jnp.float32, -bound, bound)
    return {"layers": layers,
            "fc_wf_t": fc_w[:, :H].T,                      # (H, 2) f32
            "fc_wb_t": fc_w[:, H:].T,                      # (H, 2) f32
            "fc_b": fc_b.reshape(1, 2)}


def lstm_model_forward(params, x):
    """x: (B, C, M, N) NCHW, as in the PyTorch module."""
    B, C, M, N = x.shape
    T, D = N, C * M
    xp = jnp.transpose(x, (0, 3, 1, 2)).reshape(B, T, D)        # (B, N, C*M)
    seq = jnp.transpose(xp, (1, 0, 2)).astype(jnp.float32)      # (T, B, D)
    H = params["layers"][0]["whh_f_t"].shape[0]

    out_f = out_b = None
    for li, layer in enumerate(params["layers"]):
        if li == 0:
            gf, gb = run_proj1(seq.reshape(T * B, D), layer["wih_cat_t"], layer["b_cat"])
        else:
            gf, gb = run_proj2(out_f.reshape(T * B, H), out_b.reshape(T * B, H),
                               layer["wih_f_half_t"], layer["wih_b_half_t"],
                               layer["b_cat"])
        out_f, out_b = run_bilstm(gf.reshape(T, B, 4 * H), gb.reshape(T, B, 4 * H),
                                  layer["whh_f_t"], layer["whh_b_t"])
    return run_pool_fc(out_f, out_b, params["fc_wf_t"], params["fc_wb_t"], params["fc_b"])


# -------------------------------- pure-JAX ref --------------------------------

def ref_forward(params, x):
    """Reference with identical numerics (bf16 MXU operands, f32 everywhere else)."""
    B, C, M, N = x.shape
    T, D = N, C * M
    xp = jnp.transpose(x, (0, 3, 1, 2)).reshape(B, T, D)
    seq = jnp.transpose(xp, (1, 0, 2)).astype(jnp.float32)
    H = params["layers"][0]["whh_f_t"].shape[0]

    def bf16_dot(a, w):
        return jnp.dot(a.astype(jnp.bfloat16), w, preferred_element_type=jnp.float32)

    def run_dir(gx, whh_t, reverse):
        def step(carry, g):
            h, c = carry
            gates = g + bf16_dot(h, whh_t)
            i = jax.nn.sigmoid(gates[:, 0 * H:1 * H])
            f = jax.nn.sigmoid(gates[:, 1 * H:2 * H])
            gg = jnp.tanh(gates[:, 2 * H:3 * H])
            o = jax.nn.sigmoid(gates[:, 3 * H:4 * H])
            c = f * c + i * gg
            h = o * jnp.tanh(c)
            return (h, c), h
        init = (jnp.zeros((B, H), jnp.float32), jnp.zeros((B, H), jnp.float32))
        xs = gx[::-1] if reverse else gx
        _, hs = jax.lax.scan(step, init, xs)
        return hs[::-1] if reverse else hs

    out_f = out_b = None
    for li, layer in enumerate(params["layers"]):
        if li == 0:
            g = bf16_dot(seq.reshape(T * B, D), layer["wih_cat_t"])
        else:
            g = (bf16_dot(out_f.reshape(T * B, H), layer["wih_f_half_t"])
                 + bf16_dot(out_b.reshape(T * B, H), layer["wih_b_half_t"]))
        g = g.reshape(T, B, 8 * H) + layer["b_cat"]
        out_f = run_dir(g[..., :4 * H], layer["whh_f_t"], reverse=False)
        out_b = run_dir(g[..., 4 * H:], layer["whh_b_t"], reverse=True)

    pooled_f = out_f.mean(axis=0)
    pooled_b = out_b.mean(axis=0)
    return pooled_f @ params["fc_wf_t"] + pooled_b @ params["fc_wb_t"] + params["fc_b"]


# ------------------------------------ main ------------------------------------

if __name__ == "__main__":
    key = jax.random.PRNGKey(0)
    B, C, M, N = 2, 4, 16, 8          # N is the sequence length after permute
    hidden_size, num_layers = 32, 2   # small versions of 512 / 4
    input_dim = C * M                 # 64, as implied by the forward's view()

    kx, kp = jax.random.split(key)
    x = jax.random.normal(kx, (B, C, M, N), jnp.float32)
    params = init_params(kp, input_dim, hidden_size, num_layers, bidirectional=True)

    fwd = jax.jit(lstm_model_forward)
    out = fwd(params, x)
    out = jax.block_until_ready(out)
    assert out.shape == (B, 2)

    ref = ref_forward(params, x)
    np.testing.assert_allclose(np.asarray(out), np.asarray(ref), rtol=2e-3, atol=2e-3)

    print("KERNEL_OK")
</pallas_src>

<mosaic_0001>
module attributes {stable_mosaic.version = 11 : i64} {
  func.func @proj1_kernel(%arg0: i32, %arg1: memref<16x64xf32, #tpu.memory_space<vmem>>, %arg2: memref<64x256xbf16, #tpu.memory_space<vmem>>, %arg3: memref<1x256xf32, #tpu.memory_space<vmem>>, %arg4: memref<16x128xf32, #tpu.memory_space<vmem>>, %arg5: memref<16x128xf32, #tpu.memory_space<vmem>>) attributes {dimension_semantics = [#tpu.dimension_semantics<parallel>], iteration_bounds = array<i64: 1>, scalar_prefetch = 0 : i64, scratch_operands = 0 : i64, tpu.core_type = #tpu.core_type<tc>, window_params = [{transform_indices = @transform_0, window_bounds = array<i64: 16, 64>}, {pipeline_mode = #tpu.pipeline_mode<synchronous>, transform_indices = @transform_1, window_bounds = array<i64: 64, 256>}, {pipeline_mode = #tpu.pipeline_mode<synchronous>, transform_indices = @transform_2, window_bounds = array<i64: 1, 256>}, {transform_indices = @transform_3, window_bounds = array<i64: 16, 128>}, {transform_indices = @transform_4, window_bounds = array<i64: 16, 128>}]} {
    %c0 = arith.constant 0 : index
    %c0_0 = arith.constant 0 : index
    %0 = vector.load %arg1[%c0, %c0_0] : memref<16x64xf32, #tpu.memory_space<vmem>>, vector<16x64xf32>
    %1 = arith.truncf %0 : vector<16x64xf32> to vector<16x64xbf16>
    %c0_1 = arith.constant 0 : index
    %c0_2 = arith.constant 0 : index
    %2 = vector.load %arg2[%c0_1, %c0_2] : memref<64x256xbf16, #tpu.memory_space<vmem>>, vector<64x256xbf16>
    %cst = arith.constant dense<0.000000e+00> : vector<16x256xf32>
    %3 = tpu.matmul %1, %2, %cst {dimension_numbers = #tpu.dot_dimension_numbers<[1], [0], [0], [1], [0, 0, 1, 1], [], []>} : vector<16x64xbf16>, vector<64x256xbf16>, vector<16x256xf32> -> vector<16x256xf32>
    %c0_3 = arith.constant 0 : index
    %c0_4 = arith.constant 0 : index
    %4 = vector.load %arg3[%c0_3, %c0_4] : memref<1x256xf32, #tpu.memory_space<vmem>>, vector<1x256xf32>
    %5 = vector.broadcast %4 : vector<1x256xf32> to vector<16x256xf32>
    %6 = arith.addf %3, %5 : vector<16x256xf32>
    %7 = vector.extract_strided_slice %6 {offsets = [0, 0], sizes = [16, 128], strides = [1, 1]} : vector<16x256xf32> to vector<16x128xf32>
    %c0_5 = arith.constant 0 : index
    %c0_6 = arith.constant 0 : index
    %8 = vector.load %arg4[%c0_5, %c0_6] : memref<16x128xf32, #tpu.memory_space<vmem>>, vector<16x128xf32>
    tpu.vector_store %arg4[%c0_5, %c0_6], %7 {strides = array<i32>} : memref<16x128xf32, #tpu.memory_space<vmem>>, vector<16x128xf32>,
    %9 = vector.extract_strided_slice %6 {offsets = [0, 128], sizes = [16, 128], strides = [1, 1]} : vector<16x256xf32> to vector<16x128xf32>
    %c0_7 = arith.constant 0 : index
    %c0_8 = arith.constant 0 : index
    %10 = vector.load %arg5[%c0_7, %c0_8] : memref<16x128xf32, #tpu.memory_space<vmem>>, vector<16x128xf32>
    tpu.vector_store %arg5[%c0_7, %c0_8], %9 {strides = array<i32>} : memref<16x128xf32, #tpu.memory_space<vmem>>, vector<16x128xf32>,
    return
  }
  func.func @transform_0(%arg0: i32) -> (i32, i32) {
    %c0_i32 = arith.constant 0 : i32
    %c0_i32_0 = arith.constant 0 : i32
    return %arg0, %c0_i32 : i32, i32
  }
  func.func @transform_1(%arg0: i32) -> (i32, i32) {
    %c0_i32 = arith.constant 0 : i32
    %c0_i32_0 = arith.constant 0 : i32
    %c0_i32_1 = arith.constant 0 : i32
    return %c0_i32, %c0_i32_0 : i32, i32
  }
  func.func @transform_2(%arg0: i32) -> (i32, i32) {
    %c0_i32 = arith.constant 0 : i32
    %c0_i32_0 = arith.constant 0 : i32
    %c0_i32_1 = arith.constant 0 : i32
    return %c0_i32, %c0_i32_0 : i32, i32
  }
  func.func @transform_3(%arg0: i32) -> (i32, i32) {
    %c0_i32 = arith.constant 0 : i32
    %c0_i32_0 = arith.constant 0 : i32
    return %arg0, %c0_i32 : i32, i32
  }
  func.func @transform_4(%arg0: i32) -> (i32, i32) {
    %c0_i32 = arith.constant 0 : i32
    %c0_i32_0 = arith.constant 0 : i32
    return %arg0, %c0_i32 : i32, i32
  }
}

module attributes {stable_mosaic.version = 11 : i64} {
  func.func @proj2_kernel(%arg0: i32, %arg1: memref<16x32xf32, #tpu.memory_space<vmem>>, %arg2: memref<16x32xf32, #tpu.memory_space<vmem>>, %arg3: memref<32x256xbf16, #tpu.memory_space<vmem>>, %arg4: memref<32x256xbf16, #tpu.memory_space<vmem>>, %arg5: memref<1x256xf32, #tpu.memory_space<vmem>>, %arg6: memref<16x128xf32, #tpu.memory_space<vmem>>, %arg7: memref<16x128xf32, #tpu.memory_space<vmem>>) attributes {dimension_semantics = [#tpu.dimension_semantics<parallel>], iteration_bounds = array<i64: 1>, scalar_prefetch = 0 : i64, scratch_operands = 0 : i64, tpu.core_type = #tpu.core_type<tc>, window_params = [{transform_indices = @transform_0, window_bounds = array<i64: 16, 32>}, {transform_indices = @transform_1, window_bounds = array<i64: 16, 32>}, {pipeline_mode = #tpu.pipeline_mode<synchronous>, transform_indices = @transform_2, window_bounds = array<i64: 32, 256>}, {pipeline_mode = #tpu.pipeline_mode<synchronous>, transform_indices = @transform_3, window_bounds = array<i64: 32, 256>}, {pipeline_mode = #tpu.pipeline_mode<synchronous>, transform_indices = @transform_4, window_bounds = array<i64: 1, 256>}, {transform_indices = @transform_5, window_bounds = array<i64: 16, 128>}, {transform_indices = @transform_6, window_bounds = array<i64: 16, 128>}]} {
    %c0 = arith.constant 0 : index
    %c0_0 = arith.constant 0 : index
    %0 = vector.load %arg1[%c0, %c0_0] : memref<16x32xf32, #tpu.memory_space<vmem>>, vector<16x32xf32>
    %1 = arith.truncf %0 : vector<16x32xf32> to vector<16x32xbf16>
    %c0_1 = arith.constant 0 : index
    %c0_2 = arith.constant 0 : index
    %2 = vector.load %arg3[%c0_1, %c0_2] : memref<32x256xbf16, #tpu.memory_space<vmem>>, vector<32x256xbf16>
    %cst = arith.constant dense<0.000000e+00> : vector<16x256xf32>
    %3 = tpu.matmul %1, %2, %cst {dimension_numbers = #tpu.dot_dimension_numbers<[1], [0], [0], [1], [0, 0, 1, 1], [], []>} : vector<16x32xbf16>, vector<32x256xbf16>, vector<16x256xf32> -> vector<16x256xf32>
    %c0_3 = arith.constant 0 : index
    %c0_4 = arith.constant 0 : index
    %4 = vector.load %arg2[%c0_3, %c0_4] : memref<16x32xf32, #tpu.memory_space<vmem>>, vector<16x32xf32>
    %5 = arith.truncf %4 : vector<16x32xf32> to vector<16x32xbf16>
    %c0_5 = arith.constant 0 : index
    %c0_6 = arith.constant 0 : index
    %6 = vector.load %arg4[%c0_5, %c0_6] : memref<32x256xbf16, #tpu.memory_space<vmem>>, vector<32x256xbf16>
    %cst_7 = arith.constant dense<0.000000e+00> : vector<16x256xf32>
    %7 = tpu.matmul %5, %6, %cst_7 {dimension_numbers = #tpu.dot_dimension_numbers<[1], [0], [0], [1], [0, 0, 1, 1], [], []>} : vector<16x32xbf16>, vector<32x256xbf16>, vector<16x256xf32> -> vector<16x256xf32>
    %8 = arith.addf %3, %7 : vector<16x256xf32>
    %c0_8 = arith.constant 0 : index
    %c0_9 = arith.constant 0 : index
    %9 = vector.load %arg5[%c0_8, %c0_9] : memref<1x256xf32, #tpu.memory_space<vmem>>, vector<1x256xf32>
    %10 = vector.broadcast %9 : vector<1x256xf32> to vector<16x256xf32>
    %11 = arith.addf %8, %10 : vector<16x256xf32>
    %12 = vector.extract_strided_slice %11 {offsets = [0, 0], sizes = [16, 128], strides = [1, 1]} : vector<16x256xf32> to vector<16x128xf32>
    %c0_10 = arith.constant 0 : index
    %c0_11 = arith.constant 0 : index
    %13 = vector.load %arg6[%c0_10, %c0_11] : memref<16x128xf32, #tpu.memory_space<vmem>>, vector<16x128xf32>
    tpu.vector_store %arg6[%c0_10, %c0_11], %12 {strides = array<i32>} : memref<16x128xf32, #tpu.memory_space<vmem>>, vector<16x128xf32>,
    %14 = vector.extract_strided_slice %11 {offsets = [0, 128], sizes = [16, 128], strides = [1, 1]} : vector<16x256xf32> to vector<16x128xf32>
    %c0_12 = arith.constant 0 : index
    %c0_13 = arith.constant 0 : index
    %15 = vector.load %arg7[%c0_12, %c0_13] : memref<16x128xf32, #tpu.memory_space<vmem>>, vector<16x128xf32>
    tpu.vector_store %arg7[%c0_12, %c0_13], %14 {strides = array<i32>} : memref<16x128xf32, #tpu.memory_space<vmem>>, vector<16x128xf32>,
    return
  }
  func.func @transform_0(%arg0: i32) -> (i32, i32) {
    %c0_i32 = arith.constant 0 : i32
    %c0_i32_0 = arith.constant 0 : i32
    return %arg0, %c0_i32 : i32, i32
  }
  func.func @transform_1(%arg0: i32) -> (i32, i32) {
    %c0_i32 = arith.constant 0 : i32
    %c0_i32_0 = arith.constant 0 : i32
    return %arg0, %c0_i32 : i32, i32
  }
  func.func @transform_2(%arg0: i32) -> (i32, i32) {
    %c0_i32 = arith.constant 0 : i32
    %c0_i32_0 = arith.constant 0 : i32
    %c0_i32_1 = arith.constant 0 : i32
    return %c0_i32, %c0_i32_0 : i32, i32
  }
  func.func @transform_3(%arg0: i32) -> (i32, i32) {
    %c0_i32 = arith.constant 0 : i32
    %c0_i32_0 = arith.constant 0 : i32
    %c0_i32_1 = arith.constant 0 : i32
    return %c0_i32, %c0_i32_0 : i32, i32
  }
  func.func @transform_4(%arg0: i32) -> (i32, i32) {
    %c0_i32 = arith.constant 0 : i32
    %c0_i32_0 = arith.constant 0 : i32
    %c0_i32_1 = arith.constant 0 : i32
    return %c0_i32, %c0_i32_0 : i32, i32
  }
  func.func @transform_5(%arg0: i32) -> (i32, i32) {
    %c0_i32 = arith.constant 0 : i32
    %c0_i32_0 = arith.constant 0 : i32
    return %arg0, %c0_i32 : i32, i32
  }
  func.func @transform_6(%arg0: i32) -> (i32, i32) {
    %c0_i32 = arith.constant 0 : i32
    %c0_i32_0 = arith.constant 0 : i32
    return %arg0, %c0_i32 : i32, i32
  }
}

module attributes {stable_mosaic.version = 11 : i64} {
  func.func @pool_fc_kernel(%arg0: i32, %arg1: memref<8x2x32xf32, #tpu.memory_space<vmem>>, %arg2: memref<8x2x32xf32, #tpu.memory_space<vmem>>, %arg3: memref<32x2xf32, #tpu.memory_space<vmem>>, %arg4: memref<32x2xf32, #tpu.memory_space<vmem>>, %arg5: memref<1x2xf32, #tpu.memory_space<vmem>>, %arg6: memref<2x2xf32, #tpu.memory_space<vmem>>, %arg7: memref<2x32xf32, #tpu.memory_space<vmem>>, %arg8: memref<2x32xf32, #tpu.memory_space<vmem>>) attributes {dimension_semantics = [#tpu.dimension_semantics<arbitrary>], iteration_bounds = array<i64: 1>, scalar_prefetch = 0 : i64, scratch_operands = 2 : i64, tpu.core_type = #tpu.core_type<tc>, window_params = [{transform_indices = @transform_0, window_bounds = array<i64: 8, 2, 32>}, {transform_indices = @transform_1, window_bounds = array<i64: 8, 2, 32>}, {pipeline_mode = #tpu.pipeline_mode<synchronous>, transform_indices = @transform_2, window_bounds = array<i64: 32, 2>}, {pipeline_mode = #tpu.pipeline_mode<synchronous>, transform_indices = @transform_3, window_bounds = array<i64: 32, 2>}, {pipeline_mode = #tpu.pipeline_mode<synchronous>, transform_indices = @transform_4, window_bounds = array<i64: 1, 2>}, {pipeline_mode = #tpu.pipeline_mode<synchronous>, transform_indices = @transform_5, window_bounds = array<i64: 2, 2>}]} {
    %c0_i32 = arith.constant 0 : i32
    %0 = arith.cmpi eq, %arg0, %c0_i32 : i32
    %1 = arith.extui %0 : i1 to i32
    %c0_i32_0 = arith.constant 0 : i32
    %2 = arith.cmpi ne, %1, %c0_i32_0 : i32
    scf.if %2 {
      %cst_17 = arith.constant 0.000000e+00 : f32
      %16 = vector.broadcast %cst_17 : f32 to vector<2x32xf32>
      %c0_18 = arith.constant 0 : index
      %c0_19 = arith.constant 0 : index
      %17 = vector.load %arg7[%c0_18, %c0_19] : memref<2x32xf32, #tpu.memory_space<vmem>>, vector<2x32xf32>
      tpu.vector_store %arg7[%c0_18, %c0_19], %16 {strides = array<i32>} : memref<2x32xf32, #tpu.memory_space<vmem>>, vector<2x32xf32>,
      %cst_20 = arith.constant 0.000000e+00 : f32
      %18 = vector.broadcast %cst_20 : f32 to vector<2x32xf32>
      %c0_21 = arith.constant 0 : index
      %c0_22 = arith.constant 0 : index
      %19 = vector.load %arg8[%c0_21, %c0_22] : memref<2x32xf32, #tpu.memory_space<vmem>>, vector<2x32xf32>
      tpu.vector_store %arg8[%c0_21, %c0_22], %18 {strides = array<i32>} : memref<2x32xf32, #tpu.memory_space<vmem>>, vector<2x32xf32>,
    } else {
    }
    %c0 = arith.constant 0 : index
    %c0_1 = arith.constant 0 : index
    %3 = vector.load %arg7[%c0, %c0_1] : memref<2x32xf32, #tpu.memory_space<vmem>>, vector<2x32xf32>
    %c0_2 = arith.constant 0 : index
    %c0_3 = arith.constant 0 : index
    %c0_4 = arith.constant 0 : index
    %4 = vector.load %arg1[%c0_2, %c0_3, %c0_4] : memref<8x2x32xf32, #tpu.memory_space<vmem>>, vector<8x2x32xf32>
    %cst = arith.constant dense<0.000000e+00> : vector<2x32xf32>
    %5 = vector.multi_reduction <add>, %4, %cst [0] : vector<8x2x32xf32> to vector<2x32xf32>
    %6 = arith.addf %3, %5 : vector<2x32xf32>
    %c0_5 = arith.constant 0 : index
    %c0_6 = arith.constant 0 : index
    %7 = vector.load %arg7[%c0_5, %c0_6] : memref<2x32xf32, #tpu.memory_space<vmem>>, vector<2x32xf32>
    tpu.vector_store %arg7[%c0_5, %c0_6], %6 {strides = array<i32>} : memref<2x32xf32, #tpu.memory_space<vmem>>, vector<2x32xf32>,
    %c0_7 = arith.constant 0 : index
    %c0_8 = arith.constant 0 : index
    %8 = vector.load %arg8[%c0_7, %c0_8] : memref<2x32xf32, #tpu.memory_space<vmem>>, vector<2x32xf32>
    %c0_9 = arith.constant 0 : index
    %c0_10 = arith.constant 0 : index
    %c0_11 = arith.constant 0 : index
    %9 = vector.load %arg2[%c0_9, %c0_10, %c0_11] : memref<8x2x32xf32, #tpu.memory_space<vmem>>, vector<8x2x32xf32>
    %cst_12 = arith.constant dense<0.000000e+00> : vector<2x32xf32>
    %10 = vector.multi_reduction <add>, %9, %cst_12 [0] : vector<8x2x32xf32> to vector<2x32xf32>
    %11 = arith.addf %8, %10 : vector<2x32xf32>
    %c0_13 = arith.constant 0 : index
    %c0_14 = arith.constant 0 : index
    %12 = vector.load %arg8[%c0_13, %c0_14] : memref<2x32xf32, #tpu.memory_space<vmem>>, vector<2x32xf32>
    tpu.vector_store %arg8[%c0_13, %c0_14], %11 {strides = array<i32>} : memref<2x32xf32, #tpu.memory_space<vmem>>, vector<2x32xf32>,
    %c0_i32_15 = arith.constant 0 : i32
    %13 = arith.cmpi eq, %arg0, %c0_i32_15 : i32
    %14 = arith.extui %13 : i1 to i32
    %c0_i32_16 = arith.constant 0 : i32
    %15 = arith.cmpi ne, %14, %c0_i32_16 : i32
    scf.if %15 {
      %c0_17 = arith.constant 0 : index
      %c0_18 = arith.constant 0 : index
      %16 = vector.load %arg7[%c0_17, %c0_18] : memref<2x32xf32, #tpu.memory_space<vmem>>, vector<2x32xf32>
      %cst_19 = arith.constant 1.250000e-01 : f32
      %17 = vector.broadcast %cst_19 : f32 to vector<2x32xf32>
      %18 = arith.mulf %16, %17 : vector<2x32xf32>
      %c0_20 = arith.constant 0 : index
      %c0_21 = arith.constant 0 : index
      %19 = vector.load %arg8[%c0_20, %c0_21] : memref<2x32xf32, #tpu.memory_space<vmem>>, vector<2x32xf32>
      %cst_22 = arith.constant 1.250000e-01 : f32
      %20 = vector.broadcast %cst_22 : f32 to vector<2x32xf32>
      %21 = arith.mulf %19, %20 : vector<2x32xf32>
      %c0_23 = arith.constant 0 : index
      %c0_24 = arith.constant 0 : index
      %22 = vector.load %arg3[%c0_23, %c0_24] : memref<32x2xf32, #tpu.memory_space<vmem>>, vector<32x2xf32>
      %cst_25 = arith.constant dense<0.000000e+00> : vector<2x2xf32>
      %23 = tpu.matmul %18, %22, %cst_25 {dimension_numbers = #tpu.dot_dimension_numbers<[1], [0], [0], [1], [0, 0, 1, 1], [], []>} : vector<2x32xf32>, vector<32x2xf32>, vector<2x2xf32> -> vector<2x2xf32>
      %c0_26 = arith.constant 0 : index
      %c0_27 = arith.constant 0 : index
      %24 = vector.load %arg4[%c0_26, %c0_27] : memref<32x2xf32, #tpu.memory_space<vmem>>, vector<32x2xf32>
      %cst_28 = arith.constant dense<0.000000e+00> : vector<2x2xf32>
      %25 = tpu.matmul %21, %24, %cst_28 {dimension_numbers = #tpu.dot_dimension_numbers<[1], [0], [0], [1], [0, 0, 1, 1], [], []>} : vector<2x32xf32>, vector<32x2xf32>, vector<2x2xf32> -> vector<2x2xf32>
      %26 = arith.addf %23, %25 : vector<2x2xf32>
      %c0_29 = arith.constant 0 : index
      %c0_30 = arith.constant 0 : index
      %27 = vector.load %arg5[%c0_29, %c0_30] : memref<1x2xf32, #tpu.memory_space<vmem>>, vector<1x2xf32>
      %28 = vector.broadcast %27 : vector<1x2xf32> to vector<2x2xf32>
      %29 = arith.addf %26, %28 : vector<2x2xf32>
      %c0_31 = arith.constant 0 : index
      %c0_32 = arith.constant 0 : index
      %30 = vector.load %arg6[%c0_31, %c0_32] : memref<2x2xf32, #tpu.memory_space<vmem>>, vector<2x2xf32>
      tpu.vector_store %arg6[%c0_31, %c0_32], %29 {strides = array<i32>} : memref<2x2xf32, #tpu.memory_space<vmem>>, vector<2x2xf32>,
    } else {
    }
    return
  }
  func.func @transform_0(%arg0: i32) -> (i32, i32, i32) {
    %c0_i32 = arith.constant 0 : i32
    %c0_i32_0 = arith.constant 0 : i32
    %c0_i32_1 = arith.constant 0 : i32
    return %arg0, %c0_i32, %c0_i32_0 : i32, i32, i32
  }
  func.func @transform_1(%arg0: i32) -> (i32, i32, i32) {
    %c0_i32 = arith.constant 0 : i32
    %c0_i32_0 = arith.constant 0 : i32
    %c0_i32_1 = arith.constant 0 : i32
    return %arg0, %c0_i32, %c0_i32_0 : i32, i32, i32
  }
  func.func @transform_2(%arg0: i32) -> (i32, i32) {
    %c0_i32 = arith.constant 0 : i32
    %c0_i32_0 = arith.constant 0 : i32
    %c0_i32_1 = arith.constant 0 : i32
    return %c0_i32, %c0_i32_0 : i32, i32
  }
  func.func @transform_3(%arg0: i32) -> (i32, i32) {
    %c0_i32 = arith.constant 0 : i32
    %c0_i32_0 = arith.constant 0 : i32
    %c0_i32_1 = arith.constant 0 : i32
    return %c0_i32, %c0_i32_0 : i32, i32
  }
  func.func @transform_4(%arg0: i32) -> (i32, i32) {
    %c0_i32 = arith.constant 0 : i32
    %c0_i32_0 = arith.constant 0 : i32
    %c0_i32_1 = arith.constant 0 : i32
    return %c0_i32, %c0_i32_0 : i32, i32
  }
  func.func @transform_5(%arg0: i32) -> (i32, i32) {
    %c0_i32 = arith.constant 0 : i32
    %c0_i32_0 = arith.constant 0 : i32
    %c0_i32_1 = arith.constant 0 : i32
    return %c0_i32, %c0_i32_0 : i32, i32
  }
}

module attributes {stable_mosaic.version = 11 : i64} {
  func.func @bilstm_kernel(%arg0: i32, %arg1: memref<8x2x128xf32, #tpu.memory_space<vmem>>, %arg2: memref<8x2x128xf32, #tpu.memory_space<vmem>>, %arg3: memref<32x128xbf16, #tpu.memory_space<vmem>>, %arg4: memref<32x128xbf16, #tpu.memory_space<vmem>>, %arg5: memref<8x2x32xf32, #tpu.memory_space<vmem>>, %arg6: memref<8x2x32xf32, #tpu.memory_space<vmem>>, %arg7: memref<2x32xf32, #tpu.memory_space<vmem>>, %arg8: memref<2x32xf32, #tpu.memory_space<vmem>>, %arg9: memref<2x32xf32, #tpu.memory_space<vmem>>, %arg10: memref<2x32xf32, #tpu.memory_space<vmem>>) attributes {dimension_semantics = [#tpu.dimension_semantics<arbitrary>], iteration_bounds = array<i64: 1>, scalar_prefetch = 0 : i64, scratch_operands = 4 : i64, tpu.core_type = #tpu.core_type<tc>, window_params = [{transform_indices = @transform_0, window_bounds = array<i64: 8, 2, 128>}, {transform_indices = @transform_1, window_bounds = array<i64: 8, 2, 128>}, {pipeline_mode = #tpu.pipeline_mode<synchronous>, transform_indices = @transform_2, window_bounds = array<i64: 32, 128>}, {pipeline_mode = #tpu.pipeline_mode<synchronous>, transform_indices = @transform_3, window_bounds = array<i64: 32, 128>}, {transform_indices = @transform_4, window_bounds = array<i64: 8, 2, 32>}, {transform_indices = @transform_5, window_bounds = array<i64: 8, 2, 32>}]} {
    %c0_i32 = arith.constant 0 : i32
    %0 = arith.cmpi eq, %arg0, %c0_i32 : i32
    %1 = arith.extui %0 : i1 to i32
    %c0_i32_0 = arith.constant 0 : i32
    %2 = arith.cmpi ne, %1, %c0_i32_0 : i32
    scf.if %2 {
      %cst_296 = arith.constant 0.000000e+00 : f32
      %651 = vector.broadcast %cst_296 : f32 to vector<2x32xf32>
      %c0_297 = arith.constant 0 : index
      %c0_298 = arith.constant 0 : index
      %652 = vector.load %arg7[%c0_297, %c0_298] : memref<2x32xf32, #tpu.memory_space<vmem>>, vector<2x32xf32>
      tpu.vector_store %arg7[%c0_297, %c0_298], %651 {strides = array<i32>} : memref<2x32xf32, #tpu.memory_space<vmem>>, vector<2x32xf32>,
      %cst_299 = arith.constant 0.000000e+00 : f32
      %653 = vector.broadcast %cst_299 : f32 to vector<2x32xf32>
      %c0_300 = arith.constant 0 : index
      %c0_301 = arith.constant 0 : index
      %654 = vector.load %arg8[%c0_300, %c0_301] : memref<2x32xf32, #tpu.memory_space<vmem>>, vector<2x32xf32>
      tpu.vector_store %arg8[%c0_300, %c0_301], %653 {strides = array<i32>} : memref<2x32xf32, #tpu.memory_space<vmem>>, vector<2x32xf32>,
      %cst_302 = arith.constant 0.000000e+00 : f32
      %655 = vector.broadcast %cst_302 : f32 to vector<2x32xf32>
      %c0_303 = arith.constant 0 : index
      %c0_304 = arith.constant 0 : index
      %656 = vector.load %arg9[%c0_303, %c0_304] : memref<2x32xf32, #tpu.memory_space<vmem>>, vector<2x32xf32>
      tpu.vector_store %arg9[%c0_303, %c0_304], %655 {strides = array<i32>} : memref<2x32xf32, #tpu.memory_space<vmem>>, vector<2x32xf32>,
      %cst_305 = arith.constant 0.000000e+00 : f32
      %657 = vector.broadcast %cst_305 : f32 to vector<2x32xf32>
      %c0_306 = arith.constant 0 : index
      %c0_307 = arith.constant 0 : index
      %658 = vector.load %arg10[%c0_306, %c0_307] : memref<2x32xf32, #tpu.memory_space<vmem>>, vector<2x32xf32>
      tpu.vector_store %arg10[%c0_306, %c0_307], %657 {strides = array<i32>} : memref<2x32xf32, #tpu.memory_space<vmem>>, vector<2x32xf32>,
    } else {
    }
    %c0_i32_1 = arith.constant 0 : i32
    %3 = arith.index_cast %c0_i32_1 : i32 to index
    %c0 = arith.constant 0 : index
    %c0_2 = arith.constant 0 : index
    %4 = vector.load %arg1[%3, %c0, %c0_2] : memref<8x2x128xf32, #tpu.memory_space<vmem>>, vector<1x2x128xf32>
    %5 = vector.shape_cast %4 : vector<1x2x128xf32> to vector<2x128xf32>
    %c0_3 = arith.constant 0 : index
    %c0_4 = arith.constant 0 : index
    %6 = vector.load %arg7[%c0_3, %c0_4] : memref<2x32xf32, #tpu.memory_space<vmem>>, vector<2x32xf32>
    %7 = arith.truncf %6 : vector<2x32xf32> to vector<2x32xbf16>
    %c0_5 = arith.constant 0 : index
    %c0_6 = arith.constant 0 : index
    %8 = vector.load %arg3[%c0_5, %c0_6] : memref<32x128xbf16, #tpu.memory_space<vmem>>, vector<32x128xbf16>
    %cst = arith.constant dense<0.000000e+00> : vector<2x128xf32>
    %9 = tpu.matmul %7, %8, %cst {dimension_numbers = #tpu.dot_dimension_numbers<[1], [0], [0], [1], [0, 0, 1, 1], [], []>} : vector<2x32xbf16>, vector<32x128xbf16>, vector<2x128xf32> -> vector<2x128xf32>
    %10 = arith.addf %5, %9 : vector<2x128xf32>
    %c0_7 = arith.constant 0 : index
    %c0_8 = arith.constant 0 : index
    %11 = vector.load %arg8[%c0_7, %c0_8] : memref<2x32xf32, #tpu.memory_space<vmem>>, vector<2x32xf32>
    %12 = vector.extract_strided_slice %10 {offsets = [0, 0], sizes = [2, 32], strides = [1, 1]} : vector<2x128xf32> to vector<2x32xf32>
    %13 = arith.negf %12 : vector<2x32xf32>
    %14 = math.exp %13 : vector<2x32xf32>
    %cst_9 = arith.constant 1.000000e+00 : f32
    %15 = vector.broadcast %cst_9 : f32 to vector<2x32xf32>
    %16 = arith.addf %15, %14 : vector<2x32xf32>
    %17 = arith.divf %15, %16 : vector<2x32xf32>
    %18 = vector.extract_strided_slice %10 {offsets = [0, 32], sizes = [2, 32], strides = [1, 1]} : vector<2x128xf32> to vector<2x32xf32>
    %19 = arith.negf %18 : vector<2x32xf32>
    %20 = math.exp %19 : vector<2x32xf32>
    %cst_10 = arith.constant 1.000000e+00 : f32
    %21 = vector.broadcast %cst_10 : f32 to vector<2x32xf32>
    %22 = arith.addf %21, %20 : vector<2x32xf32>
    %23 = arith.divf %21, %22 : vector<2x32xf32>
    %24 = vector.extract_strided_slice %10 {offsets = [0, 64], sizes = [2, 32], strides = [1, 1]} : vector<2x128xf32> to vector<2x32xf32>
    %25 = math.tanh %24 : vector<2x32xf32>
    %26 = vector.extract_strided_slice %10 {offsets = [0, 96], sizes = [2, 32], strides = [1, 1]} : vector<2x128xf32> to vector<2x32xf32>
    %27 = arith.negf %26 : vector<2x32xf32>
    %28 = math.exp %27 : vector<2x32xf32>
    %cst_11 = arith.constant 1.000000e+00 : f32
    %29 = vector.broadcast %cst_11 : f32 to vector<2x32xf32>
    %30 = arith.addf %29, %28 : vector<2x32xf32>
    %31 = arith.divf %29, %30 : vector<2x32xf32>
    %32 = arith.mulf %23, %11 : vector<2x32xf32>
    %33 = arith.mulf %17, %25 : vector<2x32xf32>
    %34 = arith.addf %32, %33 : vector<2x32xf32>
    %35 = math.tanh %34 : vector<2x32xf32>
    %36 = arith.mulf %31, %35 : vector<2x32xf32>
    %c0_12 = arith.constant 0 : index
    %c0_13 = arith.constant 0 : index
    %37 = vector.load %arg7[%c0_12, %c0_13] : memref<2x32xf32, #tpu.memory_space<vmem>>, vector<2x32xf32>
    tpu.vector_store %arg7[%c0_12, %c0_13], %36 {strides = array<i32>} : memref<2x32xf32, #tpu.memory_space<vmem>>, vector<2x32xf32>,
    %c0_14 = arith.constant 0 : index
    %c0_15 = arith.constant 0 : index
    %38 = vector.load %arg8[%c0_14, %c0_15] : memref<2x32xf32, #tpu.memory_space<vmem>>, vector<2x32xf32>
    tpu.vector_store %arg8[%c0_14, %c0_15], %34 {strides = array<i32>} : memref<2x32xf32, #tpu.memory_space<vmem>>, vector<2x32xf32>,
    %39 = arith.index_cast %c0_i32_1 : i32 to index
    %c0_16 = arith.constant 0 : index
    %c0_17 = arith.constant 0 : index
    %40 = vector.load %arg5[%39, %c0_16, %c0_17] : memref<8x2x32xf32, #tpu.memory_space<vmem>>, vector<1x2x32xf32>
    %41 = vector.shape_cast %40 : vector<1x2x32xf32> to vector<2x32xf32>
    %42 = vector.shape_cast %36 : vector<2x32xf32> to vector<1x2x32xf32>
    tpu.vector_store %arg5[%39, %c0_16, %c0_17], %42 {strides = array<i32>} : memref<8x2x32xf32, #tpu.memory_space<vmem>>, vector<1x2x32xf32>,
    %c7_i32 = arith.constant 7 : i32
    %43 = arith.subi %c7_i32, %c0_i32_1 : i32
    %44 = arith.index_cast %43 : i32 to index
    %c0_18 = arith.constant 0 : index
    %c0_19 = arith.constant 0 : index
    %45 = vector.load %arg2[%44, %c0_18, %c0_19] : memref<8x2x128xf32, #tpu.memory_space<vmem>>, vector<1x2x128xf32>
    %46 = vector.shape_cast %45 : vector<1x2x128xf32> to vector<2x128xf32>
    %c0_20 = arith.constant 0 : index
    %c0_21 = arith.constant 0 : index
    %47 = vector.load %arg9[%c0_20, %c0_21] : memref<2x32xf32, #tpu.memory_space<vmem>>, vector<2x32xf32>
    %48 = arith.truncf %47 : vector<2x32xf32> to vector<2x32xbf16>
    %c0_22 = arith.constant 0 : index
    %c0_23 = arith.constant 0 : index
    %49 = vector.load %arg4[%c0_22, %c0_23] : memref<32x128xbf16, #tpu.memory_space<vmem>>, vector<32x128xbf16>
    %cst_24 = arith.constant dense<0.000000e+00> : vector<2x128xf32>
    %50 = tpu.matmul %48, %49, %cst_24 {dimension_numbers = #tpu.dot_dimension_numbers<[1], [0], [0], [1], [0, 0, 1, 1], [], []>} : vector<2x32xbf16>, vector<32x128xbf16>, vector<2x128xf32> -> vector<2x128xf32>
    %51 = arith.addf %46, %50 : vector<2x128xf32>
    %c0_25 = arith.constant 0 : index
    %c0_26 = arith.constant 0 : index
    %52 = vector.load %arg10[%c0_25, %c0_26] : memref<2x32xf32, #tpu.memory_space<vmem>>, vector<2x32xf32>
    %53 = vector.extract_strided_slice %51 {offsets = [0, 0], sizes = [2, 32], strides = [1, 1]} : vector<2x128xf32> to vector<2x32xf32>
    %54 = arith.negf %53 : vector<2x32xf32>
    %55 = math.exp %54 : vector<2x32xf32>
    %cst_27 = arith.constant 1.000000e+00 : f32
    %56 = vector.broadcast %cst_27 : f32 to vector<2x32xf32>
    %57 = arith.addf %56, %55 : vector<2x32xf32>
    %58 = arith.divf %56, %57 : vector<2x32xf32>
    %59 = vector.extract_strided_slice %51 {offsets = [0, 32], sizes = [2, 32], strides = [1, 1]} : vector<2x128xf32> to vector<2x32xf32>
    %60 = arith.negf %59 : vector<2x32xf32>
    %61 = math.exp %60 : vector<2x32xf32>
    %cst_28 = arith.constant 1.000000e+00 : f32
    %62 = vector.broadcast %cst_28 : f32 to vector<2x32xf32>
    %63 = arith.addf %62, %61 : vector<2x32xf32>
    %64 = arith.divf %62, %63 : vector<2x32xf32>
    %65 = vector.extract_strided_slice %51 {offsets = [0, 64], sizes = [2, 32], strides = [1, 1]} : vector<2x128xf32> to vector<2x32xf32>
    %66 = math.tanh %65 : vector<2x32xf32>
    %67 = vector.extract_strided_slice %51 {offsets = [0, 96], sizes = [2, 32], strides = [1, 1]} : vector<2x128xf32> to vector<2x32xf32>
    %68 = arith.negf %67 : vector<2x32xf32>
    %69 = math.exp %68 : vector<2x32xf32>
    %cst_29 = arith.constant 1.000000e+00 : f32
    %70 = vector.broadcast %cst_29 : f32 to vector<2x32xf32>
    %71 = arith.addf %70, %69 : vector<2x32xf32>
    %72 = arith.divf %70, %71 : vector<2x32xf32>
    %73 = arith.mulf %64, %52 : vector<2x32xf32>
    %74 = arith.mulf %58, %66 : vector<2x32xf32>
    %75 = arith.addf %73, %74 : vector<2x32xf32>
    %76 = math.tanh %75 : vector<2x32xf32>
    %77 = arith.mulf %72, %76 : vector<2x32xf32>
    %c0_30 = arith.constant 0 : index
    %c0_31 = arith.constant 0 : index
    %78 = vector.load %arg9[%c0_30, %c0_31] : memref<2x32xf32, #tpu.memory_space<vmem>>, vector<2x32xf32>
    tpu.vector_store %arg9[%c0_30, %c0_31], %77 {strides = array<i32>} : memref<2x32xf32, #tpu.memory_space<vmem>>, vector<2x32xf32>,
    %c0_32 = arith.constant 0 : index
    %c0_33 = arith.constant 0 : index
    %79 = vector.load %arg10[%c0_32, %c0_33] : memref<2x32xf32, #tpu.memory_space<vmem>>, vector<2x32xf32>
    tpu.vector_store %arg10[%c0_32, %c0_33], %75 {strides = array<i32>} : memref<2x32xf32, #tpu.memory_space<vmem>>, vector<2x32xf32>,
    %80 = arith.index_cast %43 : i32 to index
    %c0_34 = arith.constant 0 : index
    %c0_35 = arith.constant 0 : index
    %81 = vector.load %arg6[%80, %c0_34, %c0_35] : memref<8x2x32xf32, #tpu.memory_space<vmem>>, vector<1x2x32xf32>
    %82 = vector.shape_cast %81 : vector<1x2x32xf32> to vector<2x32xf32>
    %83 = vector.shape_cast %77 : vector<2x32xf32> to vector<1x2x32xf32>
    tpu.vector_store %arg6[%80, %c0_34, %c0_35], %83 {strides = array<i32>} : memref<8x2x32xf32, #tpu.memory_space<vmem>>, vector<1x2x32xf32>,
    %c1_i32 = arith.constant 1 : i32
    %84 = arith.index_cast %c1_i32 : i32 to index
    %c0_36 = arith.constant 0 : index
    %c0_37 = arith.constant 0 : index
    %85 = vector.load %arg1[%84, %c0_36, %c0_37] : memref<8x2x128xf32, #tpu.memory_space<vmem>>, vector<1x2x128xf32>
    %86 = vector.shape_cast %85 : vector<1x2x128xf32> to vector<2x128xf32>
    %c0_38 = arith.constant 0 : index
    %c0_39 = arith.constant 0 : index
    %87 = vector.load %arg7[%c0_38, %c0_39] : memref<2x32xf32, #tpu.memory_space<vmem>>, vector<2x32xf32>
    %88 = arith.truncf %87 : vector<2x32xf32> to vector<2x32xbf16>
    %c0_40 = arith.constant 0 : index
    %c0_41 = arith.constant 0 : index
    %89 = vector.load %arg3[%c0_40, %c0_41] : memref<32x128xbf16, #tpu.memory_space<vmem>>, vector<32x128xbf16>
    %cst_42 = arith.constant dense<0.000000e+00> : vector<2x128xf32>
    %90 = tpu.matmul %88, %89, %cst_42 {dimension_numbers = #tpu.dot_dimension_numbers<[1], [0], [0], [1], [0, 0, 1, 1], [], []>} : vector<2x32xbf16>, vector<32x128xbf16>, vector<2x128xf32> -> vector<2x128xf32>
    %91 = arith.addf %86, %90 : vector<2x128xf32>
    %c0_43 = arith.constant 0 : index
    %c0_44 = arith.constant 0 : index
    %92 = vector.load %arg8[%c0_43, %c0_44] : memref<2x32xf32, #tpu.memory_space<vmem>>, vector<2x32xf32>
    %93 = vector.extract_strided_slice %91 {offsets = [0, 0], sizes = [2, 32], strides = [1, 1]} : vector<2x128xf32> to vector<2x32xf32>
    %94 = arith.negf %93 : vector<2x32xf32>
    %95 = math.exp %94 : vector<2x32xf32>
    %cst_45 = arith.constant 1.000000e+00 : f32
    %96 = vector.broadcast %cst_45 : f32 to vector<2x32xf32>
    %97 = arith.addf %96, %95 : vector<2x32xf32>
    %98 = arith.divf %96, %97 : vector<2x32xf32>
    %99 = vector.extract_strided_slice %91 {offsets = [0, 32], sizes = [2, 32], strides = [1, 1]} : vector<2x128xf32> to vector<2x32xf32>
    %100 = arith.negf %99 : vector<2x32xf32>
    %101 = math.exp %100 : vector<2x32xf32>
    %cst_46 = arith.constant 1.000000e+00 : f32
    %102 = vector.broadcast %cst_46 : f32 to vector<2x32xf32>
    %103 = arith.addf %102, %101 : vector<2x32xf32>
    %104 = arith.divf %102, %103 : vector<2x32xf32>
    %105 = vector.extract_strided_slice %91 {offsets = [0, 64], sizes = [2, 32], strides = [1, 1]} : vector<2x128xf32> to vector<2x32xf32>
    %106 = math.tanh %105 : vector<2x32xf32>
    %107 = vector.extract_strided_slice %91 {offsets = [0, 96], sizes = [2, 32], strides = [1, 1]} : vector<2x128xf32> to vector<2x32xf32>
    %108 = arith.negf %107 : vector<2x32xf32>
    %109 = math.exp %108 : vector<2x32xf32>
    %cst_47 = arith.constant 1.000000e+00 : f32
    %110 = vector.broadcast %cst_47 : f32 to vector<2x32xf32>
    %111 = arith.addf %110, %109 : vector<2x32xf32>
    %112 = arith.divf %110, %111 : vector<2x32xf32>
    %113 = arith.mulf %104, %92 : vector<2x32xf32>
    %114 = arith.mulf %98, %106 : vector<2x32xf32>
    %115 = arith.addf %113, %114 : vector<2x32xf32>
    %116 = math.tanh %115 : vector<2x32xf32>
    %117 = arith.mulf %112, %116 : vector<2x32xf32>
    %c0_48 = arith.constant 0 : index
    %c0_49 = arith.constant 0 : index
    %118 = vector.load %arg7[%c0_48, %c0_49] : memref<2x32xf32, #tpu.memory_space<vmem>>, vector<2x32xf32>
    tpu.vector_store %arg7[%c0_48, %c0_49], %117 {strides = array<i32>} : memref<2x32xf32, #tpu.memory_space<vmem>>, vector<2x32xf32>,
    %c0_50 = arith.constant 0 : index
    %c0_51 = arith.constant 0 : index
    %119 = vector.load %arg8[%c0_50, %c0_51] : memref<2x32xf32, #tpu.memory_space<vmem>>, vector<2x32xf32>
    tpu.vector_store %arg8[%c0_50, %c0_51], %115 {strides = array<i32>} : memref<2x32xf32, #tpu.memory_space<vmem>>, vector<2x32xf32>,
    %120 = arith.index_cast %c1_i32 : i32 to index
    %c0_52 = arith.constant 0 : index
    %c0_53 = arith.constant 0 : index
    %121 = vector.load %arg5[%120, %c0_52, %c0_53] : memref<8x2x32xf32, #tpu.memory_space<vmem>>, vector<1x2x32xf32>
    %122 = vector.shape_cast %121 : vector<1x2x32xf32> to vector<2x32xf32>
    %123 = vector.shape_cast %117 : vector<2x32xf32> to vector<1x2x32xf32>
    tpu.vector_store %arg5[%120, %c0_52, %c0_53], %123 {strides = array<i32>} : memref<8x2x32xf32, #tpu.memory_space<vmem>>, vector<1x2x32xf32>,
    %c7_i32_54 = arith.constant 7 : i32
    %124 = arith.subi %c7_i32_54, %c1_i32 : i32
    %125 = arith.index_cast %124 : i32 to index
    %c0_55 = arith.constant 0 : index
    %c0_56 = arith.constant 0 : index
    %126 = vector.load %arg2[%125, %c0_55, %c0_56] : memref<8x2x128xf32, #tpu.memory_space<vmem>>, vector<1x2x128xf32>
    %127 = vector.shape_cast %126 : vector<1x2x128xf32> to vector<2x128xf32>
    %c0_57 = arith.constant 0 : index
    %c0_58 = arith.constant 0 : index
    %128 = vector.load %arg9[%c0_57, %c0_58] : memref<2x32xf32, #tpu.memory_space<vmem>>, vector<2x32xf32>
    %129 = arith.truncf %128 : vector<2x32xf32> to vector<2x32xbf16>
    %c0_59 = arith.constant 0 : index
    %c0_60 = arith.constant 0 : index
    %130 = vector.load %arg4[%c0_59, %c0_60] : memref<32x128xbf16, #tpu.memory_space<vmem>>, vector<32x128xbf16>
    %cst_61 = arith.constant dense<0.000000e+00> : vector<2x128xf32>
    %131 = tpu.matmul %129, %130, %cst_61 {dimension_numbers = #tpu.dot_dimension_numbers<[1], [0], [0], [1], [0, 0, 1, 1], [], []>} : vector<2x32xbf16>, vector<32x128xbf16>, vector<2x128xf32> -> vector<2x128xf32>
    %132 = arith.addf %127, %131 : vector<2x128xf32>
    %c0_62 = arith.constant 0 : index
    %c0_63 = arith.constant 0 : index
    %133 = vector.load %arg10[%c0_62, %c0_63] : memref<2x32xf32, #tpu.memory_space<vmem>>, vector<2x32xf32>
    %134 = vector.extract_strided_slice %132 {offsets = [0, 0], sizes = [2, 32], strides = [1, 1]} : vector<2x128xf32> to vector<2x32xf32>
    %135 = arith.negf %134 : vector<2x32xf32>
    %136 = math.exp %135 : vector<2x32xf32>
    %cst_64 = arith.constant 1.000000e+00 : f32
    %137 = vector.broadcast %cst_64 : f32 to vector<2x32xf32>
    %138 = arith.addf %137, %136 : vector<2x32xf32>
    %139 = arith.divf %137, %138 : vector<2x32xf32>
    %140 = vector.extract_strided_slice %132 {offsets = [0, 32], sizes = [2, 32], strides = [1, 1]} : vector<2x128xf32> to vector<2x32xf32>
    %141 = arith.negf %140 : vector<2x32xf32>
    %142 = math.exp %141 : vector<2x32xf32>
    %cst_65 = arith.constant 1.000000e+00 : f32
    %143 = vector.broadcast %cst_65 : f32 to vector<2x32xf32>
    %144 = arith.addf %143, %142 : vector<2x32xf32>
    %145 = arith.divf %143, %144 : vector<2x32xf32>
    %146 = vector.extract_strided_slice %132 {offsets = [0, 64], sizes = [2, 32], strides = [1, 1]} : vector<2x128xf32> to vector<2x32xf32>
    %147 = math.tanh %146 : vector<2x32xf32>
    %148 = vector.extract_strided_slice %132 {offsets = [0, 96], sizes = [2, 32], strides = [1, 1]} : vector<2x128xf32> to vector<2x32xf32>
    %149 = arith.negf %148 : vector<2x32xf32>
    %150 = math.exp %149 : vector<2x32xf32>
    %cst_66 = arith.constant 1.000000e+00 : f32
    %151 = vector.broadcast %cst_66 : f32 to vector<2x32xf32>
    %152 = arith.addf %151, %150 : vector<2x32xf32>
    %153 = arith.divf %151, %152 : vector<2x32xf32>
    %154 = arith.mulf %145, %133 : vector<2x32xf32>
    %155 = arith.mulf %139, %147 : vector<2x32xf32>
    %156 = arith.addf %154, %155 : vector<2x32xf32>
    %157 = math.tanh %156 : vector<2x32xf32>
    %158 = arith.mulf %153, %157 : vector<2x32xf32>
    %c0_67 = arith.constant 0 : index
    %c0_68 = arith.constant 0 : index
    %159 = vector.load %arg9[%c0_67, %c0_68] : memref<2x32xf32, #tpu.memory_space<vmem>>, vector<2x32xf32>
    tpu.vector_store %arg9[%c0_67, %c0_68], %158 {strides = array<i32>} : memref<2x32xf32, #tpu.memory_space<vmem>>, vector<2x32xf32>,
    %c0_69 = arith.constant 0 : index
    %c0_70 = arith.constant 0 : index
    %160 = vector.load %arg10[%c0_69, %c0_70] : memref<2x32xf32, #tpu.memory_space<vmem>>, vector<2x32xf32>
    tpu.vector_store %arg10[%c0_69, %c0_70], %156 {strides = array<i32>} : memref<2x32xf32, #tpu.memory_space<vmem>>, vector<2x32xf32>,
    %161 = arith.index_cast %124 : i32 to index
    %c0_71 = arith.constant 0 : index
    %c0_72 = arith.constant 0 : index
    %162 = vector.load %arg6[%161, %c0_71, %c0_72] : memref<8x2x32xf32, #tpu.memory_space<vmem>>, vector<1x2x32xf32>
    %163 = vector.shape_cast %162 : vector<1x2x32xf32> to vector<2x32xf32>
    %164 = vector.shape_cast %158 : vector<2x32xf32> to vector<1x2x32xf32>
    tpu.vector_store %arg6[%161, %c0_71, %c0_72], %164 {strides = array<i32>} : memref<8x2x32xf32, #tpu.memory_space<vmem>>, vector<1x2x32xf32>,
    %c2_i32 = arith.constant 2 : i32
    %165 = arith.index_cast %c2_i32 : i32 to index
    %c0_73 = arith.constant 0 : index
    %c0_74 = arith.constant 0 : index
    %166 = vector.load %arg1[%165, %c0_73, %c0_74] : memref<8x2x128xf32, #tpu.memory_space<vmem>>, vector<1x2x128xf32>
    %167 = vector.shape_cast %166 : vector<1x2x128xf32> to vector<2x128xf32>
    %c0_75 = arith.constant 0 : index
    %c0_76 = arith.constant 0 : index
    %168 = vector.load %arg7[%c0_75, %c0_76] : memref<2x32xf32, #tpu.memory_space<vmem>>, vector<2x32xf32>
    %169 = arith.truncf %168 : vector<2x32xf32> to vector<2x32xbf16>
    %c0_77 = arith.constant 0 : index
    %c0_78 = arith.constant 0 : index
    %170 = vector.load %arg3[%c0_77, %c0_78] : memref<32x128xbf16, #tpu.memory_space<vmem>>, vector<32x128xbf16>
    %cst_79 = arith.constant dense<0.000000e+00> : vector<2x128xf32>
    %171 = tpu.matmul %169, %170, %cst_79 {dimension_numbers = #tpu.dot_dimension_numbers<[1], [0], [0], [1], [0, 0, 1, 1], [], []>} : vector<2x32xbf16>, vector<32x128xbf16>, vector<2x128xf32> -> vector<2x128xf32>
    %172 = arith.addf %167, %171 : vector<2x128xf32>
    %c0_80 = arith.constant 0 : index
    %c0_81 = arith.constant 0 : index
    %173 = vector.load %arg8[%c0_80, %c0_81] : memref<2x32xf32, #tpu.memory_space<vmem>>, vector<2x32xf32>
    %174 = vector.extract_strided_slice %172 {offsets = [0, 0], sizes = [2, 32], strides = [1, 1]} : vector<2x128xf32> to vector<2x32xf32>
    %175 = arith.negf %174 : vector<2x32xf32>
    %176 = math.exp %175 : vector<2x32xf32>
    %cst_82 = arith.constant 1.000000e+00 : f32
    %177 = vector.broadcast %cst_82 : f32 to vector<2x32xf32>
    %178 = arith.addf %177, %176 : vector<2x32xf32>
    %179 = arith.divf %177, %178 : vector<2x32xf32>
    %180 = vector.extract_strided_slice %172 {offsets = [0, 32], sizes = [2, 32], strides = [1, 1]} : vector<2x128xf32> to vector<2x32xf32>
    %181 = arith.negf %180 : vector<2x32xf32>
    %182 = math.exp %181 : vector<2x32xf32>
    %cst_83 = arith.constant 1.000000e+00 : f32
    %183 = vector.broadcast %cst_83 : f32 to vector<2x32xf32>
    %184 = arith.addf %183, %182 : vector<2x32xf32>
    %185 = arith.divf %183, %184 : vector<2x32xf32>
    %186 = vector.extract_strided_slice %172 {offsets = [0, 64], sizes = [2, 32], strides = [1, 1]} : vector<2x128xf32> to vector<2x32xf32>
    %187 = math.tanh %186 : vector<2x32xf32>
    %188 = vector.extract_strided_slice %172 {offsets = [0, 96], sizes = [2, 32], strides = [1, 1]} : vector<2x128xf32> to vector<2x32xf32>
    %189 = arith.negf %188 : vector<2x32xf32>
    %190 = math.exp %189 : vector<2x32xf32>
    %cst_84 = arith.constant 1.000000e+00 : f32
    %191 = vector.broadcast %cst_84 : f32 to vector<2x32xf32>
    %192 = arith.addf %191, %190 : vector<2x32xf32>
    %193 = arith.divf %191, %192 : vector<2x32xf32>
    %194 = arith.mulf %185, %173 : vector<2x32xf32>
    %195 = arith.mulf %179, %187 : vector<2x32xf32>
    %196 = arith.addf %194, %195 : vector<2x32xf32>
    %197 = math.tanh %196 : vector<2x32xf32>
    %198 = arith.mulf %193, %197 : vector<2x32xf32>
    %c0_85 = arith.constant 0 : index
    %c0_86 = arith.constant 0 : index
    %199 = vector.load %arg7[%c0_85, %c0_86] : memref<2x32xf32, #tpu.memory_space<vmem>>, vector<2x32xf32>
    tpu.vector_store %arg7[%c0_85, %c0_86], %198 {strides = array<i32>} : memref<2x32xf32, #tpu.memory_space<vmem>>, vector<2x32xf32>,
    %c0_87 = arith.constant 0 : index
    %c0_88 = arith.constant 0 : index
    %200 = vector.load %arg8[%c0_87, %c0_88] : memref<2x32xf32, #tpu.memory_space<vmem>>, vector<2x32xf32>
    tpu.vector_store %arg8[%c0_87, %c0_88], %196 {strides = array<i32>} : memref<2x32xf32, #tpu.memory_space<vmem>>, vector<2x32xf32>,
    %201 = arith.index_cast %c2_i32 : i32 to index
    %c0_89 = arith.constant 0 : index
    %c0_90 = arith.constant 0 : index
    %202 = vector.load %arg5[%201, %c0_89, %c0_90] : memref<8x2x32xf32, #tpu.memory_space<vmem>>, vector<1x2x32xf32>
    %203 = vector.shape_cast %202 : vector<1x2x32xf32> to vector<2x32xf32>
    %204 = vector.shape_cast %198 : vector<2x32xf32> to vector<1x2x32xf32>
    tpu.vector_store %arg5[%201, %c0_89, %c0_90], %204 {strides = array<i32>} : memref<8x2x32xf32, #tpu.memory_space<vmem>>, vector<1x2x32xf32>,
    %c7_i32_91 = arith.constant 7 : i32
    %205 = arith.subi %c7_i32_91, %c2_i32 : i32
    %206 = arith.index_cast %205 : i32 to index
    %c0_92 = arith.constant 0 : index
    %c0_93 = arith.constant 0 : index
    %207 = vector.load %arg2[%206, %c0_92, %c0_93] : memref<8x2x128xf32, #tpu.memory_space<vmem>>, vector<1x2x128xf32>
    %208 = vector.shape_cast %207 : vector<1x2x128xf32> to vector<2x128xf32>
    %c0_94 = arith.constant 0 : index
    %c0_95 = arith.constant 0 : index
    %209 = vector.load %arg9[%c0_94, %c0_95] : memref<2x32xf32, #tpu.memory_space<vmem>>, vector<2x32xf32>
    %210 = arith.truncf %209 : vector<2x32xf32> to vector<2x32xbf16>
    %c0_96 = arith.constant 0 : index
    %c0_97 = arith.constant 0 : index
    %211 = vector.load %arg4[%c0_96, %c0_97] : memref<32x128xbf16, #tpu.memory_space<vmem>>, vector<32x128xbf16>
    %cst_98 = arith.constant dense<0.000000e+00> : vector<2x128xf32>
    %212 = tpu.matmul %210, %211, %cst_98 {dimension_numbers = #tpu.dot_dimension_numbers<[1], [0], [0], [1], [0, 0, 1, 1], [], []>} : vector<2x32xbf16>, vector<32x128xbf16>, vector<2x128xf32> -> vector<2x128xf32>
    %213 = arith.addf %208, %212 : vector<2x128xf32>
    %c0_99 = arith.constant 0 : index
    %c0_100 = arith.constant 0 : index
    %214 = vector.load %arg10[%c0_99, %c0_100] : memref<2x32xf32, #tpu.memory_space<vmem>>, vector<2x32xf32>
    %215 = vector.extract_strided_slice %213 {offsets = [0, 0], sizes = [2, 32], strides = [1, 1]} : vector<2x128xf32> to vector<2x32xf32>
    %216 = arith.negf %215 : vector<2x32xf32>
    %217 = math.exp %216 : vector<2x32xf32>
    %cst_101 = arith.constant 1.000000e+00 : f32
    %218 = vector.broadcast %cst_101 : f32 to vector<2x32xf32>
    %219 = arith.addf %218, %217 : vector<2x32xf32>
    %220 = arith.divf %218, %219 : vector<2x32xf32>
    %221 = vector.extract_strided_slice %213 {offsets = [0, 32], sizes = [2, 32], strides = [1, 1]} : vector<2x128xf32> to vector<2x32xf32>
    %222 = arith.negf %221 : vector<2x32xf32>
    %223 = math.exp %222 : vector<2x32xf32>
    %cst_102 = arith.constant 1.000000e+00 : f32
    %224 = vector.broadcast %cst_102 : f32 to vector<2x32xf32>
    %225 = arith.addf %224, %223 : vector<2x32xf32>
    %226 = arith.divf %224, %225 : vector<2x32xf32>
    %227 = vector.extract_strided_slice %213 {offsets = [0, 64], sizes = [2, 32], strides = [1, 1]} : vector<2x128xf32> to vector<2x32xf32>
    %228 = math.tanh %227 : vector<2x32xf32>
    %229 = vector.extract_strided_slice %213 {offsets = [0, 96], sizes = [2, 32], strides = [1, 1]} : vector<2x128xf32> to vector<2x32xf32>
    %230 = arith.negf %229 : vector<2x32xf32>
    %231 = math.exp %230 : vector<2x32xf32>
    %cst_103 = arith.constant 1.000000e+00 : f32
    %232 = vector.broadcast %cst_103 : f32 to vector<2x32xf32>
    %233 = arith.addf %232, %231 : vector<2x32xf32>
    %234 = arith.divf %232, %233 : vector<2x32xf32>
    %235 = arith.mulf %226, %214 : vector<2x32xf32>
    %236 = arith.mulf %220, %228 : vector<2x32xf32>
    %237 = arith.addf %235, %236 : vector<2x32xf32>
    %238 = math.tanh %237 : vector<2x32xf32>
    %239 = arith.mulf %234, %238 : vector<2x32xf32>
    %c0_104 = arith.constant 0 : index
    %c0_105 = arith.constant 0 : index
    %240 = vector.load %arg9[%c0_104, %c0_105] : memref<2x32xf32, #tpu.memory_space<vmem>>, vector<2x32xf32>
    tpu.vector_store %arg9[%c0_104, %c0_105], %239 {strides = array<i32>} : memref<2x32xf32, #tpu.memory_space<vmem>>, vector<2x32xf32>,
    %c0_106 = arith.constant 0 : index
    %c0_107 = arith.constant 0 : index
    %241 = vector.load %arg10[%c0_106, %c0_107] : memref<2x32xf32, #tpu.memory_space<vmem>>, vector<2x32xf32>
    tpu.vector_store %arg10[%c0_106, %c0_107], %237 {strides = array<i32>} : memref<2x32xf32, #tpu.memory_space<vmem>>, vector<2x32xf32>,
    %242 = arith.index_cast %205 : i32 to index
    %c0_108 = arith.constant 0 : index
    %c0_109 = arith.constant 0 : index
    %243 = vector.load %arg6[%242, %c0_108, %c0_109] : memref<8x2x32xf32, #tpu.memory_space<vmem>>, vector<1x2x32xf32>
    %244 = vector.shape_cast %243 : vector<1x2x32xf32> to vector<2x32xf32>
    %245 = vector.shape_cast %239 : vector<2x32xf32> to vector<1x2x32xf32>
    tpu.vector_store %arg6[%242, %c0_108, %c0_109], %245 {strides = array<i32>} : memref<8x2x32xf32, #tpu.memory_space<vmem>>, vector<1x2x32xf32>,
    %c3_i32 = arith.constant 3 : i32
    %246 = arith.index_cast %c3_i32 : i32 to index
    %c0_110 = arith.constant 0 : index
    %c0_111 = arith.constant 0 : index
    %247 = vector.load %arg1[%246, %c0_110, %c0_111] : memref<8x2x128xf32, #tpu.memory_space<vmem>>, vector<1x2x128xf32>
    %248 = vector.shape_cast %247 : vector<1x2x128xf32> to vector<2x128xf32>
    %c0_112 = arith.constant 0 : index
    %c0_113 = arith.constant 0 : index
    %249 = vector.load %arg7[%c0_112, %c0_113] : memref<2x32xf32, #tpu.memory_space<vmem>>, vector<2x32xf32>
    %250 = arith.truncf %249 : vector<2x32xf32> to vector<2x32xbf16>
    %c0_114 = arith.constant 0 : index
    %c0_115 = arith.constant 0 : index
    %251 = vector.load %arg3[%c0_114, %c0_115] : memref<32x128xbf16, #tpu.memory_space<vmem>>, vector<32x128xbf16>
    %cst_116 = arith.constant dense<0.000000e+00> : vector<2x128xf32>
    %252 = tpu.matmul %250, %251, %cst_116 {dimension_numbers = #tpu.dot_dimension_numbers<[1], [0], [0], [1], [0, 0, 1, 1], [], []>} : vector<2x32xbf16>, vector<32x128xbf16>, vector<2x128xf32> -> vector<2x128xf32>
    %253 = arith.addf %248, %252 : vector<2x128xf32>
    %c0_117 = arith.constant 0 : index
    %c0_118 = arith.constant 0 : index
    %254 = vector.load %arg8[%c0_117, %c0_118] : memref<2x32xf32, #tpu.memory_space<vmem>>, vector<2x32xf32>
    %255 = vector.extract_strided_slice %253 {offsets = [0, 0], sizes = [2, 32], strides = [1, 1]} : vector<2x128xf32> to vector<2x32xf32>
    %256 = arith.negf %255 : vector<2x32xf32>
    %257 = math.exp %256 : vector<2x32xf32>
    %cst_119 = arith.constant 1.000000e+00 : f32
    %258 = vector.broadcast %cst_119 : f32 to vector<2x32xf32>
    %259 = arith.addf %258, %257 : vector<2x32xf32>
    %260 = arith.divf %258, %259 : vector<2x32xf32>
    %261 = vector.extract_strided_slice %253 {offsets = [0, 32], sizes = [2, 32], strides = [1, 1]} : vector<2x128xf32> to vector<2x32xf32>
    %262 = arith.negf %261 : vector<2x32xf32>
    %263 = math.exp %262 : vector<2x32xf32>
    %cst_120 = arith.constant 1.000000e+00 : f32
    %264 = vector.broadcast %cst_120 : f32 to vector<2x32xf32>
    %265 = arith.addf %264, %263 : vector<2x32xf32>
    %266 = arith.divf %264, %265 : vector<2x32xf32>
    %267 = vector.extract_strided_slice %253 {offsets = [0, 64], sizes = [2, 32], strides = [1, 1]} : vector<2x128xf32> to vector<2x32xf32>
    %268 = math.tanh %267 : vector<2x32xf32>
    %269 = vector.extract_strided_slice %253 {offsets = [0, 96], sizes = [2, 32], strides = [1, 1]} : vector<2x128xf32> to vector<2x32xf32>
    %270 = arith.negf %269 : vector<2x32xf32>
    %271 = math.exp %270 : vector<2x32xf32>
    %cst_121 = arith.constant 1.000000e+00 : f32
    %272 = vector.broadcast %cst_121 : f32 to vector<2x32xf32>
    %273 = arith.addf %272, %271 : vector<2x32xf32>
    %274 = arith.divf %272, %273 : vector<2x32xf32>
    %275 = arith.mulf %266, %254 : vector<2x32xf32>
    %276 = arith.mulf %260, %268 : vector<2x32xf32>
    %277 = arith.addf %275, %276 : vector<2x32xf32>
    %278 = math.tanh %277 : vector<2x32xf32>
    %279 = arith.mulf %274, %278 : vector<2x32xf32>
    %c0_122 = arith.constant 0 : index
    %c0_123 = arith.constant 0 : index
    %280 = vector.load %arg7[%c0_122, %c0_123] : memref<2x32xf32, #tpu.memory_space<vmem>>, vector<2x32xf32>
    tpu.vector_store %arg7[%c0_122, %c0_123], %279 {strides = array<i32>} : memref<2x32xf32, #tpu.memory_space<vmem>>, vector<2x32xf32>,
    %c0_124 = arith.constant 0 : index
    %c0_125 = arith.constant 0 : index
    %281 = vector.load %arg8[%c0_124, %c0_125] : memref<2x32xf32, #tpu.memory_space<vmem>>, vector<2x32xf32>
    tpu.vector_store %arg8[%c0_124, %c0_125], %277 {strides = array<i32>} : memref<2x32xf32, #tpu.memory_space<vmem>>, vector<2x32xf32>,
    %282 = arith.index_cast %c3_i32 : i32 to index
    %c0_126 = arith.constant 0 : index
    %c0_127 = arith.constant 0 : index
    %283 = vector.load %arg5[%282, %c0_126, %c0_127] : memref<8x2x32xf32, #tpu.memory_space<vmem>>, vector<1x2x32xf32>
    %284 = vector.shape_cast %283 : vector<1x2x32xf32> to vector<2x32xf32>
    %285 = vector.shape_cast %279 : vector<2x32xf32> to vector<1x2x32xf32>
    tpu.vector_store %arg5[%282, %c0_126, %c0_127], %285 {strides = array<i32>} : memref<8x2x32xf32, #tpu.memory_space<vmem>>, vector<1x2x32xf32>,
    %c7_i32_128 = arith.constant 7 : i32
    %286 = arith.subi %c7_i32_128, %c3_i32 : i32
    %287 = arith.index_cast %286 : i32 to index
    %c0_129 = arith.constant 0 : index
    %c0_130 = arith.constant 0 : index
    %288 = vector.load %arg2[%287, %c0_129, %c0_130] : memref<8x2x128xf32, #tpu.memory_space<vmem>>, vector<1x2x128xf32>
    %289 = vector.shape_cast %288 : vector<1x2x128xf32> to vector<2x128xf32>
    %c0_131 = arith.constant 0 : index
    %c0_132 = arith.constant 0 : index
    %290 = vector.load %arg9[%c0_131, %c0_132] : memref<2x32xf32, #tpu.memory_space<vmem>>, vector<2x32xf32>
    %291 = arith.truncf %290 : vector<2x32xf32> to vector<2x32xbf16>
    %c0_133 = arith.constant 0 : index
    %c0_134 = arith.constant 0 : index
    %292 = vector.load %arg4[%c0_133, %c0_134] : memref<32x128xbf16, #tpu.memory_space<vmem>>, vector<32x128xbf16>
    %cst_135 = arith.constant dense<0.000000e+00> : vector<2x128xf32>
    %293 = tpu.matmul %291, %292, %cst_135 {dimension_numbers = #tpu.dot_dimension_numbers<[1], [0], [0], [1], [0, 0, 1, 1], [], []>} : vector<2x32xbf16>, vector<32x128xbf16>, vector<2x128xf32> -> vector<2x128xf32>
    %294 = arith.addf %289, %293 : vector<2x128xf32>
    %c0_136 = arith.constant 0 : index
    %c0_137 = arith.constant 0 : index
    %295 = vector.load %arg10[%c0_136, %c0_137] : memref<2x32xf32, #tpu.memory_space<vmem>>, vector<2x32xf32>
    %296 = vector.extract_strided_slice %294 {offsets = [0, 0], sizes = [2, 32], strides = [1, 1]} : vector<2x128xf32> to vector<2x32xf32>
    %297 = arith.negf %296 : vector<2x32xf32>
    %298 = math.exp %297 : vector<2x32xf32>
    %cst_138 = arith.constant 1.000000e+00 : f32
    %299 = vector.broadcast %cst_138 : f32 to vector<2x32xf32>
    %300 = arith.addf %299, %298 : vector<2x32xf32>
    %301 = arith.divf %299, %300 : vector<2x32xf32>
    %302 = vector.extract_strided_slice %294 {offsets = [0, 32], sizes = [2, 32], strides = [1, 1]} : vector<2x128xf32> to vector<2x32xf32>
    %303 = arith.negf %302 : vector<2x32xf32>
    %304 = math.exp %303 : vector<2x32xf32>
    %cst_139 = arith.constant 1.000000e+00 : f32
    %305 = vector.broadcast %cst_139 : f32 to vector<2x32xf32>
    %306 = arith.addf %305, %304 : vector<2x32xf32>
    %307 = arith.divf %305, %306 : vector<2x32xf32>
    %308 = vector.extract_strided_slice %294 {offsets = [0, 64], sizes = [2, 32], strides = [1, 1]} : vector<2x128xf32> to vector<2x32xf32>
    %309 = math.tanh %308 : vector<2x32xf32>
    %310 = vector.extract_strided_slice %294 {offsets = [0, 96], sizes = [2, 32], strides = [1, 1]} : vector<2x128xf32> to vector<2x32xf32>
    %311 = arith.negf %310 : vector<2x32xf32>
    %312 = math.exp %311 : vector<2x32xf32>
    %cst_140 = arith.constant 1.000000e+00 : f32
    %313 = vector.broadcast %cst_140 : f32 to vector<2x32xf32>
    %314 = arith.addf %313, %312 : vector<2x32xf32>
    %315 = arith.divf %313, %314 : vector<2x32xf32>
    %316 = arith.mulf %307, %295 : vector<2x32xf32>
    %317 = arith.mulf %301, %309 : vector<2x32xf32>
    %318 = arith.addf %316, %317 : vector<2x32xf32>
    %319 = math.tanh %318 : vector<2x32xf32>
    %320 = arith.mulf %315, %319 : vector<2x32xf32>
    %c0_141 = arith.constant 0 : index
    %c0_142 = arith.constant 0 : index
    %321 = vector.load %arg9[%c0_141, %c0_142] : memref<2x32xf32, #tpu.memory_space<vmem>>, vector<2x32xf32>
    tpu.vector_store %arg9[%c0_141, %c0_142], %320 {strides = array<i32>} : memref<2x32xf32, #tpu.memory_space<vmem>>, vector<2x32xf32>,
    %c0_143 = arith.constant 0 : index
    %c0_144 = arith.constant 0 : index
    %322 = vector.load %arg10[%c0_143, %c0_144] : memref<2x32xf32, #tpu.memory_space<vmem>>, vector<2x32xf32>
    tpu.vector_store %arg10[%c0_143, %c0_144], %318 {strides = array<i32>} : memref<2x32xf32, #tpu.memory_space<vmem>>, vector<2x32xf32>,
    %323 = arith.index_cast %286 : i32 to index
    %c0_145 = arith.constant 0 : index
    %c0_146 = arith.constant 0 : index
    %324 = vector.load %arg6[%323, %c0_145, %c0_146] : memref<8x2x32xf32, #tpu.memory_space<vmem>>, vector<1x2x32xf32>
    %325 = vector.shape_cast %324 : vector<1x2x32xf32> to vector<2x32xf32>
    %326 = vector.shape_cast %320 : vector<2x32xf32> to vector<1x2x32xf32>
    tpu.vector_store %arg6[%323, %c0_145, %c0_146], %326 {strides = array<i32>} : memref<8x2x32xf32, #tpu.memory_space<vmem>>, vector<1x2x32xf32>,
    %c4_i32 = arith.constant 4 : i32
    %327 = arith.index_cast %c4_i32 : i32 to index
    %c0_147 = arith.constant 0 : index
    %c0_148 = arith.constant 0 : index
    %328 = vector.load %arg1[%327, %c0_147, %c0_148] : memref<8x2x128xf32, #tpu.memory_space<vmem>>, vector<1x2x128xf32>
    %329 = vector.shape_cast %328 : vector<1x2x128xf32> to vector<2x128xf32>
    %c0_149 = arith.constant 0 : index
    %c0_150 = arith.constant 0 : index
    %330 = vector.load %arg7[%c0_149, %c0_150] : memref<2x32xf32, #tpu.memory_space<vmem>>, vector<2x32xf32>
    %331 = arith.truncf %330 : vector<2x32xf32> to vector<2x32xbf16>
    %c0_151 = arith.constant 0 : index
    %c0_152 = arith.constant 0 : index
    %332 = vector.load %arg3[%c0_151, %c0_152] : memref<32x128xbf16, #tpu.memory_space<vmem>>, vector<32x128xbf16>
    %cst_153 = arith.constant dense<0.000000e+00> : vector<2x128xf32>
    %333 = tpu.matmul %331, %332, %cst_153 {dimension_numbers = #tpu.dot_dimension_numbers<[1], [0], [0], [1], [0, 0, 1, 1], [], []>} : vector<2x32xbf16>, vector<32x128xbf16>, vector<2x128xf32> -> vector<2x128xf32>
    %334 = arith.addf %329, %333 : vector<2x128xf32>
    %c0_154 = arith.constant 0 : index
    %c0_155 = arith.constant 0 : index
    %335 = vector.load %arg8[%c0_154, %c0_155] : memref<2x32xf32, #tpu.memory_space<vmem>>, vector<2x32xf32>
    %336 = vector.extract_strided_slice %334 {offsets = [0, 0], sizes = [2, 32], strides = [1, 1]} : vector<2x128xf32> to vector<2x32xf32>
    %337 = arith.negf %336 : vector<2x32xf32>
    %338 = math.exp %337 : vector<2x32xf32>
    %cst_156 = arith.constant 1.000000e+00 : f32
    %339 = vector.broadcast %cst_156 : f32 to vector<2x32xf32>
    %340 = arith.addf %339, %338 : vector<2x32xf32>
    %341 = arith.divf %339, %340 : vector<2x32xf32>
    %342 = vector.extract_strided_slice %334 {offsets = [0, 32], sizes = [2, 32], strides = [1, 1]} : vector<2x128xf32> to vector<2x32xf32>
    %343 = arith.negf %342 : vector<2x32xf32>
    %344 = math.exp %343 : vector<2x32xf32>
    %cst_157 = arith.constant 1.000000e+00 : f32
    %345 = vector.broadcast %cst_157 : f32 to vector<2x32xf32>
    %346 = arith.addf %345, %344 : vector<2x32xf32>
    %347 = arith.divf %345, %346 : vector<2x32xf32>
    %348 = vector.extract_strided_slice %334 {offsets = [0, 64], sizes = [2, 32], strides = [1, 1]} : vector<2x128xf32> to vector<2x32xf32>
    %349 = math.tanh %348 : vector<2x32xf32>
    %350 = vector.extract_strided_slice %334 {offsets = [0, 96], sizes = [2, 32], strides = [1, 1]} : vector<2x128xf32> to vector<2x32xf32>
    %351 = arith.negf %350 : vector<2x32xf32>
    %352 = math.exp %351 : vector<2x32xf32>
    %cst_158 = arith.constant 1.000000e+00 : f32
    %353 = vector.broadcast %cst_158 : f32 to vector<2x32xf32>
    %354 = arith.addf %353, %352 : vector<2x32xf32>
    %355 = arith.divf %353, %354 : vector<2x32xf32>
    %356 = arith.mulf %347, %335 : vector<2x32xf32>
    %357 = arith.mulf %341, %349 : vector<2x32xf32>
    %358 = arith.addf %356, %357 : vector<2x32xf32>
    %359 = math.tanh %358 : vector<2x32xf32>
    %360 = arith.mulf %355, %359 : vector<2x32xf32>
    %c0_159 = arith.constant 0 : index
    %c0_160 = arith.constant 0 : index
    %361 = vector.load %arg7[%c0_159, %c0_160] : memref<2x32xf32, #tpu.memory_space<vmem>>, vector<2x32xf32>
    tpu.vector_store %arg7[%c0_159, %c0_160], %360 {strides = array<i32>} : memref<2x32xf32, #tpu.memory_space<vmem>>, vector<2x32xf32>,
    %c0_161 = arith.constant 0 : index
    %c0_162 = arith.constant 0 : index
    %362 = vector.load %arg8[%c0_161, %c0_162] : memref<2x32xf32, #tpu.memory_space<vmem>>, vector<2x32xf32>
    tpu.vector_store %arg8[%c0_161, %c0_162], %358 {strides = array<i32>} : memref<2x32xf32, #tpu.memory_space<vmem>>, vector<2x32xf32>,
    %363 = arith.index_cast %c4_i32 : i32 to index
    %c0_163 = arith.constant 0 : index
    %c0_164 = arith.constant 0 : index
    %364 = vector.load %arg5[%363, %c0_163, %c0_164] : memref<8x2x32xf32, #tpu.memory_space<vmem>>, vector<1x2x32xf32>
    %365 = vector.shape_cast %364 : vector<1x2x32xf32> to vector<2x32xf32>
    %366 = vector.shape_cast %360 : vector<2x32xf32> to vector<1x2x32xf32>
    tpu.vector_store %arg5[%363, %c0_163, %c0_164], %366 {strides = array<i32>} : memref<8x2x32xf32, #tpu.memory_space<vmem>>, vector<1x2x32xf32>,
    %c7_i32_165 = arith.constant 7 : i32
    %367 = arith.subi %c7_i32_165, %c4_i32 : i32
    %368 = arith.index_cast %367 : i32 to index
    %c0_166 = arith.constant 0 : index
    %c0_167 = arith.constant 0 : index
    %369 = vector.load %arg2[%368, %c0_166, %c0_167] : memref<8x2x128xf32, #tpu.memory_space<vmem>>, vector<1x2x128xf32>
    %370 = vector.shape_cast %369 : vector<1x2x128xf32> to vector<2x128xf32>
    %c0_168 = arith.constant 0 : index
    %c0_169 = arith.constant 0 : index
    %371 = vector.load %arg9[%c0_168, %c0_169] : memref<2x32xf32, #tpu.memory_space<vmem>>, vector<2x32xf32>
    %372 = arith.truncf %371 : vector<2x32xf32> to vector<2x32xbf16>
    %c0_170 = arith.constant 0 : index
    %c0_171 = arith.constant 0 : index
    %373 = vector.load %arg4[%c0_170, %c0_171] : memref<32x128xbf16, #tpu.memory_space<vmem>>, vector<32x128xbf16>
    %cst_172 = arith.constant dense<0.000000e+00> : vector<2x128xf32>
    %374 = tpu.matmul %372, %373, %cst_172 {dimension_numbers = #tpu.dot_dimension_numbers<[1], [0], [0], [1], [0, 0, 1, 1], [], []>} : vector<2x32xbf16>, vector<32x128xbf16>, vector<2x128xf32> -> vector<2x128xf32>
    %375 = arith.addf %370, %374 : vector<2x128xf32>
    %c0_173 = arith.constant 0 : index
    %c0_174 = arith.constant 0 : index
    %376 = vector.load %arg10[%c0_173, %c0_174] : memref<2x32xf32, #tpu.memory_space<vmem>>, vector<2x32xf32>
    %377 = vector.extract_strided_slice %375 {offsets = [0, 0], sizes = [2, 32], strides = [1, 1]} : vector<2x128xf32> to vector<2x32xf32>
    %378 = arith.negf %377 : vector<2x32xf32>
    %379 = math.exp %378 : vector<2x32xf32>
    %cst_175 = arith.constant 1.000000e+00 : f32
    %380 = vector.broadcast %cst_175 : f32 to vector<2x32xf32>
    %381 = arith.addf %380, %379 : vector<2x32xf32>
    %382 = arith.divf %380, %381 : vector<2x32xf32>
    %383 = vector.extract_strided_slice %375 {offsets = [0, 32], sizes = [2, 32], strides = [1, 1]} : vector<2x128xf32> to vector<2x32xf32>
    %384 = arith.negf %383 : vector<2x32xf32>
    %385 = math.exp %384 : vector<2x32xf32>
    %cst_176 = arith.constant 1.000000e+00 : f32
    %386 = vector.broadcast %cst_176 : f32 to vector<2x32xf32>
    %387 = arith.addf %386, %385 : vector<2x32xf32>
    %388 = arith.divf %386, %387 : vector<2x32xf32>
    %389 = vector.extract_strided_slice %375 {offsets = [0, 64], sizes = [2, 32], strides = [1, 1]} : vector<2x128xf32> to vector<2x32xf32>
    %390 = math.tanh %389 : vector<2x32xf32>
    %391 = vector.extract_strided_slice %375 {offsets = [0, 96], sizes = [2, 32], strides = [1, 1]} : vector<2x128xf32> to vector<2x32xf32>
    %392 = arith.negf %391 : vector<2x32xf32>
    %393 = math.exp %392 : vector<2x32xf32>
    %cst_177 = arith.constant 1.000000e+00 : f32
    %394 = vector.broadcast %cst_177 : f32 to vector<2x32xf32>
    %395 = arith.addf %394, %393 : vector<2x32xf32>
    %396 = arith.divf %394, %395 : vector<2x32xf32>
    %397 = arith.mulf %388, %376 : vector<2x32xf32>
    %398 = arith.mulf %382, %390 : vector<2x32xf32>
    %399 = arith.addf %397, %398 : vector<2x32xf32>
    %400 = math.tanh %399 : vector<2x32xf32>
    %401 = arith.mulf %396, %400 : vector<2x32xf32>
    %c0_178 = arith.constant 0 : index
    %c0_179 = arith.constant 0 : index
    %402 = vector.load %arg9[%c0_178, %c0_179] : memref<2x32xf32, #tpu.memory_space<vmem>>, vector<2x32xf32>
    tpu.vector_store %arg9[%c0_178, %c0_179], %401 {strides = array<i32>} : memref<2x32xf32, #tpu.memory_space<vmem>>, vector<2x32xf32>,
    %c0_180 = arith.constant 0 : index
    %c0_181 = arith.constant 0 : index
    %403 = vector.load %arg10[%c0_180, %c0_181] : memref<2x32xf32, #tpu.memory_space<vmem>>, vector<2x32xf32>
    tpu.vector_store %arg10[%c0_180, %c0_181], %399 {strides = array<i32>} : memref<2x32xf32, #tpu.memory_space<vmem>>, vector<2x32xf32>,
    %404 = arith.index_cast %367 : i32 to index
    %c0_182 = arith.constant 0 : index
    %c0_183 = arith.constant 0 : index
    %405 = vector.load %arg6[%404, %c0_182, %c0_183] : memref<8x2x32xf32, #tpu.memory_space<vmem>>, vector<1x2x32xf32>
    %406 = vector.shape_cast %405 : vector<1x2x32xf32> to vector<2x32xf32>
    %407 = vector.shape_cast %401 : vector<2x32xf32> to vector<1x2x32xf32>
    tpu.vector_store %arg6[%404, %c0_182, %c0_183], %407 {strides = array<i32>} : memref<8x2x32xf32, #tpu.memory_space<vmem>>, vector<1x2x32xf32>,
    %c5_i32 = arith.constant 5 : i32
    %408 = arith.index_cast %c5_i32 : i32 to index
    %c0_184 = arith.constant 0 : index
    %c0_185 = arith.constant 0 : index
    %409 = vector.load %arg1[%408, %c0_184, %c0_185] : memref<8x2x128xf32, #tpu.memory_space<vmem>>, vector<1x2x128xf32>
    %410 = vector.shape_cast %409 : vector<1x2x128xf32> to vector<2x128xf32>
    %c0_186 = arith.constant 0 : index
    %c0_187 = arith.constant 0 : index
    %411 = vector.load %arg7[%c0_186, %c0_187] : memref<2x32xf32, #tpu.memory_space<vmem>>, vector<2x32xf32>
    %412 = arith.truncf %411 : vector<2x32xf32> to vector<2x32xbf16>
    %c0_188 = arith.constant 0 : index
    %c0_189 = arith.constant 0 : index
    %413 = vector.load %arg3[%c0_188, %c0_189] : memref<32x128xbf16, #tpu.memory_space<vmem>>, vector<32x128xbf16>
    %cst_190 = arith.constant dense<0.000000e+00> : vector<2x128xf32>
    %414 = tpu.matmul %412, %413, %cst_190 {dimension_numbers = #tpu.dot_dimension_numbers<[1], [0], [0], [1], [0, 0, 1, 1], [], []>} : vector<2x32xbf16>, vector<32x128xbf16>, vector<2x128xf32> -> vector<2x128xf32>
    %415 = arith.addf %410, %414 : vector<2x128xf32>
    %c0_191 = arith.constant 0 : index
    %c0_192 = arith.constant 0 : index
    %416 = vector.load %arg8[%c0_191, %c0_192] : memref<2x32xf32, #tpu.memory_space<vmem>>, vector<2x32xf32>
    %417 = vector.extract_strided_slice %415 {offsets = [0, 0], sizes = [2, 32], strides = [1, 1]} : vector<2x128xf32> to vector<2x32xf32>
    %418 = arith.negf %417 : vector<2x32xf32>
    %419 = math.exp %418 : vector<2x32xf32>
    %cst_193 = arith.constant 1.000000e+00 : f32
    %420 = vector.broadcast %cst_193 : f32 to vector<2x32xf32>
    %421 = arith.addf %420, %419 : vector<2x32xf32>
    %422 = arith.divf %420, %421 : vector<2x32xf32>
    %423 = vector.extract_strided_slice %415 {offsets = [0, 32], sizes = [2, 32], strides = [1, 1]} : vector<2x128xf32> to vector<2x32xf32>
    %424 = arith.negf %423 : vector<2x32xf32>
    %425 = math.exp %424 : vector<2x32xf32>
    %cst_194 = arith.constant 1.000000e+00 : f32
    %426 = vector.broadcast %cst_194 : f32 to vector<2x32xf32>
    %427 = arith.addf %426, %425 : vector<2x32xf32>
    %428 = arith.divf %426, %427 : vector<2x32xf32>
    %429 = vector.extract_strided_slice %415 {offsets = [0, 64], sizes = [2, 32], strides = [1, 1]} : vector<2x128xf32> to vector<2x32xf32>
    %430 = math.tanh %429 : vector<2x32xf32>
    %431 = vector.extract_strided_slice %415 {offsets = [0, 96], sizes = [2, 32], strides = [1, 1]} : vector<2x128xf32> to vector<2x32xf32>
    %432 = arith.negf %431 : vector<2x32xf32>
    %433 = math.exp %432 : vector<2x32xf32>
    %cst_195 = arith.constant 1.000000e+00 : f32
    %434 = vector.broadcast %cst_195 : f32 to vector<2x32xf32>
    %435 = arith.addf %434, %433 : vector<2x32xf32>
    %436 = arith.divf %434, %435 : vector<2x32xf32>
    %437 = arith.mulf %428, %416 : vector<2x32xf32>
    %438 = arith.mulf %422, %430 : vector<2x32xf32>
    %439 = arith.addf %437, %438 : vector<2x32xf32>
    %440 = math.tanh %439 : vector<2x32xf32>
    %441 = arith.mulf %436, %440 : vector<2x32xf32>
    %c0_196 = arith.constant 0 : index
    %c0_197 = arith.constant 0 : index
    %442 = vector.load %arg7[%c0_196, %c0_197] : memref<2x32xf32, #tpu.memory_space<vmem>>, vector<2x32xf32>
    tpu.vector_store %arg7[%c0_196, %c0_197], %441 {strides = array<i32>} : memref<2x32xf32, #tpu.memory_space<vmem>>, vector<2x32xf32>,
    %c0_198 = arith.constant 0 : index
    %c0_199 = arith.constant 0 : index
    %443 = vector.load %arg8[%c0_198, %c0_199] : memref<2x32xf32, #tpu.memory_space<vmem>>, vector<2x32xf32>
    tpu.vector_store %arg8[%c0_198, %c0_199], %439 {strides = array<i32>} : memref<2x32xf32, #tpu.memory_space<vmem>>, vector<2x32xf32>,
    %444 = arith.index_cast %c5_i32 : i32 to index
    %c0_200 = arith.constant 0 : index
    %c0_201 = arith.constant 0 : index
    %445 = vector.load %arg5[%444, %c0_200, %c0_201] : memref<8x2x32xf32, #tpu.memory_space<vmem>>, vector<1x2x32xf32>
    %446 = vector.shape_cast %445 : vector<1x2x32xf32> to vector<2x32xf32>
    %447 = vector.shape_cast %441 : vector<2x32xf32> to vector<1x2x32xf32>
    tpu.vector_store %arg5[%444, %c0_200, %c0_201], %447 {strides = array<i32>} : memref<8x2x32xf32, #tpu.memory_space<vmem>>, vector<1x2x32xf32>,
    %c7_i32_202 = arith.constant 7 : i32
    %448 = arith.subi %c7_i32_202, %c5_i32 : i32
    %449 = arith.index_cast %448 : i32 to index
    %c0_203 = arith.constant 0 : index
    %c0_204 = arith.constant 0 : index
    %450 = vector.load %arg2[%449, %c0_203, %c0_204] : memref<8x2x128xf32, #tpu.memory_space<vmem>>, vector<1x2x128xf32>
    %451 = vector.shape_cast %450 : vector<1x2x128xf32> to vector<2x128xf32>
    %c0_205 = arith.constant 0 : index
    %c0_206 = arith.constant 0 : index
    %452 = vector.load %arg9[%c0_205, %c0_206] : memref<2x32xf32, #tpu.memory_space<vmem>>, vector<2x32xf32>
    %453 = arith.truncf %452 : vector<2x32xf32> to vector<2x32xbf16>
    %c0_207 = arith.constant 0 : index
    %c0_208 = arith.constant 0 : index
    %454 = vector.load %arg4[%c0_207, %c0_208] : memref<32x128xbf16, #tpu.memory_space<vmem>>, vector<32x128xbf16>
    %cst_209 = arith.constant dense<0.000000e+00> : vector<2x128xf32>
    %455 = tpu.matmul %453, %454, %cst_209 {dimension_numbers = #tpu.dot_dimension_numbers<[1], [0], [0], [1], [0, 0, 1, 1], [], []>} : vector<2x32xbf16>, vector<32x128xbf16>, vector<2x128xf32> -> vector<2x128xf32>
    %456 = arith.addf %451, %455 : vector<2x128xf32>
    %c0_210 = arith.constant 0 : index
    %c0_211 = arith.constant 0 : index
    %457 = vector.load %arg10[%c0_210, %c0_211] : memref<2x32xf32, #tpu.memory_space<vmem>>, vector<2x32xf32>
    %458 = vector.extract_strided_slice %456 {offsets = [0, 0], sizes = [2, 32], strides = [1, 1]} : vector<2x128xf32> to vector<2x32xf32>
    %459 = arith.negf %458 : vector<2x32xf32>
    %460 = math.exp %459 : vector<2x32xf32>
    %cst_212 = arith.constant 1.000000e+00 : f32
    %461 = vector.broadcast %cst_212 : f32 to vector<2x32xf32>
    %462 = arith.addf %461, %460 : vector<2x32xf32>
    %463 = arith.divf %461, %462 : vector<2x32xf32>
    %464 = vector.extract_strided_slice %456 {offsets = [0, 32], sizes = [2, 32], strides = [1, 1]} : vector<2x128xf32> to vector<2x32xf32>
    %465 = arith.negf %464 : vector<2x32xf32>
    %466 = math.exp %465 : vector<2x32xf32>
    %cst_213 = arith.constant 1.000000e+00 : f32
    %467 = vector.broadcast %cst_213 : f32 to vector<2x32xf32>
    %468 = arith.addf %467, %466 : vector<2x32xf32>
    %469 = arith.divf %467, %468 : vector<2x32xf32>
    %470 = vector.extract_strided_slice %456 {offsets = [0, 64], sizes = [2, 32], strides = [1, 1]} : vector<2x128xf32> to vector<2x32xf32>
    %471 = math.tanh %470 : vector<2x32xf32>
    %472 = vector.extract_strided_slice %456 {offsets = [0, 96], sizes = [2, 32], strides = [1, 1]} : vector<2x128xf32> to vector<2x32xf32>
    %473 = arith.negf %472 : vector<2x32xf32>
    %474 = math.exp %473 : vector<2x32xf32>
    %cst_214 = arith.constant 1.000000e+00 : f32
    %475 = vector.broadcast %cst_214 : f32 to vector<2x32xf32>
    %476 = arith.addf %475, %474 : vector<2x32xf32>
    %477 = arith.divf %475, %476 : vector<2x32xf32>
    %478 = arith.mulf %469, %457 : vector<2x32xf32>
    %479 = arith.mulf %463, %471 : vector<2x32xf32>
    %480 = arith.addf %478, %479 : vector<2x32xf32>
    %481 = math.tanh %480 : vector<2x32xf32>
    %482 = arith.mulf %477, %481 : vector<2x32xf32>
    %c0_215 = arith.constant 0 : index
    %c0_216 = arith.constant 0 : index
    %483 = vector.load %arg9[%c0_215, %c0_216] : memref<2x32xf32, #tpu.memory_space<vmem>>, vector<2x32xf32>
    tpu.vector_store %arg9[%c0_215, %c0_216], %482 {strides = array<i32>} : memref<2x32xf32, #tpu.memory_space<vmem>>, vector<2x32xf32>,
    %c0_217 = arith.constant 0 : index
    %c0_218 = arith.constant 0 : index
    %484 = vector.load %arg10[%c0_217, %c0_218] : memref<2x32xf32, #tpu.memory_space<vmem>>, vector<2x32xf32>
    tpu.vector_store %arg10[%c0_217, %c0_218], %480 {strides = array<i32>} : memref<2x32xf32, #tpu.memory_space<vmem>>, vector<2x32xf32>,
    %485 = arith.index_cast %448 : i32 to index
    %c0_219 = arith.constant 0 : index
    %c0_220 = arith.constant 0 : index
    %486 = vector.load %arg6[%485, %c0_219, %c0_220] : memref<8x2x32xf32, #tpu.memory_space<vmem>>, vector<1x2x32xf32>
    %487 = vector.shape_cast %486 : vector<1x2x32xf32> to vector<2x32xf32>
    %488 = vector.shape_cast %482 : vector<2x32xf32> to vector<1x2x32xf32>
    tpu.vector_store %arg6[%485, %c0_219, %c0_220], %488 {strides = array<i32>} : memref<8x2x32xf32, #tpu.memory_space<vmem>>, vector<1x2x32xf32>,
    %c6_i32 = arith.constant 6 : i32
    %489 = arith.index_cast %c6_i32 : i32 to index
    %c0_221 = arith.constant 0 : index
    %c0_222 = arith.constant 0 : index
    %490 = vector.load %arg1[%489, %c0_221, %c0_222] : memref<8x2x128xf32, #tpu.memory_space<vmem>>, vector<1x2x128xf32>
    %491 = vector.shape_cast %490 : vector<1x2x128xf32> to vector<2x128xf32>
    %c0_223 = arith.constant 0 : index
    %c0_224 = arith.constant 0 : index
    %492 = vector.load %arg7[%c0_223, %c0_224] : memref<2x32xf32, #tpu.memory_space<vmem>>, vector<2x32xf32>
    %493 = arith.truncf %492 : vector<2x32xf32> to vector<2x32xbf16>
    %c0_225 = arith.constant 0 : index
    %c0_226 = arith.constant 0 : index
    %494 = vector.load %arg3[%c0_225, %c0_226] : memref<32x128xbf16, #tpu.memory_space<vmem>>, vector<32x128xbf16>
    %cst_227 = arith.constant dense<0.000000e+00> : vector<2x128xf32>
    %495 = tpu.matmul %493, %494, %cst_227 {dimension_numbers = #tpu.dot_dimension_numbers<[1], [0], [0], [1], [0, 0, 1, 1], [], []>} : vector<2x32xbf16>, vector<32x128xbf16>, vector<2x128xf32> -> vector<2x128xf32>
    %496 = arith.addf %491, %495 : vector<2x128xf32>
    %c0_228 = arith.constant 0 : index
    %c0_229 = arith.constant 0 : index
    %497 = vector.load %arg8[%c0_228, %c0_229] : memref<2x32xf32, #tpu.memory_space<vmem>>, vector<2x32xf32>
    %498 = vector.extract_strided_slice %496 {offsets = [0, 0], sizes = [2, 32], strides = [1, 1]} : vector<2x128xf32> to vector<2x32xf32>
    %499 = arith.negf %498 : vector<2x32xf32>
    %500 = math.exp %499 : vector<2x32xf32>
    %cst_230 = arith.constant 1.000000e+00 : f32
    %501 = vector.broadcast %cst_230 : f32 to vector<2x32xf32>
    %502 = arith.addf %501, %500 : vector<2x32xf32>
    %503 = arith.divf %501, %502 : vector<2x32xf32>
    %504 = vector.extract_strided_slice %496 {offsets = [0, 32], sizes = [2, 32], strides = [1, 1]} : vector<2x128xf32> to vector<2x32xf32>
    %505 = arith.negf %504 : vector<2x32xf32>
    %506 = math.exp %505 : vector<2x32xf32>
    %cst_231 = arith.constant 1.000000e+00 : f32
    %507 = vector.broadcast %cst_231 : f32 to vector<2x32xf32>
    %508 = arith.addf %507, %506 : vector<2x32xf32>
    %509 = arith.divf %507, %508 : vector<2x32xf32>
    %510 = vector.extract_strided_slice %496 {offsets = [0, 64], sizes = [2, 32], strides = [1, 1]} : vector<2x128xf32> to vector<2x32xf32>
    %511 = math.tanh %510 : vector<2x32xf32>
    %512 = vector.extract_strided_slice %496 {offsets = [0, 96], sizes = [2, 32], strides = [1, 1]} : vector<2x128xf32> to vector<2x32xf32>
    %513 = arith.negf %512 : vector<2x32xf32>
    %514 = math.exp %513 : vector<2x32xf32>
    %cst_232 = arith.constant 1.000000e+00 : f32
    %515 = vector.broadcast %cst_232 : f32 to vector<2x32xf32>
    %516 = arith.addf %515, %514 : vector<2x32xf32>
    %517 = arith.divf %515, %516 : vector<2x32xf32>
    %518 = arith.mulf %509, %497 : vector<2x32xf32>
    %519 = arith.mulf %503, %511 : vector<2x32xf32>
    %520 = arith.addf %518, %519 : vector<2x32xf32>
    %521 = math.tanh %520 : vector<2x32xf32>
    %522 = arith.mulf %517, %521 : vector<2x32xf32>
    %c0_233 = arith.constant 0 : index
    %c0_234 = arith.constant 0 : index
    %523 = vector.load %arg7[%c0_233, %c0_234] : memref<2x32xf32, #tpu.memory_space<vmem>>, vector<2x32xf32>
    tpu.vector_store %arg7[%c0_233, %c0_234], %522 {strides = array<i32>} : memref<2x32xf32, #tpu.memory_space<vmem>>, vector<2x32xf32>,
    %c0_235 = arith.constant 0 : index
    %c0_236 = arith.constant 0 : index
    %524 = vector.load %arg8[%c0_235, %c0_236] : memref<2x32xf32, #tpu.memory_space<vmem>>, vector<2x32xf32>
    tpu.vector_store %arg8[%c0_235, %c0_236], %520 {strides = array<i32>} : memref<2x32xf32, #tpu.memory_space<vmem>>, vector<2x32xf32>,
    %525 = arith.index_cast %c6_i32 : i32 to index
    %c0_237 = arith.constant 0 : index
    %c0_238 = arith.constant 0 : index
    %526 = vector.load %arg5[%525, %c0_237, %c0_238] : memref<8x2x32xf32, #tpu.memory_space<vmem>>, vector<1x2x32xf32>
    %527 = vector.shape_cast %526 : vector<1x2x32xf32> to vector<2x32xf32>
    %528 = vector.shape_cast %522 : vector<2x32xf32> to vector<1x2x32xf32>
    tpu.vector_store %arg5[%525, %c0_237, %c0_238], %528 {strides = array<i32>} : memref<8x2x32xf32, #tpu.memory_space<vmem>>, vector<1x2x32xf32>,
    %c7_i32_239 = arith.constant 7 : i32
    %529 = arith.subi %c7_i32_239, %c6_i32 : i32
    %530 = arith.index_cast %529 : i32 to index
    %c0_240 = arith.constant 0 : index
    %c0_241 = arith.constant 0 : index
    %531 = vector.load %arg2[%530, %c0_240, %c0_241] : memref<8x2x128xf32, #tpu.memory_space<vmem>>, vector<1x2x128xf32>
    %532 = vector.shape_cast %531 : vector<1x2x128xf32> to vector<2x128xf32>
    %c0_242 = arith.constant 0 : index
    %c0_243 = arith.constant 0 : index
    %533 = vector.load %arg9[%c0_242, %c0_243] : memref<2x32xf32, #tpu.memory_space<vmem>>, vector<2x32xf32>
    %534 = arith.truncf %533 : vector<2x32xf32> to vector<2x32xbf16>
    %c0_244 = arith.constant 0 : index
    %c0_245 = arith.constant 0 : index
    %535 = vector.load %arg4[%c0_244, %c0_245] : memref<32x128xbf16, #tpu.memory_space<vmem>>, vector<32x128xbf16>
    %cst_246 = arith.constant dense<0.000000e+00> : vector<2x128xf32>
    %536 = tpu.matmul %534, %535, %cst_246 {dimension_numbers = #tpu.dot_dimension_numbers<[1], [0], [0], [1], [0, 0, 1, 1], [], []>} : vector<2x32xbf16>, vector<32x128xbf16>, vector<2x128xf32> -> vector<2x128xf32>
    %537 = arith.addf %532, %536 : vector<2x128xf32>
    %c0_247 = arith.constant 0 : index
    %c0_248 = arith.constant 0 : index
    %538 = vector.load %arg10[%c0_247, %c0_248] : memref<2x32xf32, #tpu.memory_space<vmem>>, vector<2x32xf32>
    %539 = vector.extract_strided_slice %537 {offsets = [0, 0], sizes = [2, 32], strides = [1, 1]} : vector<2x128xf32> to vector<2x32xf32>
    %540 = arith.negf %539 : vector<2x32xf32>
    %541 = math.exp %540 : vector<2x32xf32>
    %cst_249 = arith.constant 1.000000e+00 : f32
    %542 = vector.broadcast %cst_249 : f32 to vector<2x32xf32>
    %543 = arith.addf %542, %541 : vector<2x32xf32>
    %544 = arith.divf %542, %543 : vector<2x32xf32>
    %545 = vector.extract_strided_slice %537 {offsets = [0, 32], sizes = [2, 32], strides = [1, 1]} : vector<2x128xf32> to vector<2x32xf32>
    %546 = arith.negf %545 : vector<2x32xf32>
    %547 = math.exp %546 : vector<2x32xf32>
    %cst_250 = arith.constant 1.000000e+00 : f32
    %548 = vector.broadcast %cst_250 : f32 to vector<2x32xf32>
    %549 = arith.addf %548, %547 : vector<2x32xf32>
    %550 = arith.divf %548, %549 : vector<2x32xf32>
    %551 = vector.extract_strided_slice %537 {offsets = [0, 64], sizes = [2, 32], strides = [1, 1]} : vector<2x128xf32> to vector<2x32xf32>
    %552 = math.tanh %551 : vector<2x32xf32>
    %553 = vector.extract_strided_slice %537 {offsets = [0, 96], sizes = [2, 32], strides = [1, 1]} : vector<2x128xf32> to vector<2x32xf32>
    %554 = arith.negf %553 : vector<2x32xf32>
    %555 = math.exp %554 : vector<2x32xf32>
    %cst_251 = arith.constant 1.000000e+00 : f32
    %556 = vector.broadcast %cst_251 : f32 to vector<2x32xf32>
    %557 = arith.addf %556, %555 : vector<2x32xf32>
    %558 = arith.divf %556, %557 : vector<2x32xf32>
    %559 = arith.mulf %550, %538 : vector<2x32xf32>
    %560 = arith.mulf %544, %552 : vector<2x32xf32>
    %561 = arith.addf %559, %560 : vector<2x32xf32>
    %562 = math.tanh %561 : vector<2x32xf32>
    %563 = arith.mulf %558, %562 : vector<2x32xf32>
    %c0_252 = arith.constant 0 : index
    %c0_253 = arith.constant 0 : index
    %564 = vector.load %arg9[%c0_252, %c0_253] : memref<2x32xf32, #tpu.memory_space<vmem>>, vector<2x32xf32>
    tpu.vector_store %arg9[%c0_252, %c0_253], %563 {strides = array<i32>} : memref<2x32xf32, #tpu.memory_space<vmem>>, vector<2x32xf32>,
    %c0_254 = arith.constant 0 : index
    %c0_255 = arith.constant 0 : index
    %565 = vector.load %arg10[%c0_254, %c0_255] : memref<2x32xf32, #tpu.memory_space<vmem>>, vector<2x32xf32>
    tpu.vector_store %arg10[%c0_254, %c0_255], %561 {strides = array<i32>} : memref<2x32xf32, #tpu.memory_space<vmem>>, vector<2x32xf32>,
    %566 = arith.index_cast %529 : i32 to index
    %c0_256 = arith.constant 0 : index
    %c0_257 = arith.constant 0 : index
    %567 = vector.load %arg6[%566, %c0_256, %c0_257] : memref<8x2x32xf32, #tpu.memory_space<vmem>>, vector<1x2x32xf32>
    %568 = vector.shape_cast %567 : vector<1x2x32xf32> to vector<2x32xf32>
    %569 = vector.shape_cast %563 : vector<2x32xf32> to vector<1x2x32xf32>
    tpu.vector_store %arg6[%566, %c0_256, %c0_257], %569 {strides = array<i32>} : memref<8x2x32xf32, #tpu.memory_space<vmem>>, vector<1x2x32xf32>,
    %c7_i32_258 = arith.constant 7 : i32
    %570 = arith.index_cast %c7_i32_258 : i32 to index
    %c0_259 = arith.constant 0 : index
    %c0_260 = arith.constant 0 : index
    %571 = vector.load %arg1[%570, %c0_259, %c0_260] : memref<8x2x128xf32, #tpu.memory_space<vmem>>, vector<1x2x128xf32>
    %572 = vector.shape_cast %571 : vector<1x2x128xf32> to vector<2x128xf32>
    %c0_261 = arith.constant 0 : index
    %c0_262 = arith.constant 0 : index
    %573 = vector.load %arg7[%c0_261, %c0_262] : memref<2x32xf32, #tpu.memory_space<vmem>>, vector<2x32xf32>
    %574 = arith.truncf %573 : vector<2x32xf32> to vector<2x32xbf16>
    %c0_263 = arith.constant 0 : index
    %c0_264 = arith.constant 0 : index
    %575 = vector.load %arg3[%c0_263, %c0_264] : memref<32x128xbf16, #tpu.memory_space<vmem>>, vector<32x128xbf16>
    %cst_265 = arith.constant dense<0.000000e+00> : vector<2x128xf32>
    %576 = tpu.matmul %574, %575, %cst_265 {dimension_numbers = #tpu.dot_dimension_numbers<[1], [0], [0], [1], [0, 0, 1, 1], [], []>} : vector<2x32xbf16>, vector<32x128xbf16>, vector<2x128xf32> -> vector<2x128xf32>
    %577 = arith.addf %572, %576 : vector<2x128xf32>
    %c0_266 = arith.constant 0 : index
    %c0_267 = arith.constant 0 : index
    %578 = vector.load %arg8[%c0_266, %c0_267] : memref<2x32xf32, #tpu.memory_space<vmem>>, vector<2x32xf32>
    %579 = vector.extract_strided_slice %577 {offsets = [0, 0], sizes = [2, 32], strides = [1, 1]} : vector<2x128xf32> to vector<2x32xf32>
    %580 = arith.negf %579 : vector<2x32xf32>
    %581 = math.exp %580 : vector<2x32xf32>
    %cst_268 = arith.constant 1.000000e+00 : f32
    %582 = vector.broadcast %cst_268 : f32 to vector<2x32xf32>
    %583 = arith.addf %582, %581 : vector<2x32xf32>
    %584 = arith.divf %582, %583 : vector<2x32xf32>
    %585 = vector.extract_strided_slice %577 {offsets = [0, 32], sizes = [2, 32], strides = [1, 1]} : vector<2x128xf32> to vector<2x32xf32>
    %586 = arith.negf %585 : vector<2x32xf32>
    %587 = math.exp %586 : vector<2x32xf32>
    %cst_269 = arith.constant 1.000000e+00 : f32
    %588 = vector.broadcast %cst_269 : f32 to vector<2x32xf32>
    %589 = arith.addf %588, %587 : vector<2x32xf32>
    %590 = arith.divf %588, %589 : vector<2x32xf32>
    %591 = vector.extract_strided_slice %577 {offsets = [0, 64], sizes = [2, 32], strides = [1, 1]} : vector<2x128xf32> to vector<2x32xf32>
    %592 = math.tanh %591 : vector<2x32xf32>
    %593 = vector.extract_strided_slice %577 {offsets = [0, 96], sizes = [2, 32], strides = [1, 1]} : vector<2x128xf32> to vector<2x32xf32>
    %594 = arith.negf %593 : vector<2x32xf32>
    %595 = math.exp %594 : vector<2x32xf32>
    %cst_270 = arith.constant 1.000000e+00 : f32
    %596 = vector.broadcast %cst_270 : f32 to vector<2x32xf32>
    %597 = arith.addf %596, %595 : vector<2x32xf32>
    %598 = arith.divf %596, %597 : vector<2x32xf32>
    %599 = arith.mulf %590, %578 : vector<2x32xf32>
    %600 = arith.mulf %584, %592 : vector<2x32xf32>
    %601 = arith.addf %599, %600 : vector<2x32xf32>
    %602 = math.tanh %601 : vector<2x32xf32>
    %603 = arith.mulf %598, %602 : vector<2x32xf32>
    %c0_271 = arith.constant 0 : index
    %c0_272 = arith.constant 0 : index
    %604 = vector.load %arg7[%c0_271, %c0_272] : memref<2x32xf32, #tpu.memory_space<vmem>>, vector<2x32xf32>
    tpu.vector_store %arg7[%c0_271, %c0_272], %603 {strides = array<i32>} : memref<2x32xf32, #tpu.memory_space<vmem>>, vector<2x32xf32>,
    %c0_273 = arith.constant 0 : index
    %c0_274 = arith.constant 0 : index
    %605 = vector.load %arg8[%c0_273, %c0_274] : memref<2x32xf32, #tpu.memory_space<vmem>>, vector<2x32xf32>
    tpu.vector_store %arg8[%c0_273, %c0_274], %601 {strides = array<i32>} : memref<2x32xf32, #tpu.memory_space<vmem>>, vector<2x32xf32>,
    %606 = arith.index_cast %c7_i32_258 : i32 to index
    %c0_275 = arith.constant 0 : index
    %c0_276 = arith.constant 0 : index
    %607 = vector.load %arg5[%606, %c0_275, %c0_276] : memref<8x2x32xf32, #tpu.memory_space<vmem>>, vector<1x2x32xf32>
    %608 = vector.shape_cast %607 : vector<1x2x32xf32> to vector<2x32xf32>
    %609 = vector.shape_cast %603 : vector<2x32xf32> to vector<1x2x32xf32>
    tpu.vector_store %arg5[%606, %c0_275, %c0_276], %609 {strides = array<i32>} : memref<8x2x32xf32, #tpu.memory_space<vmem>>, vector<1x2x32xf32>,
    %c7_i32_277 = arith.constant 7 : i32
    %610 = arith.subi %c7_i32_277, %c7_i32_258 : i32
    %611 = arith.index_cast %610 : i32 to index
    %c0_278 = arith.constant 0 : index
    %c0_279 = arith.constant 0 : index
    %612 = vector.load %arg2[%611, %c0_278, %c0_279] : memref<8x2x128xf32, #tpu.memory_space<vmem>>, vector<1x2x128xf32>
    %613 = vector.shape_cast %612 : vector<1x2x128xf32> to vector<2x128xf32>
    %c0_280 = arith.constant 0 : index
    %c0_281 = arith.constant 0 : index
    %614 = vector.load %arg9[%c0_280, %c0_281] : memref<2x32xf32, #tpu.memory_space<vmem>>, vector<2x32xf32>
    %615 = arith.truncf %614 : vector<2x32xf32> to vector<2x32xbf16>
    %c0_282 = arith.constant 0 : index
    %c0_283 = arith.constant 0 : index
    %616 = vector.load %arg4[%c0_282, %c0_283] : memref<32x128xbf16, #tpu.memory_space<vmem>>, vector<32x128xbf16>
    %cst_284 = arith.constant dense<0.000000e+00> : vector<2x128xf32>
    %617 = tpu.matmul %615, %616, %cst_284 {dimension_numbers = #tpu.dot_dimension_numbers<[1], [0], [0], [1], [0, 0, 1, 1], [], []>} : vector<2x32xbf16>, vector<32x128xbf16>, vector<2x128xf32> -> vector<2x128xf32>
    %618 = arith.addf %613, %617 : vector<2x128xf32>
    %c0_285 = arith.constant 0 : index
    %c0_286 = arith.constant 0 : index
    %619 = vector.load %arg10[%c0_285, %c0_286] : memref<2x32xf32, #tpu.memory_space<vmem>>, vector<2x32xf32>
    %620 = vector.extract_strided_slice %618 {offsets = [0, 0], sizes = [2, 32], strides = [1, 1]} : vector<2x128xf32> to vector<2x32xf32>
    %621 = arith.negf %620 : vector<2x32xf32>
    %622 = math.exp %621 : vector<2x32xf32>
    %cst_287 = arith.constant 1.000000e+00 : f32
    %623 = vector.broadcast %cst_287 : f32 to vector<2x32xf32>
    %624 = arith.addf %623, %622 : vector<2x32xf32>
    %625 = arith.divf %623, %624 : vector<2x32xf32>
    %626 = vector.extract_strided_slice %618 {offsets = [0, 32], sizes = [2, 32], strides = [1, 1]} : vector<2x128xf32> to vector<2x32xf32>
    %627 = arith.negf %626 : vector<2x32xf32>
    %628 = math.exp %627 : vector<2x32xf32>
    %cst_288 = arith.constant 1.000000e+00 : f32
    %629 = vector.broadcast %cst_288 : f32 to vector<2x32xf32>
    %630 = arith.addf %629, %628 : vector<2x32xf32>
    %631 = arith.divf %629, %630 : vector<2x32xf32>
    %632 = vector.extract_strided_slice %618 {offsets = [0, 64], sizes = [2, 32], strides = [1, 1]} : vector<2x128xf32> to vector<2x32xf32>
    %633 = math.tanh %632 : vector<2x32xf32>
    %634 = vector.extract_strided_slice %618 {offsets = [0, 96], sizes = [2, 32], strides = [1, 1]} : vector<2x128xf32> to vector<2x32xf32>
    %635 = arith.negf %634 : vector<2x32xf32>
    %636 = math.exp %635 : vector<2x32xf32>
    %cst_289 = arith.constant 1.000000e+00 : f32
    %637 = vector.broadcast %cst_289 : f32 to vector<2x32xf32>
    %638 = arith.addf %637, %636 : vector<2x32xf32>
    %639 = arith.divf %637, %638 : vector<2x32xf32>
    %640 = arith.mulf %631, %619 : vector<2x32xf32>
    %641 = arith.mulf %625, %633 : vector<2x32xf32>
    %642 = arith.addf %640, %641 : vector<2x32xf32>
    %643 = math.tanh %642 : vector<2x32xf32>
    %644 = arith.mulf %639, %643 : vector<2x32xf32>
    %c0_290 = arith.constant 0 : index
    %c0_291 = arith.constant 0 : index
    %645 = vector.load %arg9[%c0_290, %c0_291] : memref<2x32xf32, #tpu.memory_space<vmem>>, vector<2x32xf32>
    tpu.vector_store %arg9[%c0_290, %c0_291], %644 {strides = array<i32>} : memref<2x32xf32, #tpu.memory_space<vmem>>, vector<2x32xf32>,
    %c0_292 = arith.constant 0 : index
    %c0_293 = arith.constant 0 : index
    %646 = vector.load %arg10[%c0_292, %c0_293] : memref<2x32xf32, #tpu.memory_space<vmem>>, vector<2x32xf32>
    tpu.vector_store %arg10[%c0_292, %c0_293], %642 {strides = array<i32>} : memref<2x32xf32, #tpu.memory_space<vmem>>, vector<2x32xf32>,
    %647 = arith.index_cast %610 : i32 to index
    %c0_294 = arith.constant 0 : index
    %c0_295 = arith.constant 0 : index
    %648 = vector.load %arg6[%647, %c0_294, %c0_295] : memref<8x2x32xf32, #tpu.memory_space<vmem>>, vector<1x2x32xf32>
    %649 = vector.shape_cast %648 : vector<1x2x32xf32> to vector<2x32xf32>
    %650 = vector.shape_cast %644 : vector<2x32xf32> to vector<1x2x32xf32>
    tpu.vector_store %arg6[%647, %c0_294, %c0_295], %650 {strides = array<i32>} : memref<8x2x32xf32, #tpu.memory_space<vmem>>, vector<1x2x32xf32>,
    %c8_i32 = arith.constant 8 : i32
    return
  }
  func.func @transform_0(%arg0: i32) -> (i32, i32, i32) {
    %c0_i32 = arith.constant 0 : i32
    %c0_i32_0 = arith.constant 0 : i32
    %c0_i32_1 = arith.constant 0 : i32
    return %arg0, %c0_i32, %c0_i32_0 : i32, i32, i32
  }
  func.func @transform_1(%arg0: i32) -> (i32, i32, i32) {
    %c0_i32 = arith.constant 0 : i32
    %0 = arith.subi %c0_i32, %arg0 : i32
    %c0_i32_0 = arith.constant 0 : i32
    %c0_i32_1 = arith.constant 0 : i32
    %c0_i32_2 = arith.constant 0 : i32
    return %0, %c0_i32_0, %c0_i32_1 : i32, i32, i32
  }
  func.func @transform_2(%arg0: i32) -> (i32, i32) {
    %c0_i32 = arith.constant 0 : i32
    %c0_i32_0 = arith.constant 0 : i32
    %c0_i32_1 = arith.constant 0 : i32
    return %c0_i32, %c0_i32_0 : i32, i32
  }
  func.func @transform_3(%arg0: i32) -> (i32, i32) {
    %c0_i32 = arith.constant 0 : i32
    %c0_i32_0 = arith.constant 0 : i32
    %c0_i32_1 = arith.constant 0 : i32
    return %c0_i32, %c0_i32_0 : i32, i32
  }
  func.func @transform_4(%arg0: i32) -> (i32, i32, i32) {
    %c0_i32 = arith.constant 0 : i32
    %c0_i32_0 = arith.constant 0 : i32
    %c0_i32_1 = arith.constant 0 : i32
    return %arg0, %c0_i32, %c0_i32_0 : i32, i32, i32
  }
  func.func @transform_5(%arg0: i32) -> (i32, i32, i32) {
    %c0_i32 = arith.constant 0 : i32
    %0 = arith.subi %c0_i32, %arg0 : i32
    %c0_i32_0 = arith.constant 0 : i32
    %c0_i32_1 = arith.constant 0 : i32
    %c0_i32_2 = arith.constant 0 : i32
    return %0, %c0_i32_0, %c0_i32_1 : i32, i32, i32
  }
}

</mosaic_0001>

<bundles_post_ra>
// kernel: lstm_model_forward.7
= control target key start
LH: loop header
LB: loop body
LE: loop exit
PB: predicated region body
PF: predicated region fallthrough
CT: control target
= control target key end

     0   :  { %v221_v1 = vmov 0   ;;  %vm57_vm0 = vcmask 261120   ;;  %v172_v15 = vlaneseq  ;;  %s308_s3 = inlined_call_operand.vmem [shape: bf16[32,256], index: 3, kind: input, shape index: {}]   ;;  %s309_s2 = inlined_call_operand.vmem [shape: bf16[32,256], index: 2, kind: input, shape index: {}]   ;;  %s310_s1 = inlined_call_operand.vmem [shape: f32[16,32], index: 1, kind: input, shape index: {}]   ;;  %s311_s0 = inlined_call_operand.vmem [shape: f32[16,32], index: 0, kind: input, shape index: {}]   ;;  %s312_s4 = inlined_call_operand.vmem [shape: f32[1,256], index: 4, kind: input, shape index: {}]   ;;  %s313_s5 = inlined_call_operand.vmem [shape: f32[16,128], index: 5, kind: output, shape index: {0}]   ;;  %s314_s6 = inlined_call_operand.vmem [shape: f32[16,128], index: 6, kind: output, shape index: {1}]  }
   0x1   :  { %v209_v0 = vld [vmem:[%s308_s3 + $0x14] ss:$8 sps:$4 sm:$0xff]   ;;  %93 = vmatprep.mubr.bf16.mxu0 %v221_v1  ;;  %159 = vmatprep.mubr.bf16.mxu1 %v221_v1  ;;  %v213_v3 = vld [vmem:[%s308_s3 + $0x10] ss:$8 sps:$4 sm:$0xff]   ;;  %v215_v5 = vld [vmem:[%s308_s3 + $0x4] ss:$8 sps:$4 sm:$0xff]  }
   0x2   :  { %v211_v2 = vld [vmem:[%s309_s2 + $0x14] ss:$8 sps:$4 sm:$0xff]   ;;  %73 = vmatprep.subr.bf16.mxu0 %v209_v0  ;;  %v214_v4 = vld [vmem:[%s309_s2 + $0x10] ss:$8 sps:$4 sm:$0xff]   ;;  %v217_v6 = vld [vmem:[%s309_s2 + $0x4] ss:$8 sps:$4 sm:$0xff]  }
   0x3   :  { %139 = vmatprep.subr.bf16.mxu1 %v211_v2  ;;  %74 = vmatpush1.bf16.msra.mxu0 %v213_v3  ;;  %v219_v7 = vld [vmem:[%s308_s3] ss:$8 sps:$4 sm:$0xff]   ;;  %v173_v16 = vshrl.u32 %v172_v15, 7 }
   0x4   :  { %140 = vmatpush1.bf16.msra.mxu1 %v214_v4  ;;  %75 = vmatprep.subr.bf16.mxu0 %v215_v5  ;;  %v220_v8 = vld [vmem:[%s309_s2] ss:$8 sps:$4 sm:$0xff]  }
   0x5   :  { %v30_v9 = vld [vmem:[%s310_s1] sm:$0xff]  ;;  %v31_v10 = vld [vmem:[%s310_s1 + $0x8] sm:$0xff]  ;;  %141 = vmatprep.subr.bf16.mxu1 %v217_v6  ;;  %v174_v17 = vsub.s32 0, %v173_v16  ;;  %v178_v19 = vsub.s32 1, %v173_v16 }
   0x6   :  { %v23_v11 = vld [vmem:[%s311_s0] sm:$0xff]  ;;  %v24_v12 = vld [vmem:[%s311_s0 + $0x8] sm:$0xff]  ;;  %v32_v13 = vpack.c.bf16 %v31_v10, %v30_v9 }
   0x7   :  { %v25_v14 = vpack.c.bf16 %v24_v12, %v23_v11  ;;  %76 = vmatpush1.bf16.msra.mxu0 %v219_v7  ;;  %v170_v18 = vld [vmem:[%s312_s4] sm:$0x3] }
   0x8   :  { %142 = vmatpush1.bf16.msra.mxu1 %v220_v8  ;;  %v175_v20 = vrot.slane %v170_v18, %v174_v17  ;;  %v179_v24 = vrot.slane %v170_v18, %v178_v19 }
   0xa   :  { %202 = vmatmul.mubr.msk.bf16.vlgmr.msra.gmra.mxu0 %vm57_vm0, %v32_v13 }
   0xb   :  { %207 = vmatmul.mubr.msk.bf16.vlgmr.msra.gmra.mxu1 %vm57_vm0, %v25_v14 }
  0xca   :  { %v95_v21 = vpop.f32.mrf.mxu0 }
  0xcb   :  { %v161_v22 = vpop.f32.mrf.mxu1 }
  0xcc   :  { %v162_v23 = vadd.f32 %v161_v22, %v95_v21  ;;  %v97_v25 = vpop.f32.mrf.mxu0 }
  0xcd   :  { %v163_v26 = vpop.f32.mrf.mxu1 }
  0xce   :  { %v182_v27 = vadd.f32 %v175_v20, %v162_v23  ;;  %v164_v28 = vadd.f32 %v163_v26, %v97_v25  ;;  %v99_v29 = vpop.f32.mrf.mxu0 }
  0xcf   :  { %v165_v30 = vpop.f32.mrf.mxu1 }
  0xd0   :  { %186 = vst [vmem:[%s313_s5] sm:$0xff] %v182_v27  ;;  %v183_v31 = vadd.f32 %v179_v24, %v164_v28  ;;  %v166_v32 = vadd.f32 %v165_v30, %v99_v29  ;;  %v101_v33 = vpop.f32.mrf.mxu0 }
  0xd1   :  { %v167_v34 = vpop.f32.mrf.mxu1 }
  0xd2   :  { %188 = vst [vmem:[%s314_s6] sm:$0xff] %v183_v31  ;;  %v184_v35 = vadd.f32 %v175_v20, %v166_v32  ;;  %v168_v36 = vadd.f32 %v167_v34, %v101_v33 }
  0xd4   :  { %187 = vst [vmem:[%s313_s5 + $0x8] sm:$0xff] %v184_v35  ;;  %v185_v37 = vadd.f32 %v179_v24, %v168_v36 }
  0xd6   :  { %189 = vst [vmem:[%s314_s6 + $0x8] sm:$0xff] %v185_v37 }

// kernel: lstm_model_forward.5
= control target key start
LH: loop header
LB: loop body
LE: loop exit
PB: predicated region body
PF: predicated region fallthrough
CT: control target
= control target key end

     0   :  { %v161_v1 = vmov 0   ;;  %vm80_vm0 = vcmask 523264   ;;  %v30_v12 = vlaneseq  ;;  %s232_s1 = inlined_call_operand.vmem [shape: bf16[64,256], index: 1, kind: input, shape index: {}]   ;;  %s233_s0 = inlined_call_operand.vmem [shape: f32[16,64], index: 0, kind: input, shape index: {}]   ;;  %s234_s2 = inlined_call_operand.vmem [shape: f32[1,256], index: 2, kind: input, shape index: {}]   ;;  %s235_s3 = inlined_call_operand.vmem [shape: f32[16,128], index: 3, kind: output, shape index: {0}]   ;;  %s236_s4 = inlined_call_operand.vmem [shape: f32[16,128], index: 4, kind: output, shape index: {1}]  }
   0x1   :  { %v149_v0 = vld [vmem:[%s232_s1 + $0x34] ss:$8 sps:$4 sm:$0xff]   ;;  %116 = vmatprep.mubr.bf16.mxu0 %v161_v1  ;;  %v151_v2 = vld [vmem:[%s232_s1 + $0x30] ss:$8 sps:$4 sm:$0xff]   ;;  %v152_v3 = vld [vmem:[%s232_s1 + $0x24] ss:$8 sps:$4 sm:$0xff]  }
   0x2   :  { %92 = vmatprep.subr.bf16.mxu0 %v149_v0  ;;  %v154_v4 = vld [vmem:[%s232_s1 + $0x20] ss:$8 sps:$4 sm:$0xff]   ;;  %v155_v5 = vld [vmem:[%s232_s1 + $0x14] ss:$8 sps:$4 sm:$0xff]   ;;  %v157_v6 = vld [vmem:[%s232_s1 + $0x10] ss:$8 sps:$4 sm:$0xff]  }
   0x3   :  { %93 = vmatpush1.bf16.msra.mxu0 %v151_v2  ;;  %v158_v7 = vld [vmem:[%s232_s1 + $0x4] ss:$8 sps:$4 sm:$0xff]   ;;  %v160_v8 = vld [vmem:[%s232_s1] ss:$8 sps:$4 sm:$0xff]   ;;  %v31_v13 = vshrl.u32 %v30_v12, 7 }
   0x4   :  { %94 = vmatprep.subr.bf16.mxu0 %v152_v3  ;;  %v17_v9 = vld [vmem:[%s233_s0] sm:$0xff]  ;;  %v18_v10 = vld [vmem:[%s233_s0 + $0x8] sm:$0xff] }
   0x5   :  { %v19_v11 = vpack.c.bf16 %v18_v10, %v17_v9  ;;  %v32_v14 = vsub.s32 0, %v31_v13  ;;  %v28_v15 = vld [vmem:[%s234_s2] sm:$0x3]  ;;  %v36_v16 = vsub.s32 1, %v31_v13 }
   0x7   :  { %95 = vmatpush1.bf16.msra.mxu0 %v154_v4  ;;  %v33_v17 = vrot.slane %v28_v15, %v32_v14  ;;  %v37_v18 = vrot.slane %v28_v15, %v36_v16 }
   0x8   :  { %96 = vmatprep.subr.bf16.mxu0 %v155_v5 }
   0xb   :  { %97 = vmatpush1.bf16.msra.mxu0 %v157_v6 }
   0xc   :  { %98 = vmatprep.subr.bf16.mxu0 %v158_v7 }
   0xf   :  { %99 = vmatpush1.bf16.msra.mxu0 %v160_v8 }
  0x12   :  { %147 = vmatmul.mubr.msk.bf16.vlgmr.msra.gmra.mxu0 %vm80_vm0, %v19_v11 }
  0xd2   :  { %v118_v19 = vpop.f32.mrf.mxu0 }
  0xd3   :  { %v119_v20 = vadd.f32 %v118_v19, %v33_v17 }
  0xd4   :  { %v120_v21 = vpop.f32.mrf.mxu0 }
  0xd5   :  { %127 = vst [vmem:[%s235_s3] sm:$0xff] %v119_v20  ;;  %v121_v22 = vadd.f32 %v120_v21, %v37_v18 }
  0xd6   :  { %v122_v23 = vpop.f32.mrf.mxu0 }
  0xd7   :  { %129 = vst [vmem:[%s236_s4] sm:$0xff] %v121_v22  ;;  %v123_v24 = vadd.f32 %v122_v23, %v33_v17 }
  0xd8   :  { %v124_v25 = vpop.f32.mrf.mxu0 }
  0xd9   :  { %128 = vst [vmem:[%s235_s3 + $0x8] sm:$0xff] %v123_v24  ;;  %v125_v26 = vadd.f32 %v124_v25, %v37_v18 }
  0xdb   :  { %130 = vst [vmem:[%s236_s4 + $0x8] sm:$0xff] %v125_v26 }

// kernel: lstm_model_forward.9
= control target key start
LH: loop header
LB: loop body
LE: loop exit
PB: predicated region body
PF: predicated region fallthrough
CT: control target
= control target key end

     0   :  { %vm25_vm0 = vcmask 254976   ;;  %v327_v2 = vmov 0.0   ;;  %vm328_vm1 = vmmov 0   ;;  %s458_s0 = inlined_call_operand.vmem [shape: f32[8,2,32], index: 0, kind: input, shape index: {}]   ;;  %s459_s1 = inlined_call_operand.vmem [shape: f32[8,2,32], index: 1, kind: input, shape index: {}]   ;;  %s460_s2 = inlined_call_operand.vmem [shape: f32[32,2], index: 2, kind: input, shape index: {}]   ;;  %s461_s3 = inlined_call_operand.vmem [shape: f32[32,2], index: 3, kind: input, shape index: {}]   ;;  %s462_s4 = inlined_call_operand.vmem [shape: f32[1,2], index: 4, kind: input, shape index: {}]   ;;  %s463_s5 = inlined_call_operand.hbm [shape: f32[2,2], index: 5, kind: output, shape index: {}]  }
   0x1   :  { %v95_v0 = vld [vmem:[%s461_s3 + $0x18] sm:$0xff]  ;;  %280 = vmatprep.subr.mxu0 %v327_v2  ;;  %291 = vmatprep.subr.mxu1 %v327_v2  ;;  %v94_v3 = vld [vmem:[%s461_s3 + $0x10] sm:$0xff]  ;;  %27 = vst.msk [vmem:[#allocation3] sm:$0x3] %vm25_vm0, %v327_v2  ;;  %26 = vst.msk [vmem:[#allocation2] sm:$0x3] %vm25_vm0, %v327_v2 }
   0x2   :  { %v91_v1 = vld [vmem:[%s460_s2 + $0x18] sm:$0xff]  ;;  %v90_v4 = vld [vmem:[%s460_s2 + $0x10] sm:$0xff]  ;;  %281 = vmatpush3.msra.mxu0 %v95_v0  ;;  %v93_v5 = vld [vmem:[%s461_s3 + $0x8] sm:$0xff]  ;;  %288 = vmatprep.mubr.msk.f32.mxu0 %vm328_vm1, %v327_v2 }
   0x3   :  { %292 = vmatpush3.msra.mxu1 %v91_v1  ;;  %v56_v6 = vld [vmem:[%s459_s1] sm:$0x3]  ;;  %282 = vmatprep.subr.mxu0 %v327_v2  ;;  %v89_v7 = vld [vmem:[%s460_s2 + $0x8] sm:$0xff]  ;;  %v57_v8 = vld [vmem:[%s459_s1 + $0x2] sm:$0x3] }
   0x4   :  { %293 = vmatprep.subr.mxu1 %v327_v2  ;;  %v58_v9 = vld [vmem:[%s459_s1 + $0x4] sm:$0x3]  ;;  %283 = vmatpush3.msra.mxu0 %v94_v3  ;;  %v59_v10 = vld [vmem:[%s459_s1 + $0x6] sm:$0x3]  ;;  %v64_v12 = vsel %vm25_vm0, %v56_v6, 0.0  ;;  %v65_v13 = vsel %vm25_vm0, %v57_v8, 0.0 }
   0x5   :  { %294 = vmatpush3.msra.mxu1 %v90_v4  ;;  %284 = vmatprep.subr.mxu0 %v327_v2  ;;  %v92_v11 = vld [vmem:[%s461_s3] sm:$0xff]  ;;  %v67_v14 = vsel %vm25_vm0, %v58_v9, 0.0  ;;  %v60_v16 = vld [vmem:[%s459_s1 + $0x8] sm:$0x3]  ;;  %v66_v17 = vadd.f32 %v65_v13, %v64_v12  ;;  %v69_v19 = vsel %vm25_vm0, %v59_v10, 0.0 }
   0x6   :  { %295 = vmatprep.subr.mxu1 %v327_v2  ;;  %285 = vmatpush3.msra.mxu0 %v93_v5  ;;  %v88_v15 = vld [vmem:[%s460_s2] sm:$0xff]  ;;  %v61_v22 = vld [vmem:[%s459_s1 + $0xa] sm:$0x3]  ;;  %v71_v25 = vsel %vm25_vm0, %v60_v16, 0.0  ;;  %v62_v27 = vld [vmem:[%s459_s1 + $0xc] sm:$0x3] }
   0x7   :  { %296 = vmatpush3.msra.mxu1 %v89_v7  ;;  %v29_v18 = vld [vmem:[%s458_s0] sm:$0x3]  ;;  %286 = vmatprep.subr.mxu0 %v327_v2  ;;  %v30_v20 = vld [vmem:[%s458_s0 + $0x2] sm:$0x3]  ;;  %v31_v21 = vld [vmem:[%s458_s0 + $0x4] sm:$0x3]  ;;  %v68_v23 = vadd.f32 %v67_v14, %v66_v17 }
   0x8   :  { %297 = vmatprep.subr.mxu1 %v327_v2  ;;  %287 = vmatpush3.msra.mxu0 %v92_v11  ;;  %v38_v24 = vsel %vm25_vm0, %v29_v18, 0.0  ;;  %v32_v26 = vld [vmem:[%s458_s0 + $0x6] sm:$0x3]  ;;  %v39_v29 = vsel %vm25_vm0, %v30_v20, 0.0  ;;  %v41_v30 = vsel %vm25_vm0, %v31_v21, 0.0  ;;  %v73_v31 = vsel %vm25_vm0, %v61_v22, 0.0 }
   0x9   :  { %298 = vmatpush3.msra.mxu1 %v88_v15  ;;  %299 = vmatprep.mubr.msk.f32.mxu1 %vm328_vm1, %v327_v2  ;;  %v70_v28 = vadd.f32 %v69_v19, %v68_v23  ;;  %v33_v32 = vld [vmem:[%s458_s0 + $0x8] sm:$0x3]  ;;  %v40_v33 = vadd.f32 %v39_v29, %v38_v24 }
   0xa   :  { %10 = vsyncpa [#allocation5], 0  ;;  %v63_v34 = vld [vmem:[%s459_s1 + $0xe] sm:$0x3]  ;;  %v43_v36 = vsel %vm25_vm0, %v32_v26, 0.0  ;;  %v75_v37 = vsel %vm25_vm0, %v62_v27, 0.0 }
   0xb   :  { %v72_v35 = vadd.f32 %v71_v25, %v70_v28  ;;  %v34_v38 = vld [vmem:[%s458_s0 + $0xa] sm:$0x3]  ;;  %v42_v39 = vadd.f32 %v41_v30, %v40_v33  ;;  %v45_v41 = vsel %vm25_vm0, %v33_v32, 0.0  ;;  %v77_v42 = vsel %vm25_vm0, %v63_v34, 0.0  ;;  %v35_v43 = vld [vmem:[%s458_s0 + $0xc] sm:$0x3] }
   0xc   :  { %v47_v46 = vsel %vm25_vm0, %v34_v38, 0.0  ;;  %v55_v47 = vld [vmem:[#allocation3] sm:$0x3]  ;;  %v36_v48 = vld [vmem:[%s458_s0 + $0xe] sm:$0x3]  ;;  %v49_v51 = vsel %vm25_vm0, %v35_v43, 0.0 }
   0xd   :  { %v74_v40 = vadd.f32 %v73_v31, %v72_v35  ;;  %v44_v44 = vadd.f32 %v43_v36, %v42_v39  ;;  %v51_v54 = vsel %vm25_vm0, %v36_v48, 0.0  ;;  %v28_v56 = vld [vmem:[#allocation2] sm:$0x3]  ;;  %vm96_vm2 = vcmask 261120   ;;  %s329_s14 = smov [#allocation4]  }
   0xe   :  { %v269_v2 = vld [vmem:[%s462_s4] ss:$0 sm:$0xff]  ;;  %s259_s15 = sshll.u32 %s329_s14, 4  ;;  %vm251_vm3 = vcmask 9216   ;;  %s260_s15 = int_to_ptr.vmem [resolvable:$true] %s259_s15 }
   0xf   :  { %v76_v45 = vadd.f32 %v75_v37, %v74_v40  ;;  %v46_v49 = vadd.f32 %v45_v41, %v44_v44  ;;  %s305_s16 = scalar_lea.vmem %s260_s15, 32  ;;  %p310_p1 = scmp.lt.s32.totalorder %s260_s15, %s260_s15 }
  0x10   :  { %p306_p0 = scmp.ne.s32.totalorder %s260_s15, %s305_s16  ;;  %p311_p2 = scmp.lt.s32.totalorder %s305_s16, %s305_s16 }
  0x11   :  { %v78_v50 = vadd.f32 %v77_v42, %v76_v45  ;;  %v48_v52 = vadd.f32 %v47_v46, %v46_v49 }
  0x12   :  { %p312_p3 = por %p311_p2, %p310_p1 }
  0x13   :  { %v79_v53 = vadd.f32 %v78_v50, %v55_v47  ;;  %v50_v55 = vadd.f32 %v49_v51, %v48_v52 }
  0x14   :  { %p313_p4 = pnand %p312_p3, %p306_p0 }
  0x15   :  { %80 = vst.msk [vmem:[#allocation3] sm:$0x3] %vm25_vm0, %v79_v53  ;;  %v52_v57 = vadd.f32 %v51_v54, %v50_v55 }
  0x17   :  { %v53_v58 = vadd.f32 %v52_v57, %v28_v56 }
  0x19   :  { %54 = vst.msk [vmem:[#allocation2] sm:$0x3] %vm25_vm0, %v53_v58 }
  0x1c   :  { %v86_v59 = vld [vmem:[#allocation3] sm:$0x3] }
  0x1d   :  { %v87_v60 = vmul.f32 0.125, %v86_v59 }
  0x1f   :  { %289 = vmatmul.mubr.msk.f32.vlgmr.msra.gmra.mxu0 %vm96_vm2, %v87_v60 }
  0x20   :  { %v84_v61 = vld [vmem:[#allocation2] sm:$0x3] }
  0x21   :  { %v85_v62 = vmul.f32 0.125, %v84_v61 }
  0x23   :  { %300 = vmatmul.mubr.msk.f32.vlgmr.msra.gmra.mxu1 %vm96_vm2, %v85_v62 }
  0xdf   :  { %v166_v63 = vpop.f32.mrf.mxu0 }
  0xe1   :  { %v290_v0 = vpop.f32.mrf.mxu0 }
  0xe3   :  { %v239_v1 = vpop.f32.mrf.mxu1 }
  0xe4   :  { %v240_v3 = vadd.f32 %v239_v1, %v166_v63 }
  0xe5   :  { %v301_v4 = vpop.f32.mrf.mxu1 }
  0xe6   :  { %v250_v5 = vadd.f32 %v269_v2, %v240_v3 }
  0xe8   :  { %252 = vst.msk [vmem:[#allocation4] sm:$0x3] %vm251_vm3, %v250_v5 }
  0xe9   :  { %316 = shalt.err (!%p313_p4)
}
  0xea   :  { %262 = dma.vmem_to_hbm [thread:$0]  %s260_s15, 32, %s463_s5, [#allocation5]  }
  0xeb   :  { %325 = dma.done.wait [#allocation5], 32  }
  0xec   :  { %326 = vsyncadd [#allocation5], 4294967264 }
  0xed   :  { %266 = vsyncpa [#allocation5], 1 }

// kernel: lstm_model_forward.6
= control target key start
LH: loop header
LB: loop body
LE: loop exit
PB: predicated region body
PF: predicated region fallthrough
CT: control target
= control target key end

     0   :  { %vm60_vm0 = vcmask 254976   ;;  %v2212_v0 = vmov 0.0   ;;  %vm2213_vm1 = vmmov 0   ;;  %vm84_vm2 = vcmask 261120   ;;  %s2214_s26 = smov 32   ;;  %s2215_s6 = smov 64   ;;  %s2671_s2 = inlined_call_operand.vmem [shape: bf16[32,128], index: 2, kind: input, shape index: {}]   ;;  %s2672_s3 = inlined_call_operand.vmem [shape: bf16[32,128], index: 3, kind: input, shape index: {}]   ;;  %s2673_s0 = inlined_call_operand.vmem [shape: f32[8,2,128], index: 0, kind: input, shape index: {}]   ;;  %s2674_s1 = inlined_call_operand.vmem [shape: f32[8,2,128], index: 1, kind: input, shape index: {}]   ;;  %s2675_s4 = inlined_call_operand.vmem [shape: f32[8,2,32], index: 4, kind: output, shape index: {0}]   ;;  %s2676_s5 = inlined_call_operand.vmem [shape: f32[8,2,32], index: 5, kind: output, shape index: {1}]  }
   0x1   :  { %1919 = vmatprep.subr.bf16.mxu0 %v2212_v0  ;;  %1927 = vmatprep.subr.bf16.mxu1 %v2212_v0  ;;  %v2052_v1 = vld [vmem:[%s2671_s2 + $0x8] sm:$0xff]   ;;  %61 = vst.msk [vmem:[#allocation2] sm:$0x3] %vm60_vm0, %v2212_v0  ;;  %62 = vst.msk [vmem:[#allocation3] sm:$0x3] %vm60_vm0, %v2212_v0  ;;  %v2054_v3 = vld [vmem:[%s2671_s2] sm:$0xff]  }
   0x2   :  { %63 = vst.msk [vmem:[#allocation4] sm:$0x3] %vm60_vm0, %v2212_v0  ;;  %64 = vst.msk [vmem:[#allocation5] sm:$0x3] %vm60_vm0, %v2212_v0  ;;  %v2053_v2 = vld [vmem:[%s2672_s3 + $0x8] sm:$0xff]   ;;  %1923 = vmatprep.mubr.msk.bf16.mxu0 %vm2213_vm1, %v2212_v0  ;;  %1931 = vmatprep.mubr.msk.bf16.mxu1 %vm2213_vm1, %v2212_v0  ;;  %v2055_v4 = vld [vmem:[%s2672_s3] sm:$0xff]  }
   0x3   :  { %1920 = vmatpush3.bf16.msra.mxu0 %v2052_v1  ;;  %1928 = vmatpush3.bf16.msra.mxu1 %v2053_v2  ;;  %v65_v11 = vld [vmem:[%s2673_s0] sm:$0x3]  ;;  %v1783_v12 = vld [vmem:[%s2674_s1 + $0xe] sm:$0x3]  ;;  %s2216_s15 = smov 96  }
   0x4   :  { %1921 = vmatprep.subr.bf16.mxu0 %v2212_v0  ;;  %1929 = vmatprep.subr.bf16.mxu1 %v2212_v0  ;;  %v2056_v47 = vld [vmem:[%s2671_s2 + $0x8] sm:$0xff]   ;;  %v2057_v48 = vld [vmem:[%s2671_s2] sm:$0xff]  }
   0x5   :  { %v2058_v49 = vld [vmem:[%s2672_s3 + $0x8] sm:$0xff]   ;;  %v2059_v50 = vld [vmem:[%s2672_s3] sm:$0xff]  }
   0x6   :  { %v1789_v63 = vld [vmem:[%s2673_s0 + $0x2] sm:$0x3] }
   0x7   :  { %1922 = vmatpush3.bf16.msra.mxu0 %v2054_v3  ;;  %1930 = vmatpush3.bf16.msra.mxu1 %v2055_v4  ;;  %v1795_v4 = vld [vmem:[%s2674_s1 + $0xc] sm:$0x3] }
   0x8   :  { %v66_v5 = vld [vmem:[#allocation2] sm:$0x3]  ;;  %v129_v7 = vld [vmem:[#allocation3] sm:$0x3]  ;;  %1935 = vmatprep.subr.bf16.mxu0 %v2212_v0  ;;  %1943 = vmatprep.subr.bf16.mxu1 %v2212_v0 }
   0x9   :  { %v172_v6 = vld [vmem:[#allocation4] sm:$0x3]  ;;  %v67_v8 = vpack.c.bf16 %v66_v5, %v66_v5  ;;  %138 = vrot.lane.b32.xlu1 %v129_v7, %s2214_s26  ;;  %v234_v10 = vld [vmem:[#allocation5] sm:$0x3] }
   0xa   :  { %v173_v9 = vpack.c.bf16 %v172_v6, %v172_v6 }
   0xb   :  { %1924 = vmatmul.mubr.msk.bf16.vlgmr.msra.gmra.mxu0 %vm84_vm2, %v67_v8 }
   0xc   :  { %1932 = vmatmul.mubr.msk.bf16.vlgmr.msra.gmra.mxu1 %vm84_vm2, %v173_v9  ;;  %1939 = vmatprep.mubr.msk.bf16.mxu0 %vm2213_vm1, %v2212_v0 }
   0xd   :  { %1947 = vmatprep.mubr.msk.bf16.mxu1 %vm2213_vm1, %v2212_v0  ;;  %243 = vrot.lane.b32.xlu1 %v234_v10, %s2214_s26 }
   0xe   :  { %1936 = vmatpush3.bf16.msra.mxu0 %v2056_v47  ;;  %1944 = vmatpush3.bf16.msra.mxu1 %v2058_v49 }
   0xf   :  { %1937 = vmatprep.subr.bf16.mxu0 %v2212_v0  ;;  %1945 = vmatprep.subr.bf16.mxu1 %v2212_v0 }
  0x12   :  { %1938 = vmatpush3.bf16.msra.mxu0 %v2057_v48  ;;  %1946 = vmatpush3.bf16.msra.mxu1 %v2059_v50 }
  0x13   :  { %1951 = vmatprep.subr.bf16.mxu0 %v2212_v0  ;;  %1959 = vmatprep.subr.bf16.mxu1 %v2212_v0 }
  0x7b   :  { %v139_v37 = vpop.permute.xlu1 %138 }
  0x7f   :  { %v244_v39 = vpop.permute.xlu1 %243 }
  0xcb   :  { %v122_v13 = vpop.f32.mrf.mxu0 }
  0xcc   :  { %v227_v14 = vpop.f32.mrf.mxu1  ;;  %v128_v15 = vadd.f32 %v122_v13, %v65_v11 }
  0xcd   :  { %v233_v16 = vadd.f32 %v1783_v12, %v227_v14  ;;  %v1925_v17 = vpop.f32.mrf.mxu0 }
  0xce   :  { %v1933_v18 = vpop.f32.mrf.mxu1  ;;  %2084 = vtanh.f32 %v128_v15  ;;  %v1782_v25 = vmul.f32 -1.442695, %v128_v15 }
  0xcf   :  { %v125_v19 = vpop.f32.mrf.mxu0  ;;  %2086 = vtanh.f32 %v233_v16  ;;  %v1787_v26 = vmul.f32 -1.442695, %v233_v16 }
  0xd0   :  { %v230_v20 = vpop.f32.mrf.mxu1  ;;  %2088 = vpow2.f32 %v1782_v25 }
  0xd1   :  { %v1926_v21 = vpop.f32.mrf.mxu0  ;;  %2090 = vpow2.f32 %v1787_v26 }
  0xd2   :  { %v1934_v22 = vpop.f32.mrf.mxu1 }
  0xdb   :  { %v2085_v23 = vpop.eup %2084 }
  0xdc   :  { %143 = vrot.lane.b32.xlu0 %v2085_v23, %s2215_s6  ;;  %v2087_v24 = vpop.eup %2086 }
  0xdd   :  { %v2089_v27 = vpop.eup %2088 }
  0xde   :  { %v133_v28 = vadd.f32 1.0, %v2089_v27  ;;  %v2091_v29 = vpop.eup %2090 }
  0xdf   :  { %v238_v30 = vadd.f32 1.0, %v2091_v29 }
  0xe0   :  { %248 = vrot.lane.b32.xlu0 %v2087_v24, %s2215_s6  ;;  %2092 = vrcp.f32 %v133_v28 }
  0xe1   :  { %2094 = vrcp.f32 %v238_v30 }
  0xed   :  { %v2093_v31 = vpop.eup %2092 }
  0xee   :  { %v2095_v34 = vpop.eup %2094  ;;  %v141_v38 = vmul.f32 %v2093_v31, %v139_v37 }
  0xef   :  { %v246_v42 = vmul.f32 %v2095_v34, %v244_v39  ;;  %v2061_v39 = vld [vmem:[%s2671_s2] sm:$0xff]  }
 0x14e   :  { %v144_v32 = vpop.permute.xlu0 %143 }
 0x14f   :  { %v146_v33 = vmul.f32 %v2093_v31, %v144_v32 }
 0x151   :  { %148 = vrot.lane.b32.xlu0 %v146_v33, %s2214_s26 }
 0x152   :  { %v249_v35 = vpop.permute.xlu0 %248 }
 0x153   :  { %v251_v36 = vmul.f32 %v2095_v34, %v249_v35 }
 0x155   :  { %253 = vrot.lane.b32.xlu1 %v251_v36, %s2214_s26 }
 0x1c3   :  { %v149_v40 = vpop.permute.xlu0 %148 }
 0x1c4   :  { %v151_v41 = vadd.f32 %v149_v40, %v141_v38  ;;  %v2060_v38 = vld [vmem:[%s2671_s2 + $0x8] sm:$0xff]  }
 0x1c5   :  { %v2062_v40 = vld [vmem:[%s2672_s3 + $0x8] sm:$0xff]  }
 0x1c6   :  { %2096 = vtanh.f32 %v151_v41 }
 0x1c7   :  { %v254_v43 = vpop.permute.xlu1 %253 }
 0x1c8   :  { %v256_v44 = vadd.f32 %v254_v43, %v246_v42 }
 0x1ca   :  { %2098 = vtanh.f32 %v256_v44 }
 0x1d3   :  { %v2097_v45 = vpop.eup %2096 }
 0x1d4   :  { %154 = vrot.lane.b32.xlu0 %v2097_v45, %s2215_s6 }
 0x1d7   :  { %v2099_v46 = vpop.eup %2098 }
 0x1d8   :  { %259 = vrot.lane.b32.xlu1 %v2099_v46, %s2215_s6 }
 0x246   :  { %v155_v51 = vpop.permute.xlu0 %154 }
 0x247   :  { %v157_v52 = vmul.f32 %v2093_v31, %v155_v51 }
 0x249   :  { %159 = vrot.lane.b32.xlu0 %v157_v52, %s2214_s26 }
 0x24a   :  { %v260_v53 = vpop.permute.xlu1 %259 }
 0x24b   :  { %v262_v54 = vmul.f32 %v2095_v34, %v260_v53 }
 0x24d   :  { %264 = vrot.lane.b32.xlu1 %v262_v54, %s2214_s26  ;;  %165 = vrot.lane.b32.xlu0 %v151_v41, %s2216_s15  ;;  %v2063_v41 = vld [vmem:[%s2672_s3] sm:$0xff]  }
 0x24e   :  { %v1801_v54 = vld [vmem:[%s2673_s0 + $0x4] sm:$0x3] }
 0x251   :  { %269 = vrot.lane.b32.xlu1 %v256_v44, %s2216_s15 }
 0x2bb   :  { %v160_v55 = vpop.permute.xlu0 %159 }
 0x2bc   :  { %163 = vst.msk [vmem:[#allocation2] sm:$0x3] %vm60_vm0, %v160_v55  ;;  %169 = vst.msk [vmem:[%s2675_s4] sm:$0x3] %vm60_vm0, %v160_v55 }
 0x2bf   :  { %v265_v56 = vpop.permute.xlu1 %264  ;;  %v166_v57 = vpop.permute.xlu0 %165 }
 0x2c0   :  { %267 = vst.msk [vmem:[#allocation4] sm:$0x3] %vm60_vm0, %v265_v56  ;;  %1788 = vst.msk [vmem:[%s2676_s5 + $0xe] sm:$0x3] %vm60_vm0, %v265_v56 }
 0x2c1   :  { %168 = vst.msk [vmem:[#allocation3] sm:$0x3] %vm60_vm0, %v166_v57 }
 0x2c3   :  { %v270_v58 = vpop.permute.xlu1 %269  ;;  %v277_v59 = vld [vmem:[#allocation2] sm:$0x3] }
 0x2c4   :  { %272 = vst.msk [vmem:[#allocation5] sm:$0x3] %vm60_vm0, %v270_v58  ;;  %v278_v60 = vpack.c.bf16 %v277_v59, %v277_v59  ;;  %v1807_v58 = vld [vmem:[%s2674_s1 + $0xa] sm:$0x3] }
 0x2c6   :  { %1940 = vmatmul.mubr.msk.bf16.vlgmr.msra.gmra.mxu0 %vm84_vm2, %v278_v60 }
 0x2c7   :  { %v382_v61 = vld [vmem:[#allocation4] sm:$0x3]  ;;  %1955 = vmatprep.mubr.msk.bf16.mxu0 %vm2213_vm1, %v2212_v0  ;;  %1952 = vmatpush3.bf16.msra.mxu0 %v2060_v38 }
 0x2c8   :  { %v383_v62 = vpack.c.bf16 %v382_v61, %v382_v61  ;;  %v339_v14 = vld [vmem:[#allocation3] sm:$0x3]  ;;  %1953 = vmatprep.subr.bf16.mxu0 %v2212_v0 }
 0x2ca   :  { %1948 = vmatmul.mubr.msk.bf16.vlgmr.msra.gmra.mxu1 %vm84_vm2, %v383_v62 }
 0x2cb   :  { %1963 = vmatprep.mubr.msk.bf16.mxu1 %vm2213_vm1, %v2212_v0  ;;  %v444_v15 = vld [vmem:[#allocation5] sm:$0x3]  ;;  %1954 = vmatpush3.bf16.msra.mxu0 %v2061_v39 }
 0x2cc   :  { %1960 = vmatpush3.bf16.msra.mxu1 %v2062_v40  ;;  %1967 = vmatprep.subr.bf16.mxu0 %v2212_v0 }
 0x2cd   :  { %1961 = vmatprep.subr.bf16.mxu1 %v2212_v0 }
 0x2d0   :  { %1962 = vmatpush3.bf16.msra.mxu1 %v2063_v41 }
 0x2d1   :  { %1975 = vmatprep.subr.bf16.mxu1 %v2212_v0 }
 0x386   :  { %v332_v1 = vpop.f32.mrf.mxu0 }
 0x387   :  { %v338_v2 = vadd.f32 %v1789_v63, %v332_v1 }
 0x388   :  { %v1941_v3 = vpop.f32.mrf.mxu0 }
 0x389   :  { %2100 = vtanh.f32 %v338_v2  ;;  %v1793_v16 = vmul.f32 -1.442695, %v338_v2 }
 0x38a   :  { %v335_v5 = vpop.f32.mrf.mxu0  ;;  %v437_v6 = vpop.f32.mrf.mxu1 }
 0x38b   :  { %v443_v7 = vadd.f32 %v1795_v4, %v437_v6 }
 0x38c   :  { %v1942_v8 = vpop.f32.mrf.mxu0  ;;  %v1949_v9 = vpop.f32.mrf.mxu1 }
 0x38d   :  { %2102 = vtanh.f32 %v443_v7  ;;  %v1799_v17 = vmul.f32 -1.442695, %v443_v7 }
 0x38e   :  { %v440_v10 = vpop.f32.mrf.mxu1  ;;  %2104 = vpow2.f32 %v1793_v16 }
 0x38f   :  { %2106 = vpow2.f32 %v1799_v17 }
 0x390   :  { %v1950_v11 = vpop.f32.mrf.mxu1 }
 0x396   :  { %v2101_v12 = vpop.eup %2100 }
 0x397   :  { %353 = vrot.lane.b32.xlu0 %v2101_v12, %s2215_s6 }
 0x39a   :  { %v2103_v13 = vpop.eup %2102 }
 0x39b   :  { %458 = vrot.lane.b32.xlu1 %v2103_v13, %s2215_s6  ;;  %348 = vrot.lane.b32.xlu0 %v339_v14, %s2214_s26  ;;  %v2105_v18 = vpop.eup %2104 }
 0x39c   :  { %v343_v19 = vadd.f32 1.0, %v2105_v18  ;;  %v2107_v20 = vpop.eup %2106 }
 0x39d   :  { %v448_v21 = vadd.f32 1.0, %v2107_v20 }
 0x39e   :  { %2108 = vrcp.f32 %v343_v19 }
 0x39f   :  { %453 = vrot.lane.b32.xlu1 %v444_v15, %s2214_s26  ;;  %2110 = vrcp.f32 %v448_v21 }
 0x3ab   :  { %v2109_v22 = vpop.eup %2108 }
 0x3ac   :  { %v2111_v25 = vpop.eup %2110 }
 0x409   :  { %v354_v23 = vpop.permute.xlu0 %353 }
 0x40a   :  { %v356_v24 = vmul.f32 %v2109_v22, %v354_v23 }
 0x40c   :  { %358 = vrot.lane.b32.xlu0 %v356_v24, %s2214_s26 }
 0x40d   :  { %v459_v26 = vpop.permute.xlu1 %458  ;;  %v349_v28 = vpop.permute.xlu0 %348 }
 0x40e   :  { %v461_v27 = vmul.f32 %v2111_v25, %v459_v26  ;;  %v351_v29 = vmul.f32 %v2109_v22, %v349_v28 }
 0x410   :  { %463 = vrot.lane.b32.xlu1 %v461_v27, %s2214_s26 }
 0x411   :  { %v454_v30 = vpop.permute.xlu1 %453 }
 0x412   :  { %v456_v33 = vmul.f32 %v2111_v25, %v454_v30  ;;  %v2065_v30 = vld [vmem:[%s2671_s2] sm:$0xff]  }
 0x47e   :  { %v359_v31 = vpop.permute.xlu0 %358 }
 0x47f   :  { %v361_v32 = vadd.f32 %v359_v31, %v351_v29  ;;  %v2064_v29 = vld [vmem:[%s2671_s2 + $0x8] sm:$0xff]  }
 0x480   :  { %v2066_v31 = vld [vmem:[%s2672_s3 + $0x8] sm:$0xff]  }
 0x481   :  { %2112 = vtanh.f32 %v361_v32 }
 0x482   :  { %v464_v34 = vpop.permute.xlu1 %463 }
 0x483   :  { %v466_v35 = vadd.f32 %v464_v34, %v456_v33 }
 0x485   :  { %2114 = vtanh.f32 %v466_v35 }
 0x48e   :  { %v2113_v36 = vpop.eup %2112 }
 0x48f   :  { %364 = vrot.lane.b32.xlu0 %v2113_v36, %s2215_s6 }
 0x492   :  { %v2115_v37 = vpop.eup %2114 }
 0x493   :  { %469 = vrot.lane.b32.xlu1 %v2115_v37, %s2215_s6 }
 0x501   :  { %v365_v42 = vpop.permute.xlu0 %364 }
 0x502   :  { %v367_v43 = vmul.f32 %v2109_v22, %v365_v42 }
 0x504   :  { %369 = vrot.lane.b32.xlu0 %v367_v43, %s2214_s26 }
 0x505   :  { %v470_v44 = vpop.permute.xlu1 %469 }
 0x506   :  { %v472_v45 = vmul.f32 %v2111_v25, %v470_v44 }
 0x508   :  { %474 = vrot.lane.b32.xlu1 %v472_v45, %s2214_s26  ;;  %374 = vrot.lane.b32.xlu0 %v361_v32, %s2216_s15  ;;  %v2067_v32 = vld [vmem:[%s2672_s3] sm:$0xff]  }
 0x509   :  { %v1813_v45 = vld [vmem:[%s2673_s0 + $0x6] sm:$0x3] }
 0x50c   :  { %479 = vrot.lane.b32.xlu1 %v466_v35, %s2216_s15 }
 0x576   :  { %v370_v46 = vpop.permute.xlu0 %369 }
 0x577   :  { %372 = vst.msk [vmem:[#allocation2] sm:$0x3] %vm60_vm0, %v370_v46  ;;  %1794 = vst.msk [vmem:[%s2675_s4 + $0x2] sm:$0x3] %vm60_vm0, %v370_v46 }
 0x57a   :  { %v475_v47 = vpop.permute.xlu1 %474  ;;  %v375_v48 = vpop.permute.xlu0 %374 }
 0x57b   :  { %477 = vst.msk [vmem:[#allocation4] sm:$0x3] %vm60_vm0, %v475_v47  ;;  %1800 = vst.msk [vmem:[%s2676_s5 + $0xc] sm:$0x3] %vm60_vm0, %v475_v47 }
 0x57c   :  { %377 = vst.msk [vmem:[#allocation3] sm:$0x3] %vm60_vm0, %v375_v48 }
 0x57e   :  { %v480_v49 = vpop.permute.xlu1 %479  ;;  %v487_v50 = vld [vmem:[#allocation2] sm:$0x3] }
 0x57f   :  { %482 = vst.msk [vmem:[#allocation5] sm:$0x3] %vm60_vm0, %v480_v49  ;;  %v488_v51 = vpack.c.bf16 %v487_v50, %v487_v50  ;;  %v1819_v49 = vld [vmem:[%s2674_s1 + $0x8] sm:$0x3] }
 0x581   :  { %1956 = vmatmul.mubr.msk.bf16.vlgmr.msra.gmra.mxu0 %vm84_vm2, %v488_v51 }
 0x582   :  { %v592_v52 = vld [vmem:[#allocation4] sm:$0x3]  ;;  %1971 = vmatprep.mubr.msk.bf16.mxu0 %vm2213_vm1, %v2212_v0  ;;  %1968 = vmatpush3.bf16.msra.mxu0 %v2064_v29 }
 0x583   :  { %v593_v53 = vpack.c.bf16 %v592_v52, %v592_v52  ;;  %v549_v5 = vld [vmem:[#allocation3] sm:$0x3]  ;;  %1969 = vmatprep.subr.bf16.mxu0 %v2212_v0 }
 0x585   :  { %1964 = vmatmul.mubr.msk.bf16.vlgmr.msra.gmra.mxu1 %vm84_vm2, %v593_v53 }
 0x586   :  { %1979 = vmatprep.mubr.msk.bf16.mxu1 %vm2213_vm1, %v2212_v0  ;;  %v654_v6 = vld [vmem:[#allocation5] sm:$0x3]  ;;  %1970 = vmatpush3.bf16.msra.mxu0 %v2065_v30 }
 0x587   :  { %1976 = vmatpush3.bf16.msra.mxu1 %v2066_v31  ;;  %1983 = vmatprep.subr.bf16.mxu0 %v2212_v0 }
 0x588   :  { %1977 = vmatprep.subr.bf16.mxu1 %v2212_v0 }
 0x58b   :  { %1978 = vmatpush3.bf16.msra.mxu1 %v2067_v32 }
 0x58c   :  { %1991 = vmatprep.subr.bf16.mxu1 %v2212_v0 }
 0x641   :  { %v542_v55 = vpop.f32.mrf.mxu0 }
 0x642   :  { %v548_v56 = vadd.f32 %v1801_v54, %v542_v55 }
 0x643   :  { %v1957_v57 = vpop.f32.mrf.mxu0 }
 0x644   :  { %2116 = vtanh.f32 %v548_v56  ;;  %v1805_v7 = vmul.f32 -1.442695, %v548_v56 }
 0x645   :  { %v545_v59 = vpop.f32.mrf.mxu0  ;;  %v647_v60 = vpop.f32.mrf.mxu1 }
 0x646   :  { %v653_v61 = vadd.f32 %v1807_v58, %v647_v60 }
 0x647   :  { %v1958_v62 = vpop.f32.mrf.mxu0  ;;  %v1965_v63 = vpop.f32.mrf.mxu1 }
 0x648   :  { %2118 = vtanh.f32 %v653_v61  ;;  %v1811_v8 = vmul.f32 -1.442695, %v653_v61 }
 0x649   :  { %v650_v1 = vpop.f32.mrf.mxu1  ;;  %2120 = vpow2.f32 %v1805_v7 }
 0x64a   :  { %2122 = vpow2.f32 %v1811_v8 }
 0x64b   :  { %v1966_v2 = vpop.f32.mrf.mxu1 }
 0x651   :  { %v2117_v3 = vpop.eup %2116 }
 0x652   :  { %563 = vrot.lane.b32.xlu0 %v2117_v3, %s2215_s6 }
 0x655   :  { %v2119_v4 = vpop.eup %2118 }
 0x656   :  { %668 = vrot.lane.b32.xlu1 %v2119_v4, %s2215_s6  ;;  %558 = vrot.lane.b32.xlu0 %v549_v5, %s2214_s26  ;;  %v2121_v9 = vpop.eup %2120 }
 0x657   :  { %v553_v10 = vadd.f32 1.0, %v2121_v9  ;;  %v2123_v11 = vpop.eup %2122 }
 0x658   :  { %v658_v12 = vadd.f32 1.0, %v2123_v11 }
 0x659   :  { %2124 = vrcp.f32 %v553_v10 }
 0x65a   :  { %663 = vrot.lane.b32.xlu1 %v654_v6, %s2214_s26  ;;  %2126 = vrcp.f32 %v658_v12 }
 0x666   :  { %v2125_v13 = vpop.eup %2124 }
 0x667   :  { %v2127_v16 = vpop.eup %2126 }
 0x6c4   :  { %v564_v14 = vpop.permute.xlu0 %563 }
 0x6c5   :  { %v566_v15 = vmul.f32 %v2125_v13, %v564_v14 }
 0x6c7   :  { %568 = vrot.lane.b32.xlu0 %v566_v15, %s2214_s26 }
 0x6c8   :  { %v669_v17 = vpop.permute.xlu1 %668  ;;  %v559_v19 = vpop.permute.xlu0 %558 }
 0x6c9   :  { %v671_v18 = vmul.f32 %v2127_v16, %v669_v17  ;;  %v561_v20 = vmul.f32 %v2125_v13, %v559_v19 }
 0x6cb   :  { %673 = vrot.lane.b32.xlu1 %v671_v18, %s2214_s26 }
 0x6cc   :  { %v664_v21 = vpop.permute.xlu1 %663 }
 0x6cd   :  { %v666_v24 = vmul.f32 %v2127_v16, %v664_v21  ;;  %v2069_v21 = vld [vmem:[%s2671_s2] sm:$0xff]  }
 0x739   :  { %v569_v22 = vpop.permute.xlu0 %568 }
 0x73a   :  { %v571_v23 = vadd.f32 %v569_v22, %v561_v20  ;;  %v2068_v20 = vld [vmem:[%s2671_s2 + $0x8] sm:$0xff]  }
 0x73b   :  { %v2070_v22 = vld [vmem:[%s2672_s3 + $0x8] sm:$0xff]  }
 0x73c   :  { %2128 = vtanh.f32 %v571_v23 }
 0x73d   :  { %v674_v25 = vpop.permute.xlu1 %673 }
 0x73e   :  { %v676_v26 = vadd.f32 %v674_v25, %v666_v24 }
 0x740   :  { %2130 = vtanh.f32 %v676_v26 }
 0x749   :  { %v2129_v27 = vpop.eup %2128 }
 0x74a   :  { %574 = vrot.lane.b32.xlu0 %v2129_v27, %s2215_s6 }
 0x74d   :  { %v2131_v28 = vpop.eup %2130 }
 0x74e   :  { %679 = vrot.lane.b32.xlu1 %v2131_v28, %s2215_s6 }
 0x7bc   :  { %v575_v33 = vpop.permute.xlu0 %574 }
 0x7bd   :  { %v577_v34 = vmul.f32 %v2125_v13, %v575_v33 }
 0x7bf   :  { %579 = vrot.lane.b32.xlu0 %v577_v34, %s2214_s26 }
 0x7c0   :  { %v680_v35 = vpop.permute.xlu1 %679 }
 0x7c1   :  { %v682_v36 = vmul.f32 %v2127_v16, %v680_v35 }
 0x7c3   :  { %684 = vrot.lane.b32.xlu1 %v682_v36, %s2214_s26  ;;  %584 = vrot.lane.b32.xlu0 %v571_v23, %s2216_s15  ;;  %v2071_v23 = vld [vmem:[%s2672_s3] sm:$0xff]   ;;  %v1825_v36 = vld [vmem:[%s2673_s0 + $0x8] sm:$0x3] }
 0x7c7   :  { %689 = vrot.lane.b32.xlu1 %v676_v26, %s2216_s15 }
 0x831   :  { %v580_v37 = vpop.permute.xlu0 %579 }
 0x832   :  { %582 = vst.msk [vmem:[#allocation2] sm:$0x3] %vm60_vm0, %v580_v37  ;;  %1806 = vst.msk [vmem:[%s2675_s4 + $0x4] sm:$0x3] %vm60_vm0, %v580_v37 }
 0x835   :  { %v685_v38 = vpop.permute.xlu1 %684  ;;  %v585_v39 = vpop.permute.xlu0 %584 }
 0x836   :  { %687 = vst.msk [vmem:[#allocation4] sm:$0x3] %vm60_vm0, %v685_v38  ;;  %1812 = vst.msk [vmem:[%s2676_s5 + $0xa] sm:$0x3] %vm60_vm0, %v685_v38 }
 0x837   :  { %587 = vst.msk [vmem:[#allocation3] sm:$0x3] %vm60_vm0, %v585_v39 }
 0x839   :  { %v690_v40 = vpop.permute.xlu1 %689  ;;  %v697_v41 = vld [vmem:[#allocation2] sm:$0x3] }
 0x83a   :  { %692 = vst.msk [vmem:[#allocation5] sm:$0x3] %vm60_vm0, %v690_v40  ;;  %v698_v42 = vpack.c.bf16 %v697_v41, %v697_v41  ;;  %v1831_v40 = vld [vmem:[%s2674_s1 + $0x6] sm:$0x3] }
 0x83c   :  { %1972 = vmatmul.mubr.msk.bf16.vlgmr.msra.gmra.mxu0 %vm84_vm2, %v698_v42 }
 0x83d   :  { %v802_v43 = vld [vmem:[#allocation4] sm:$0x3]  ;;  %1987 = vmatprep.mubr.msk.bf16.mxu0 %vm2213_vm1, %v2212_v0  ;;  %1984 = vmatpush3.bf16.msra.mxu0 %v2068_v20 }
 0x83e   :  { %v803_v44 = vpack.c.bf16 %v802_v43, %v802_v43  ;;  %v759_v59 = vld [vmem:[#allocation3] sm:$0x3]  ;;  %1985 = vmatprep.subr.bf16.mxu0 %v2212_v0 }
 0x840   :  { %1980 = vmatmul.mubr.msk.bf16.vlgmr.msra.gmra.mxu1 %vm84_vm2, %v803_v44 }
 0x841   :  { %1995 = vmatprep.mubr.msk.bf16.mxu1 %vm2213_vm1, %v2212_v0  ;;  %v864_v60 = vld [vmem:[#allocation5] sm:$0x3]  ;;  %1986 = vmatpush3.bf16.msra.mxu0 %v2069_v21 }
 0x842   :  { %1992 = vmatpush3.bf16.msra.mxu1 %v2070_v22  ;;  %1999 = vmatprep.subr.bf16.mxu0 %v2212_v0 }
 0x843   :  { %1993 = vmatprep.subr.bf16.mxu1 %v2212_v0 }
 0x846   :  { %1994 = vmatpush3.bf16.msra.mxu1 %v2071_v23 }
 0x847   :  { %2007 = vmatprep.subr.bf16.mxu1 %v2212_v0 }
 0x8fc   :  { %v752_v46 = vpop.f32.mrf.mxu0 }
 0x8fd   :  { %v758_v47 = vadd.f32 %v1813_v45, %v752_v46 }
 0x8fe   :  { %v1973_v48 = vpop.f32.mrf.mxu0 }
 0x8ff   :  { %2132 = vtanh.f32 %v758_v47  ;;  %v1817_v61 = vmul.f32 -1.442695, %v758_v47 }
 0x900   :  { %v755_v50 = vpop.f32.mrf.mxu0  ;;  %v857_v51 = vpop.f32.mrf.mxu1 }
 0x901   :  { %v863_v52 = vadd.f32 %v1819_v49, %v857_v51 }
 0x902   :  { %v1974_v53 = vpop.f32.mrf.mxu0  ;;  %v1981_v54 = vpop.f32.mrf.mxu1 }
 0x903   :  { %2134 = vtanh.f32 %v863_v52  ;;  %v1823_v62 = vmul.f32 -1.442695, %v863_v52 }
 0x904   :  { %v860_v55 = vpop.f32.mrf.mxu1  ;;  %2136 = vpow2.f32 %v1817_v61 }
 0x905   :  { %2138 = vpow2.f32 %v1823_v62 }
 0x906   :  { %v1982_v56 = vpop.f32.mrf.mxu1 }
 0x90c   :  { %v2133_v57 = vpop.eup %2132 }
 0x90d   :  { %773 = vrot.lane.b32.xlu0 %v2133_v57, %s2215_s6 }
 0x910   :  { %v2135_v58 = vpop.eup %2134 }
 0x911   :  { %878 = vrot.lane.b32.xlu1 %v2135_v58, %s2215_s6  ;;  %768 = vrot.lane.b32.xlu0 %v759_v59, %s2214_s26  ;;  %v2137_v63 = vpop.eup %2136 }
 0x912   :  { %v763_v1 = vadd.f32 1.0, %v2137_v63  ;;  %v2139_v2 = vpop.eup %2138 }
 0x913   :  { %v868_v3 = vadd.f32 1.0, %v2139_v2 }
 0x914   :  { %2140 = vrcp.f32 %v763_v1 }
 0x915   :  { %873 = vrot.lane.b32.xlu1 %v864_v60, %s2214_s26  ;;  %2142 = vrcp.f32 %v868_v3 }
 0x921   :  { %v2141_v4 = vpop.eup %2140 }
 0x922   :  { %v2143_v7 = vpop.eup %2142 }
 0x97f   :  { %v774_v5 = vpop.permute.xlu0 %773 }
 0x980   :  { %v776_v6 = vmul.f32 %v2141_v4, %v774_v5 }
 0x982   :  { %778 = vrot.lane.b32.xlu0 %v776_v6, %s2214_s26 }
 0x983   :  { %v879_v8 = vpop.permute.xlu1 %878  ;;  %v769_v10 = vpop.permute.xlu0 %768 }
 0x984   :  { %v881_v9 = vmul.f32 %v2143_v7, %v879_v8  ;;  %v771_v11 = vmul.f32 %v2141_v4, %v769_v10 }
 0x986   :  { %883 = vrot.lane.b32.xlu1 %v881_v9, %s2214_s26 }
 0x987   :  { %v874_v12 = vpop.permute.xlu1 %873 }
 0x988   :  { %v876_v15 = vmul.f32 %v2143_v7, %v874_v12  ;;  %v2073_v12 = vld [vmem:[%s2671_s2] sm:$0xff]  }
 0x9f4   :  { %v779_v13 = vpop.permute.xlu0 %778 }
 0x9f5   :  { %v781_v14 = vadd.f32 %v779_v13, %v771_v11  ;;  %v2072_v11 = vld [vmem:[%s2671_s2 + $0x8] sm:$0xff]  }
 0x9f6   :  { %v2074_v13 = vld [vmem:[%s2672_s3 + $0x8] sm:$0xff]  }
 0x9f7   :  { %2144 = vtanh.f32 %v781_v14 }
 0x9f8   :  { %v884_v16 = vpop.permute.xlu1 %883 }
 0x9f9   :  { %v886_v17 = vadd.f32 %v884_v16, %v876_v15 }
 0x9fb   :  { %2146 = vtanh.f32 %v886_v17 }
 0xa04   :  { %v2145_v18 = vpop.eup %2144 }
 0xa05   :  { %784 = vrot.lane.b32.xlu0 %v2145_v18, %s2215_s6 }
 0xa08   :  { %v2147_v19 = vpop.eup %2146 }
 0xa09   :  { %889 = vrot.lane.b32.xlu1 %v2147_v19, %s2215_s6 }
 0xa77   :  { %v785_v24 = vpop.permute.xlu0 %784 }
 0xa78   :  { %v787_v25 = vmul.f32 %v2141_v4, %v785_v24 }
 0xa7a   :  { %789 = vrot.lane.b32.xlu0 %v787_v25, %s2214_s26 }
 0xa7b   :  { %v890_v26 = vpop.permute.xlu1 %889 }
 0xa7c   :  { %v892_v27 = vmul.f32 %v2143_v7, %v890_v26 }
 0xa7e   :  { %894 = vrot.lane.b32.xlu1 %v892_v27, %s2214_s26  ;;  %794 = vrot.lane.b32.xlu0 %v781_v14, %s2216_s15  ;;  %v2075_v14 = vld [vmem:[%s2672_s3] sm:$0xff]   ;;  %v1837_v27 = vld [vmem:[%s2673_s0 + $0xa] sm:$0x3] }
 0xa82   :  { %899 = vrot.lane.b32.xlu1 %v886_v17, %s2216_s15 }
 0xaec   :  { %v790_v28 = vpop.permute.xlu0 %789 }
 0xaed   :  { %792 = vst.msk [vmem:[#allocation2] sm:$0x3] %vm60_vm0, %v790_v28  ;;  %1818 = vst.msk [vmem:[%s2675_s4 + $0x6] sm:$0x3] %vm60_vm0, %v790_v28 }
 0xaf0   :  { %v895_v29 = vpop.permute.xlu1 %894  ;;  %v795_v30 = vpop.permute.xlu0 %794 }
 0xaf1   :  { %897 = vst.msk [vmem:[#allocation4] sm:$0x3] %vm60_vm0, %v895_v29  ;;  %1824 = vst.msk [vmem:[%s2676_s5 + $0x8] sm:$0x3] %vm60_vm0, %v895_v29 }
 0xaf2   :  { %797 = vst.msk [vmem:[#allocation3] sm:$0x3] %vm60_vm0, %v795_v30 }
 0xaf4   :  { %v900_v31 = vpop.permute.xlu1 %899  ;;  %v907_v32 = vld [vmem:[#allocation2] sm:$0x3] }
 0xaf5   :  { %902 = vst.msk [vmem:[#allocation5] sm:$0x3] %vm60_vm0, %v900_v31  ;;  %v908_v33 = vpack.c.bf16 %v907_v32, %v907_v32  ;;  %v1843_v31 = vld [vmem:[%s2674_s1 + $0x4] sm:$0x3] }
 0xaf7   :  { %1988 = vmatmul.mubr.msk.bf16.vlgmr.msra.gmra.mxu0 %vm84_vm2, %v908_v33 }
 0xaf8   :  { %v1012_v34 = vld [vmem:[#allocation4] sm:$0x3]  ;;  %2003 = vmatprep.mubr.msk.bf16.mxu0 %vm2213_vm1, %v2212_v0  ;;  %2000 = vmatpush3.bf16.msra.mxu0 %v2072_v11 }
 0xaf9   :  { %v1013_v35 = vpack.c.bf16 %v1012_v34, %v1012_v34  ;;  %v969_v50 = vld [vmem:[#allocation3] sm:$0x3]  ;;  %2001 = vmatprep.subr.bf16.mxu0 %v2212_v0 }
 0xafb   :  { %1996 = vmatmul.mubr.msk.bf16.vlgmr.msra.gmra.mxu1 %vm84_vm2, %v1013_v35 }
 0xafc   :  { %2011 = vmatprep.mubr.msk.bf16.mxu1 %vm2213_vm1, %v2212_v0  ;;  %v1074_v51 = vld [vmem:[#allocation5] sm:$0x3]  ;;  %2002 = vmatpush3.bf16.msra.mxu0 %v2073_v12 }
 0xafd   :  { %2008 = vmatpush3.bf16.msra.mxu1 %v2074_v13  ;;  %2015 = vmatprep.subr.bf16.mxu0 %v2212_v0 }
 0xafe   :  { %2009 = vmatprep.subr.bf16.mxu1 %v2212_v0 }
 0xb01   :  { %2010 = vmatpush3.bf16.msra.mxu1 %v2075_v14 }
 0xb02   :  { %2023 = vmatprep.subr.bf16.mxu1 %v2212_v0 }
 0xbb7   :  { %v962_v37 = vpop.f32.mrf.mxu0 }
 0xbb8   :  { %v968_v38 = vadd.f32 %v1825_v36, %v962_v37 }
 0xbb9   :  { %v1989_v39 = vpop.f32.mrf.mxu0 }
 0xbba   :  { %2148 = vtanh.f32 %v968_v38  ;;  %v1829_v52 = vmul.f32 -1.442695, %v968_v38 }
 0xbbb   :  { %v965_v41 = vpop.f32.mrf.mxu0  ;;  %v1067_v42 = vpop.f32.mrf.mxu1 }
 0xbbc   :  { %v1073_v43 = vadd.f32 %v1831_v40, %v1067_v42 }
 0xbbd   :  { %v1990_v44 = vpop.f32.mrf.mxu0  ;;  %v1997_v45 = vpop.f32.mrf.mxu1 }
 0xbbe   :  { %2150 = vtanh.f32 %v1073_v43  ;;  %v1835_v53 = vmul.f32 -1.442695, %v1073_v43 }
 0xbbf   :  { %v1070_v46 = vpop.f32.mrf.mxu1  ;;  %2152 = vpow2.f32 %v1829_v52 }
 0xbc0   :  { %2154 = vpow2.f32 %v1835_v53 }
 0xbc1   :  { %v1998_v47 = vpop.f32.mrf.mxu1 }
 0xbc7   :  { %v2149_v48 = vpop.eup %2148 }
 0xbc8   :  { %983 = vrot.lane.b32.xlu0 %v2149_v48, %s2215_s6 }
 0xbcb   :  { %v2151_v49 = vpop.eup %2150 }
 0xbcc   :  { %1088 = vrot.lane.b32.xlu1 %v2151_v49, %s2215_s6  ;;  %978 = vrot.lane.b32.xlu0 %v969_v50, %s2214_s26  ;;  %v2153_v54 = vpop.eup %2152 }
 0xbcd   :  { %v973_v55 = vadd.f32 1.0, %v2153_v54  ;;  %v2155_v56 = vpop.eup %2154 }
 0xbce   :  { %v1078_v57 = vadd.f32 1.0, %v2155_v56 }
 0xbcf   :  { %2156 = vrcp.f32 %v973_v55 }
 0xbd0   :  { %1083 = vrot.lane.b32.xlu1 %v1074_v51, %s2214_s26  ;;  %2158 = vrcp.f32 %v1078_v57 }
 0xbdc   :  { %v2157_v58 = vpop.eup %2156 }
 0xbdd   :  { %v2159_v61 = vpop.eup %2158 }
 0xc3a   :  { %v984_v59 = vpop.permute.xlu0 %983 }
 0xc3b   :  { %v986_v60 = vmul.f32 %v2157_v58, %v984_v59 }
 0xc3d   :  { %988 = vrot.lane.b32.xlu0 %v986_v60, %s2214_s26 }
 0xc3e   :  { %v1089_v62 = vpop.permute.xlu1 %1088  ;;  %v979_v1 = vpop.permute.xlu0 %978 }
 0xc3f   :  { %v1091_v63 = vmul.f32 %v2159_v61, %v1089_v62  ;;  %v981_v2 = vmul.f32 %v2157_v58, %v979_v1 }
 0xc41   :  { %1093 = vrot.lane.b32.xlu1 %v1091_v63, %s2214_s26 }
 0xc42   :  { %v1084_v3 = vpop.permute.xlu1 %1083 }
 0xc43   :  { %v1086_v6 = vmul.f32 %v2159_v61, %v1084_v3  ;;  %v2077_v3 = vld [vmem:[%s2671_s2] sm:$0xff]  }
 0xcaf   :  { %v989_v4 = vpop.permute.xlu0 %988 }
 0xcb0   :  { %v991_v5 = vadd.f32 %v989_v4, %v981_v2  ;;  %v2076_v2 = vld [vmem:[%s2671_s2 + $0x8] sm:$0xff]  }
 0xcb1   :  { %v2078_v4 = vld [vmem:[%s2672_s3 + $0x8] sm:$0xff]  }
 0xcb2   :  { %2160 = vtanh.f32 %v991_v5 }
 0xcb3   :  { %v1094_v7 = vpop.permute.xlu1 %1093 }
 0xcb4   :  { %v1096_v8 = vadd.f32 %v1094_v7, %v1086_v6 }
 0xcb6   :  { %2162 = vtanh.f32 %v1096_v8 }
 0xcbf   :  { %v2161_v9 = vpop.eup %2160 }
 0xcc0   :  { %994 = vrot.lane.b32.xlu0 %v2161_v9, %s2215_s6 }
 0xcc3   :  { %v2163_v10 = vpop.eup %2162 }
 0xcc4   :  { %1099 = vrot.lane.b32.xlu1 %v2163_v10, %s2215_s6 }
 0xd32   :  { %v995_v15 = vpop.permute.xlu0 %994 }
 0xd33   :  { %v997_v16 = vmul.f32 %v2157_v58, %v995_v15 }
 0xd35   :  { %999 = vrot.lane.b32.xlu0 %v997_v16, %s2214_s26 }
 0xd36   :  { %v1100_v17 = vpop.permute.xlu1 %1099 }
 0xd37   :  { %v1102_v18 = vmul.f32 %v2159_v61, %v1100_v17 }
 0xd39   :  { %1104 = vrot.lane.b32.xlu1 %v1102_v18, %s2214_s26  ;;  %1004 = vrot.lane.b32.xlu0 %v991_v5, %s2216_s15  ;;  %v2079_v5 = vld [vmem:[%s2672_s3] sm:$0xff]   ;;  %v1849_v18 = vld [vmem:[%s2673_s0 + $0xc] sm:$0x3] }
 0xd3d   :  { %1109 = vrot.lane.b32.xlu1 %v1096_v8, %s2216_s15 }
 0xda7   :  { %v1000_v19 = vpop.permute.xlu0 %999 }
 0xda8   :  { %1002 = vst.msk [vmem:[#allocation2] sm:$0x3] %vm60_vm0, %v1000_v19  ;;  %1830 = vst.msk [vmem:[%s2675_s4 + $0x8] sm:$0x3] %vm60_vm0, %v1000_v19 }
 0xdab   :  { %v1105_v20 = vpop.permute.xlu1 %1104  ;;  %v1005_v21 = vpop.permute.xlu0 %1004 }
 0xdac   :  { %1107 = vst.msk [vmem:[#allocation4] sm:$0x3] %vm60_vm0, %v1105_v20  ;;  %1836 = vst.msk [vmem:[%s2676_s5 + $0x6] sm:$0x3] %vm60_vm0, %v1105_v20 }
 0xdad   :  { %1007 = vst.msk [vmem:[#allocation3] sm:$0x3] %vm60_vm0, %v1005_v21 }
 0xdaf   :  { %v1110_v22 = vpop.permute.xlu1 %1109  ;;  %v1117_v23 = vld [vmem:[#allocation2] sm:$0x3] }
 0xdb0   :  { %1112 = vst.msk [vmem:[#allocation5] sm:$0x3] %vm60_vm0, %v1110_v22  ;;  %v1118_v24 = vpack.c.bf16 %v1117_v23, %v1117_v23  ;;  %v1855_v22 = vld [vmem:[%s2674_s1 + $0x2] sm:$0x3] }
 0xdb2   :  { %2004 = vmatmul.mubr.msk.bf16.vlgmr.msra.gmra.mxu0 %vm84_vm2, %v1118_v24 }
 0xdb3   :  { %v1222_v25 = vld [vmem:[#allocation4] sm:$0x3]  ;;  %2019 = vmatprep.mubr.msk.bf16.mxu0 %vm2213_vm1, %v2212_v0  ;;  %2016 = vmatpush3.bf16.msra.mxu0 %v2076_v2 }
 0xdb4   :  { %v1223_v26 = vpack.c.bf16 %v1222_v25, %v1222_v25  ;;  %v1179_v41 = vld [vmem:[#allocation3] sm:$0x3]  ;;  %2017 = vmatprep.subr.bf16.mxu0 %v2212_v0 }
 0xdb6   :  { %2012 = vmatmul.mubr.msk.bf16.vlgmr.msra.gmra.mxu1 %vm84_vm2, %v1223_v26 }
 0xdb7   :  { %2027 = vmatprep.mubr.msk.bf16.mxu1 %vm2213_vm1, %v2212_v0  ;;  %v1284_v42 = vld [vmem:[#allocation5] sm:$0x3]  ;;  %2018 = vmatpush3.bf16.msra.mxu0 %v2077_v3 }
 0xdb8   :  { %2024 = vmatpush3.bf16.msra.mxu1 %v2078_v4  ;;  %2031 = vmatprep.subr.bf16.mxu0 %v2212_v0 }
 0xdb9   :  { %2025 = vmatprep.subr.bf16.mxu1 %v2212_v0 }
 0xdbc   :  { %2026 = vmatpush3.bf16.msra.mxu1 %v2079_v5 }
 0xdbd   :  { %2039 = vmatprep.subr.bf16.mxu1 %v2212_v0 }
 0xe72   :  { %v1172_v28 = vpop.f32.mrf.mxu0 }
 0xe73   :  { %v1178_v29 = vadd.f32 %v1837_v27, %v1172_v28 }
 0xe74   :  { %v2005_v30 = vpop.f32.mrf.mxu0 }
 0xe75   :  { %2164 = vtanh.f32 %v1178_v29  ;;  %v1841_v43 = vmul.f32 -1.442695, %v1178_v29 }
 0xe76   :  { %v1175_v32 = vpop.f32.mrf.mxu0  ;;  %v1277_v33 = vpop.f32.mrf.mxu1 }
 0xe77   :  { %v1283_v34 = vadd.f32 %v1843_v31, %v1277_v33 }
 0xe78   :  { %v2006_v35 = vpop.f32.mrf.mxu0  ;;  %v2013_v36 = vpop.f32.mrf.mxu1 }
 0xe79   :  { %2166 = vtanh.f32 %v1283_v34  ;;  %v1847_v44 = vmul.f32 -1.442695, %v1283_v34 }
 0xe7a   :  { %v1280_v37 = vpop.f32.mrf.mxu1  ;;  %2168 = vpow2.f32 %v1841_v43 }
 0xe7b   :  { %2170 = vpow2.f32 %v1847_v44 }
 0xe7c   :  { %v2014_v38 = vpop.f32.mrf.mxu1 }
 0xe82   :  { %v2165_v39 = vpop.eup %2164 }
 0xe83   :  { %1193 = vrot.lane.b32.xlu0 %v2165_v39, %s2215_s6 }
 0xe86   :  { %v2167_v40 = vpop.eup %2166 }
 0xe87   :  { %1298 = vrot.lane.b32.xlu1 %v2167_v40, %s2215_s6  ;;  %1188 = vrot.lane.b32.xlu0 %v1179_v41, %s2214_s26  ;;  %v2169_v45 = vpop.eup %2168 }
 0xe88   :  { %v1183_v46 = vadd.f32 1.0, %v2169_v45  ;;  %v2171_v47 = vpop.eup %2170 }
 0xe89   :  { %v1288_v48 = vadd.f32 1.0, %v2171_v47 }
 0xe8a   :  { %2172 = vrcp.f32 %v1183_v46 }
 0xe8b   :  { %1293 = vrot.lane.b32.xlu1 %v1284_v42, %s2214_s26  ;;  %2174 = vrcp.f32 %v1288_v48 }
 0xe97   :  { %v2173_v49 = vpop.eup %2172 }
 0xe98   :  { %v2175_v52 = vpop.eup %2174 }
 0xef5   :  { %v1194_v50 = vpop.permute.xlu0 %1193 }
 0xef6   :  { %v1196_v51 = vmul.f32 %v2173_v49, %v1194_v50 }
 0xef8   :  { %1198 = vrot.lane.b32.xlu0 %v1196_v51, %s2214_s26 }
 0xef9   :  { %v1299_v53 = vpop.permute.xlu1 %1298  ;;  %v1189_v55 = vpop.permute.xlu0 %1188 }
 0xefa   :  { %v1301_v54 = vmul.f32 %v2175_v52, %v1299_v53  ;;  %v1191_v56 = vmul.f32 %v2173_v49, %v1189_v55 }
 0xefc   :  { %1303 = vrot.lane.b32.xlu1 %v1301_v54, %s2214_s26 }
 0xefd   :  { %v1294_v57 = vpop.permute.xlu1 %1293 }
 0xefe   :  { %v1296_v60 = vmul.f32 %v2175_v52, %v1294_v57  ;;  %v2081_v57 = vld [vmem:[%s2671_s2] sm:$0xff]  }
 0xf6a   :  { %v1199_v58 = vpop.permute.xlu0 %1198 }
 0xf6b   :  { %v1201_v59 = vadd.f32 %v1199_v58, %v1191_v56  ;;  %v2080_v56 = vld [vmem:[%s2671_s2 + $0x8] sm:$0xff]  }
 0xf6c   :  { %v2082_v58 = vld [vmem:[%s2672_s3 + $0x8] sm:$0xff]  }
 0xf6d   :  { %2176 = vtanh.f32 %v1201_v59 }
 0xf6e   :  { %v1304_v61 = vpop.permute.xlu1 %1303 }
 0xf6f   :  { %v1306_v62 = vadd.f32 %v1304_v61, %v1296_v60 }
 0xf71   :  { %2178 = vtanh.f32 %v1306_v62 }
 0xf7a   :  { %v2177_v63 = vpop.eup %2176 }
 0xf7b   :  { %1204 = vrot.lane.b32.xlu0 %v2177_v63, %s2215_s6 }
 0xf7e   :  { %v2179_v1 = vpop.eup %2178 }
 0xf7f   :  { %1309 = vrot.lane.b32.xlu1 %v2179_v1, %s2215_s6 }
 0xfed   :  { %v1205_v6 = vpop.permute.xlu0 %1204 }
 0xfee   :  { %v1207_v7 = vmul.f32 %v2173_v49, %v1205_v6 }
 0xff0   :  { %1209 = vrot.lane.b32.xlu0 %v1207_v7, %s2214_s26 }
 0xff1   :  { %v1310_v8 = vpop.permute.xlu1 %1309 }
 0xff2   :  { %v1312_v9 = vmul.f32 %v2175_v52, %v1310_v8  ;;  %v1861_v8 = vld [vmem:[%s2673_s0 + $0xe] sm:$0x3] }
 0xff4   :  { %1314 = vrot.lane.b32.xlu1 %v1312_v9, %s2214_s26  ;;  %1214 = vrot.lane.b32.xlu0 %v1201_v59, %s2216_s15  ;;  %v2083_v59 = vld [vmem:[%s2672_s3] sm:$0xff]  }
 0xff8   :  { %1319 = vrot.lane.b32.xlu1 %v1306_v62, %s2216_s15 }
0x1062   :  { %v1210_v10 = vpop.permute.xlu0 %1209 }
0x1063   :  { %1212 = vst.msk [vmem:[#allocation2] sm:$0x3] %vm60_vm0, %v1210_v10  ;;  %1842 = vst.msk [vmem:[%s2675_s4 + $0xa] sm:$0x3] %vm60_vm0, %v1210_v10 }
0x1066   :  { %v1315_v11 = vpop.permute.xlu1 %1314  ;;  %v1215_v12 = vpop.permute.xlu0 %1214 }
0x1067   :  { %1317 = vst.msk [vmem:[#allocation4] sm:$0x3] %vm60_vm0, %v1315_v11  ;;  %1848 = vst.msk [vmem:[%s2676_s5 + $0x4] sm:$0x3] %vm60_vm0, %v1315_v11 }
0x1068   :  { %1217 = vst.msk [vmem:[#allocation3] sm:$0x3] %vm60_vm0, %v1215_v12  ;;  %v1640_v12 = vld [vmem:[%s2674_s1] sm:$0x3] }
0x106a   :  { %v1320_v13 = vpop.permute.xlu1 %1319  ;;  %v1327_v14 = vld [vmem:[#allocation2] sm:$0x3] }
0x106b   :  { %1322 = vst.msk [vmem:[#allocation5] sm:$0x3] %vm60_vm0, %v1320_v13  ;;  %v1328_v15 = vpack.c.bf16 %v1327_v14, %v1327_v14 }
0x106d   :  { %2020 = vmatmul.mubr.msk.bf16.vlgmr.msra.gmra.mxu0 %vm84_vm2, %v1328_v15 }
0x106e   :  { %v1432_v16 = vld [vmem:[#allocation4] sm:$0x3]  ;;  %2035 = vmatprep.mubr.msk.bf16.mxu0 %vm2213_vm1, %v2212_v0  ;;  %2032 = vmatpush3.bf16.msra.mxu0 %v2080_v56 }
0x106f   :  { %v1433_v17 = vpack.c.bf16 %v1432_v16, %v1432_v16  ;;  %v1389_v32 = vld [vmem:[#allocation3] sm:$0x3]  ;;  %2033 = vmatprep.subr.bf16.mxu0 %v2212_v0 }
0x1071   :  { %2028 = vmatmul.mubr.msk.bf16.vlgmr.msra.gmra.mxu1 %vm84_vm2, %v1433_v17 }
0x1072   :  { %2043 = vmatprep.mubr.msk.bf16.mxu1 %vm2213_vm1, %v2212_v0  ;;  %v1494_v33 = vld [vmem:[#allocation5] sm:$0x3]  ;;  %2034 = vmatpush3.bf16.msra.mxu0 %v2081_v57 }
0x1073   :  { %2040 = vmatpush3.bf16.msra.mxu1 %v2082_v58 }
0x1074   :  { %2041 = vmatprep.subr.bf16.mxu1 %v2212_v0 }
0x1077   :  { %2042 = vmatpush3.bf16.msra.mxu1 %v2083_v59 }
0x112d   :  { %v1382_v19 = vpop.f32.mrf.mxu0 }
0x112e   :  { %v1388_v20 = vadd.f32 %v1849_v18, %v1382_v19 }
0x112f   :  { %v2021_v21 = vpop.f32.mrf.mxu0 }
0x1130   :  { %2180 = vtanh.f32 %v1388_v20  ;;  %v1853_v34 = vmul.f32 -1.442695, %v1388_v20 }
0x1131   :  { %v1385_v23 = vpop.f32.mrf.mxu0  ;;  %v1487_v24 = vpop.f32.mrf.mxu1 }
0x1132   :  { %v1493_v25 = vadd.f32 %v1855_v22, %v1487_v24 }
0x1133   :  { %v2022_v26 = vpop.f32.mrf.mxu0  ;;  %v2029_v27 = vpop.f32.mrf.mxu1 }
0x1134   :  { %2182 = vtanh.f32 %v1493_v25  ;;  %v1859_v35 = vmul.f32 -1.442695, %v1493_v25 }
0x1135   :  { %v1490_v28 = vpop.f32.mrf.mxu1  ;;  %2184 = vpow2.f32 %v1853_v34 }
0x1136   :  { %2186 = vpow2.f32 %v1859_v35 }
0x1137   :  { %v2030_v29 = vpop.f32.mrf.mxu1 }
0x113d   :  { %v2181_v30 = vpop.eup %2180 }
0x113e   :  { %1403 = vrot.lane.b32.xlu0 %v2181_v30, %s2215_s6 }
0x1141   :  { %v2183_v31 = vpop.eup %2182 }
0x1142   :  { %1508 = vrot.lane.b32.xlu1 %v2183_v31, %s2215_s6  ;;  %1398 = vrot.lane.b32.xlu0 %v1389_v32, %s2214_s26  ;;  %v2185_v36 = vpop.eup %2184 }
0x1143   :  { %v1393_v37 = vadd.f32 1.0, %v2185_v36  ;;  %v2187_v38 = vpop.eup %2186 }
0x1144   :  { %v1498_v39 = vadd.f32 1.0, %v2187_v38 }
0x1145   :  { %2188 = vrcp.f32 %v1393_v37 }
0x1146   :  { %1503 = vrot.lane.b32.xlu1 %v1494_v33, %s2214_s26  ;;  %2190 = vrcp.f32 %v1498_v39 }
0x1152   :  { %v2189_v40 = vpop.eup %2188 }
0x1153   :  { %v2191_v43 = vpop.eup %2190 }
0x11b0   :  { %v1404_v41 = vpop.permute.xlu0 %1403 }
0x11b1   :  { %v1406_v42 = vmul.f32 %v2189_v40, %v1404_v41 }
0x11b3   :  { %1408 = vrot.lane.b32.xlu0 %v1406_v42, %s2214_s26 }
0x11b4   :  { %v1509_v44 = vpop.permute.xlu1 %1508  ;;  %v1399_v46 = vpop.permute.xlu0 %1398 }
0x11b5   :  { %v1511_v45 = vmul.f32 %v2191_v43, %v1509_v44  ;;  %v1401_v47 = vmul.f32 %v2189_v40, %v1399_v46 }
0x11b7   :  { %1513 = vrot.lane.b32.xlu1 %v1511_v45, %s2214_s26 }
0x11b8   :  { %v1504_v48 = vpop.permute.xlu1 %1503 }
0x11b9   :  { %v1506_v51 = vmul.f32 %v2191_v43, %v1504_v48 }
0x1225   :  { %v1409_v49 = vpop.permute.xlu0 %1408 }
0x1226   :  { %v1411_v50 = vadd.f32 %v1409_v49, %v1401_v47 }
0x1228   :  { %2192 = vtanh.f32 %v1411_v50 }
0x1229   :  { %v1514_v52 = vpop.permute.xlu1 %1513 }
0x122a   :  { %v1516_v53 = vadd.f32 %v1514_v52, %v1506_v51 }
0x122c   :  { %2194 = vtanh.f32 %v1516_v53 }
0x1235   :  { %v2193_v54 = vpop.eup %2192 }
0x1236   :  { %1414 = vrot.lane.b32.xlu0 %v2193_v54, %s2215_s6 }
0x1239   :  { %v2195_v55 = vpop.eup %2194 }
0x123a   :  { %1519 = vrot.lane.b32.xlu1 %v2195_v55, %s2215_s6 }
0x12a8   :  { %v1415_v60 = vpop.permute.xlu0 %1414 }
0x12a9   :  { %v1417_v61 = vmul.f32 %v2189_v40, %v1415_v60 }
0x12ab   :  { %1419 = vrot.lane.b32.xlu0 %v1417_v61, %s2214_s26 }
0x12ac   :  { %v1520_v62 = vpop.permute.xlu1 %1519 }
0x12ad   :  { %v1522_v63 = vmul.f32 %v2191_v43, %v1520_v62 }
0x12af   :  { %1524 = vrot.lane.b32.xlu1 %v1522_v63, %s2214_s26  ;;  %1424 = vrot.lane.b32.xlu0 %v1411_v50, %s2216_s15 }
0x12b3   :  { %1529 = vrot.lane.b32.xlu1 %v1516_v53, %s2216_s15 }
0x131d   :  { %v1420_v1 = vpop.permute.xlu0 %1419 }
0x131e   :  { %1422 = vst.msk [vmem:[#allocation2] sm:$0x3] %vm60_vm0, %v1420_v1  ;;  %1854 = vst.msk [vmem:[%s2675_s4 + $0xc] sm:$0x3] %vm60_vm0, %v1420_v1 }
0x1321   :  { %v1525_v0 = vpop.permute.xlu1 %1524  ;;  %v1425_v2 = vpop.permute.xlu0 %1424 }
0x1322   :  { %1527 = vst.msk [vmem:[#allocation4] sm:$0x3] %vm60_vm0, %v1525_v0  ;;  %1860 = vst.msk [vmem:[%s2676_s5 + $0x2] sm:$0x3] %vm60_vm0, %v1525_v0 }
0x1323   :  { %1427 = vst.msk [vmem:[#allocation3] sm:$0x3] %vm60_vm0, %v1425_v2 }
0x1325   :  { %v1530_v3 = vpop.permute.xlu1 %1529  ;;  %v1537_v4 = vld [vmem:[#allocation2] sm:$0x3] }
0x1326   :  { %1532 = vst.msk [vmem:[#allocation5] sm:$0x3] %vm60_vm0, %v1530_v3  ;;  %v1538_v5 = vpack.c.bf16 %v1537_v4, %v1537_v4 }
0x1328   :  { %2036 = vmatmul.mubr.msk.bf16.vlgmr.msra.gmra.mxu0 %vm84_vm2, %v1538_v5 }
0x1329   :  { %v1641_v6 = vld [vmem:[#allocation4] sm:$0x3] }
0x132a   :  { %v1642_v7 = vpack.c.bf16 %v1641_v6, %v1641_v6  ;;  %v1599_v22 = vld [vmem:[#allocation3] sm:$0x3] }
0x132c   :  { %2044 = vmatmul.mubr.msk.bf16.vlgmr.msra.gmra.mxu1 %vm84_vm2, %v1642_v7 }
0x132d   :  { %v1703_v23 = vld [vmem:[#allocation5] sm:$0x3] }
0x13e8   :  { %v1592_v9 = vpop.f32.mrf.mxu0 }
0x13e9   :  { %v1598_v10 = vadd.f32 %v1861_v8, %v1592_v9 }
0x13ea   :  { %v2037_v11 = vpop.f32.mrf.mxu0 }
0x13eb   :  { %2196 = vtanh.f32 %v1598_v10  ;;  %v1865_v24 = vmul.f32 -1.442695, %v1598_v10 }
0x13ec   :  { %v1595_v13 = vpop.f32.mrf.mxu0  ;;  %v1696_v14 = vpop.f32.mrf.mxu1 }
0x13ed   :  { %v1702_v15 = vadd.f32 %v1696_v14, %v1640_v12 }
0x13ee   :  { %v2038_v16 = vpop.f32.mrf.mxu0  ;;  %v2045_v17 = vpop.f32.mrf.mxu1 }
0x13ef   :  { %2198 = vtanh.f32 %v1702_v15  ;;  %v1870_v25 = vmul.f32 -1.442695, %v1702_v15 }
0x13f0   :  { %v1699_v18 = vpop.f32.mrf.mxu1  ;;  %2200 = vpow2.f32 %v1865_v24 }
0x13f1   :  { %2202 = vpow2.f32 %v1870_v25 }
0x13f2   :  { %v2046_v19 = vpop.f32.mrf.mxu1 }
0x13f8   :  { %v2197_v20 = vpop.eup %2196 }
0x13f9   :  { %1613 = vrot.lane.b32.xlu0 %v2197_v20, %s2215_s6 }
0x13fc   :  { %v2199_v21 = vpop.eup %2198 }
0x13fd   :  { %1717 = vrot.lane.b32.xlu1 %v2199_v21, %s2215_s6  ;;  %1608 = vrot.lane.b32.xlu0 %v1599_v22, %s2214_s26  ;;  %v2201_v26 = vpop.eup %2200 }
0x13fe   :  { %v1603_v27 = vadd.f32 1.0, %v2201_v26  ;;  %v2203_v28 = vpop.eup %2202 }
0x13ff   :  { %v1707_v29 = vadd.f32 1.0, %v2203_v28 }
0x1400   :  { %2204 = vrcp.f32 %v1603_v27 }
0x1401   :  { %1712 = vrot.lane.b32.xlu1 %v1703_v23, %s2214_s26  ;;  %2206 = vrcp.f32 %v1707_v29 }
0x140d   :  { %v2205_v30 = vpop.eup %2204 }
0x140e   :  { %v2207_v33 = vpop.eup %2206 }
0x146b   :  { %v1614_v31 = vpop.permute.xlu0 %1613 }
0x146c   :  { %v1616_v32 = vmul.f32 %v2205_v30, %v1614_v31 }
0x146e   :  { %1618 = vrot.lane.b32.xlu0 %v1616_v32, %s2214_s26 }
0x146f   :  { %v1718_v34 = vpop.permute.xlu1 %1717  ;;  %v1609_v36 = vpop.permute.xlu0 %1608 }
0x1470   :  { %v1720_v35 = vmul.f32 %v2207_v33, %v1718_v34  ;;  %v1611_v37 = vmul.f32 %v2205_v30, %v1609_v36 }
0x1472   :  { %1722 = vrot.lane.b32.xlu1 %v1720_v35, %s2214_s26 }
0x1473   :  { %v1713_v38 = vpop.permute.xlu1 %1712 }
0x1474   :  { %v1715_v41 = vmul.f32 %v2207_v33, %v1713_v38 }
0x14e0   :  { %v1619_v39 = vpop.permute.xlu0 %1618 }
0x14e1   :  { %v1621_v40 = vadd.f32 %v1619_v39, %v1611_v37 }
0x14e3   :  { %2208 = vtanh.f32 %v1621_v40 }
0x14e4   :  { %v1723_v42 = vpop.permute.xlu1 %1722 }
0x14e5   :  { %v1725_v43 = vadd.f32 %v1723_v42, %v1715_v41 }
0x14e7   :  { %2210 = vtanh.f32 %v1725_v43 }
0x14f0   :  { %v2209_v44 = vpop.eup %2208 }
0x14f1   :  { %1624 = vrot.lane.b32.xlu0 %v2209_v44, %s2215_s6 }
0x14f4   :  { %v2211_v45 = vpop.eup %2210 }
0x14f5   :  { %1728 = vrot.lane.b32.xlu1 %v2211_v45, %s2215_s6 }
0x14f9   :  { %1634 = vrot.lane.b32.xlu1 %v1621_v40, %s2216_s15 }
0x14fd   :  { %1738 = vrot.lane.b32.xlu1 %v1725_v43, %s2216_s15 }
0x1563   :  { %v1625_v46 = vpop.permute.xlu0 %1624 }
0x1564   :  { %v1627_v47 = vmul.f32 %v2205_v30, %v1625_v46 }
0x1566   :  { %1629 = vrot.lane.b32.xlu0 %v1627_v47, %s2214_s26 }
0x1567   :  { %v1729_v48 = vpop.permute.xlu1 %1728 }
0x1568   :  { %v1731_v49 = vmul.f32 %v2207_v33, %v1729_v48 }
0x156a   :  { %1733 = vrot.lane.b32.xlu0 %v1731_v49, %s2214_s26 }
0x156b   :  { %v1635_v50 = vpop.permute.xlu1 %1634 }
0x156c   :  { %1637 = vst.msk [vmem:[#allocation3] sm:$0x3] %vm60_vm0, %v1635_v50 }
0x156f   :  { %v1739_v51 = vpop.permute.xlu1 %1738 }
0x1570   :  { %1741 = vst.msk [vmem:[#allocation5] sm:$0x3] %vm60_vm0, %v1739_v51 }
0x15d8   :  { %v1630_v52 = vpop.permute.xlu0 %1629 }
0x15d9   :  { %1632 = vst.msk [vmem:[#allocation2] sm:$0x3] %vm60_vm0, %v1630_v52  ;;  %1866 = vst.msk [vmem:[%s2675_s4 + $0xe] sm:$0x3] %vm60_vm0, %v1630_v52 }
0x15dc   :  { %v1734_v53 = vpop.permute.xlu0 %1733 }
0x15dd   :  { %1736 = vst.msk [vmem:[#allocation4] sm:$0x3] %vm60_vm0, %v1734_v53  ;;  %1742 = vst.msk [vmem:[%s2676_s5] sm:$0x3] %vm60_vm0, %v1734_v53 }

</bundles_post_ra>
